<compile_context>
chip_gen: v7x
topology: tpu7x:2x2x1
jax: 0.10.0
libtpu: 0.0.40
codegen_flags: <defaults>
</compile_context>

<pallas_src>
import functools
import math

import jax
import jax.numpy as jnp
from jax.experimental import pallas as pl
from jax.experimental.pallas import tpu as pltpu

BN_EPS = 1e-5


# ----------------------------------------------------------------------------------
# In-kernel building block: Conv1d + folded BN (+ residual) (+ ReLU), one batch element
# ----------------------------------------------------------------------------------
def _conv_bn(xb, sel_ref, w_ref, b_ref, *, relu, residual=None):
    """xb:      (L_in, C_in)  bf16 activation value (in vregs/VMEM).
       sel_ref: (K, L_out, L_in) bf16 ref of 0/1 tap-selection matrices (host constants).
       w_ref:   (K, C_in, C_out) bf16 ref; BN scale folded in.
       b_ref:   (1, C_out) f32 ref; folded BN bias.
       Returns: (L_out, C_out) f32.
    """
    K, _, c_out = w_ref.shape
    l_out = sel_ref.shape[1]

    acc = jnp.zeros((l_out, c_out), jnp.float32)
    for k in range(K):                    # unrolled; K is 1, 3 or 15 (static)
        # Gather (shift/stride/zero-pad) via MXU: exact 0/1 selection in bf16.
        xk = jnp.dot(sel_ref[k], xb,
                     preferred_element_type=jnp.float32).astype(jnp.bfloat16)
        acc = acc + jnp.dot(xk, w_ref[k], preferred_element_type=jnp.float32)

    y = acc + b_ref[...]
    if residual is not None:
        y = y + residual
    if relu:
        y = jnp.maximum(y, 0.0)
    return y


def _make_kernel(block_meta, program, n_sel):
    """block_meta: tuple of (stride, has_downsample) per BasicBlock, in network order.
       program:    static dict mapping each conv to its dedup'd selection-matrix index."""

    def kernel(x_ref, *refs):
        o_ref = refs[-1]
        sel_refs = refs[:n_sel]
        prm = refs[n_sel:-1]

        def get(i):
            return prm[2 * i], prm[2 * i + 1]

        pi = 0
        xb = x_ref[0].astype(jnp.bfloat16)            # (L, C_in) for this batch element

        # Stem: conv(k=15, s=2, p=3) + BN + ReLU.  Dropout(p=0.5) == identity in eval.
        w, b = get(pi); pi += 1
        x = _conv_bn(xb, sel_refs[program["stem"]], w, b, relu=True)

        # BasicBlocks: relu(bn2(conv2(relu(bn1(conv1(x))))) + identity)
        for (stride, has_ds), entry in zip(block_meta, program["blocks"]):
            xb = x.astype(jnp.bfloat16)               # cast once, shared by both paths
            if has_ds:
                wd, bd = get(pi); pi += 1
                identity = _conv_bn(xb, sel_refs[entry["ds"]], wd, bd, relu=False)
            else:
                identity = x
            w1, b1 = get(pi); pi += 1
            h = _conv_bn(xb, sel_refs[entry["conv1"]], w1, b1, relu=True)
            w2, b2 = get(pi); pi += 1
            x = _conv_bn(h.astype(jnp.bfloat16), sel_refs[entry["conv2"]], w2, b2,
                         relu=True, residual=identity)

        # AdaptiveAvgPool1d(1) + flatten; embed_only=True -> no fc head.
        emb = jnp.sum(x, axis=0, keepdims=True) * (1.0 / x.shape[0])       # (1, 256)
        o_ref[...] = emb.reshape(1, 1, emb.shape[-1]).astype(o_ref.dtype)

    return kernel


# ----------------------------------------------------------------------------------
# Host-side preprocessing
# ----------------------------------------------------------------------------------
def _build_sels(L, block_meta):
    """Build dedup'd 0/1 tap-selection matrices for every conv in the network."""
    cache, arrays = {}, []

    def get(l_in, K, stride, padding):
        l_out = (l_in + 2 * padding - K) // stride + 1
        key = (l_in, K, stride, padding)
        if key not in cache:
            t = jnp.arange(l_out, dtype=jnp.int32)[:, None]
            j = jnp.arange(l_in, dtype=jnp.int32)[None, :]
            taps = [(j == stride * t + (k - padding)).astype(jnp.bfloat16)
                    for k in range(K)]
            cache[key] = len(arrays)
            arrays.append(jnp.stack(taps, axis=0))        # (K, l_out, l_in)
        return cache[key], l_out

    program = {"blocks": []}
    program["stem"], l = get(L, 15, 2, 3)
    for stride, has_ds in block_meta:
        entry = {}
        if has_ds:
            entry["ds"], _ = get(l, 1, stride, 0)
        entry["conv1"], l1 = get(l, 3, stride, 1)
        entry["conv2"], l = get(l1, 3, 1, 1)
        program["blocks"].append(entry)
    assert l >= 1
    return arrays, program


def prepare_params(params):
    """One-time weight prep: fold BN into conv weights, transpose to (K,Cin,Cout), bf16."""
    def prep(w, bn):
        scale = (bn["gamma"] / jnp.sqrt(bn["var"] + BN_EPS)).astype(jnp.float32)   # (Cout,)
        bias = (bn["beta"] - bn["mean"] * scale).astype(jnp.float32)[None, :]      # (1, Cout)
        w_taps = jnp.transpose(w, (2, 1, 0)).astype(jnp.float32) * scale[None, None, :]
        return [w_taps.astype(jnp.bfloat16), bias]

    flat = list(prep(params["conv1_w"], params["bn1"]))
    block_meta = []
    for blocks in params["layers"]:
        for blk in blocks:
            has_ds = "ds_w" in blk
            block_meta.append((blk["stride"], has_ds))
            if has_ds:
                flat += prep(blk["ds_w"], blk["ds_bn"])
            flat += prep(blk["conv1_w"], blk["bn1"])
            flat += prep(blk["conv2_w"], blk["bn2"])
    return flat, tuple(block_meta)


def _const_index_map(ndim, b):
    return (0,) * ndim


def resnet_forward(x_ncl, flat, block_meta):
    """x_ncl: PyTorch-style (B, C_in, L) input.  Returns (B, 256) embeddings."""
    x = jnp.transpose(x_ncl, (0, 2, 1)).astype(jnp.float32)     # channels-last (B, L, C)
    B, L, C = x.shape
    c_out = flat[-1].shape[-1]

    sels, program = _build_sels(L, block_meta)

    in_specs = [pl.BlockSpec((1, L, C), lambda b: (b, 0, 0))]
    for arr in list(sels) + list(flat):    # constants: full-array block, same every step
        in_specs.append(pl.BlockSpec(arr.shape, functools.partial(_const_index_map, arr.ndim)))

    out = pl.pallas_call(
        _make_kernel(block_meta, program, len(sels)),
        out_shape=jax.ShapeDtypeStruct((B, 1, c_out), jnp.float32),
        grid=(B,),
        in_specs=in_specs,
        out_specs=pl.BlockSpec((1, 1, c_out), lambda b: (b, 0, 0)),
        compiler_params=pltpu.CompilerParams(dimension_semantics=("parallel",)),
    )(x, *sels, *flat)
    return out.reshape(B, c_out)


# ----------------------------------------------------------------------------------
# Deterministic parameter construction (kaiming_normal fan_out, BN weight=1 / bias=0)
# ----------------------------------------------------------------------------------
def _kaiming_conv(key, cout, cin, k):
    std = math.sqrt(2.0 / (cout * k))            # mode='fan_out', relu gain
    return jax.random.normal(key, (cout, cin, k), jnp.float32) * std


def _bn_params(c):
    return dict(gamma=jnp.ones((c,), jnp.float32), beta=jnp.zeros((c,), jnp.float32),
                mean=jnp.zeros((c,), jnp.float32), var=jnp.ones((c,), jnp.float32))


def init_resnet_params(key, layers=(1, 1, 1, 1), num_channels=12):
    keys = iter(jax.random.split(key, 128))
    params = {"conv1_w": _kaiming_conv(next(keys), 32, num_channels, 15),
              "bn1": _bn_params(32), "layers": []}
    inplanes = 32
    for planes, nblocks, stride in zip((32, 64, 128, 256), layers, (1, 2, 2, 2)):
        blocks = []
        for b in range(nblocks):
            s = stride if b == 0 else 1
            blk = {
                "conv1_w": _kaiming_conv(next(keys), planes, inplanes, 3),
                "bn1": _bn_params(planes),
                "conv2_w": _kaiming_conv(next(keys), planes, planes, 3),
                "bn2": _bn_params(planes),
                "stride": s,
            }
            if s != 1 or inplanes != planes:     # BasicBlock expansion == 1
                blk["ds_w"] = _kaiming_conv(next(keys), planes, inplanes, 1)
                blk["ds_bn"] = _bn_params(planes)
            blocks.append(blk)
            inplanes = planes
        params["layers"].append(blocks)
    return params


# ----------------------------------------------------------------------------------
if __name__ == "__main__":
    key = jax.random.PRNGKey(0)
    pkey, xkey = jax.random.split(key)

    # ResNet(BasicBlock, layers=[1,1,1,1], num_channels=12, embed_only=True)
    params = init_resnet_params(pkey, layers=(1, 1, 1, 1), num_channels=12)
    flat, block_meta = prepare_params(params)    # one-time: BN folded, bf16 weights

    # PyTorch-style input: (batch, channels, length) = (2, 12, 64)
    x = jax.random.normal(xkey, (2, 12, 64), jnp.float32)

    # TODO(synk): nn.Dropout(p=0.5) is treated as inference-mode identity (no RNG mask).
    forward = jax.jit(lambda inp, prm: resnet_forward(inp, prm, block_meta))
    emb = forward(x, flat)
    jax.block_until_ready(emb)
    assert emb.shape == (2, 256), emb.shape
    print("KERNEL_OK")
</pallas_src>

<mosaic_0001>
module attributes {stable_mosaic.version = 11 : i64} {
  func.func @kernel(%arg0: i32, %arg1: memref<1x64x12xf32, #tpu.memory_space<vmem>>, %arg2: memref<15x28x64xbf16, #tpu.memory_space<vmem>>, %arg3: memref<3x28x28xbf16, #tpu.memory_space<vmem>>, %arg4: memref<1x14x28xbf16, #tpu.memory_space<vmem>>, %arg5: memref<3x14x28xbf16, #tpu.memory_space<vmem>>, %arg6: memref<3x14x14xbf16, #tpu.memory_space<vmem>>, %arg7: memref<1x7x14xbf16, #tpu.memory_space<vmem>>, %arg8: memref<3x7x14xbf16, #tpu.memory_space<vmem>>, %arg9: memref<3x7x7xbf16, #tpu.memory_space<vmem>>, %arg10: memref<1x4x7xbf16, #tpu.memory_space<vmem>>, %arg11: memref<3x4x7xbf16, #tpu.memory_space<vmem>>, %arg12: memref<3x4x4xbf16, #tpu.memory_space<vmem>>, %arg13: memref<15x12x32xbf16, #tpu.memory_space<vmem>>, %arg14: memref<1x32xf32, #tpu.memory_space<vmem>>, %arg15: memref<3x32x32xbf16, #tpu.memory_space<vmem>>, %arg16: memref<1x32xf32, #tpu.memory_space<vmem>>, %arg17: memref<3x32x32xbf16, #tpu.memory_space<vmem>>, %arg18: memref<1x32xf32, #tpu.memory_space<vmem>>, %arg19: memref<1x32x64xbf16, #tpu.memory_space<vmem>>, %arg20: memref<1x64xf32, #tpu.memory_space<vmem>>, %arg21: memref<3x32x64xbf16, #tpu.memory_space<vmem>>, %arg22: memref<1x64xf32, #tpu.memory_space<vmem>>, %arg23: memref<3x64x64xbf16, #tpu.memory_space<vmem>>, %arg24: memref<1x64xf32, #tpu.memory_space<vmem>>, %arg25: memref<1x64x128xbf16, #tpu.memory_space<vmem>>, %arg26: memref<1x128xf32, #tpu.memory_space<vmem>>, %arg27: memref<3x64x128xbf16, #tpu.memory_space<vmem>>, %arg28: memref<1x128xf32, #tpu.memory_space<vmem>>, %arg29: memref<3x128x128xbf16, #tpu.memory_space<vmem>>, %arg30: memref<1x128xf32, #tpu.memory_space<vmem>>, %arg31: memref<1x128x256xbf16, #tpu.memory_space<vmem>>, %arg32: memref<1x256xf32, #tpu.memory_space<vmem>>, %arg33: memref<3x128x256xbf16, #tpu.memory_space<vmem>>, %arg34: memref<1x256xf32, #tpu.memory_space<vmem>>, %arg35: memref<3x256x256xbf16, #tpu.memory_space<vmem>>, %arg36: memref<1x256xf32, #tpu.memory_space<vmem>>, %arg37: memref<1x1x256xf32, #tpu.memory_space<vmem>>) attributes {dimension_semantics = [#tpu.dimension_semantics<parallel>], iteration_bounds = array<i64: 2>, scalar_prefetch = 0 : i64, scratch_operands = 0 : i64, tpu.core_type = #tpu.core_type<tc>, window_params = [{transform_indices = @transform_0, window_bounds = array<i64: 1, 64, 12>}, {pipeline_mode = #tpu.pipeline_mode<synchronous>, transform_indices = @transform_1, window_bounds = array<i64: 15, 28, 64>}, {pipeline_mode = #tpu.pipeline_mode<synchronous>, transform_indices = @transform_2, window_bounds = array<i64: 3, 28, 28>}, {pipeline_mode = #tpu.pipeline_mode<synchronous>, transform_indices = @transform_3, window_bounds = array<i64: 1, 14, 28>}, {pipeline_mode = #tpu.pipeline_mode<synchronous>, transform_indices = @transform_4, window_bounds = array<i64: 3, 14, 28>}, {pipeline_mode = #tpu.pipeline_mode<synchronous>, transform_indices = @transform_5, window_bounds = array<i64: 3, 14, 14>}, {pipeline_mode = #tpu.pipeline_mode<synchronous>, transform_indices = @transform_6, window_bounds = array<i64: 1, 7, 14>}, {pipeline_mode = #tpu.pipeline_mode<synchronous>, transform_indices = @transform_7, window_bounds = array<i64: 3, 7, 14>}, {pipeline_mode = #tpu.pipeline_mode<synchronous>, transform_indices = @transform_8, window_bounds = array<i64: 3, 7, 7>}, {pipeline_mode = #tpu.pipeline_mode<synchronous>, transform_indices = @transform_9, window_bounds = array<i64: 1, 4, 7>}, {pipeline_mode = #tpu.pipeline_mode<synchronous>, transform_indices = @transform_10, window_bounds = array<i64: 3, 4, 7>}, {pipeline_mode = #tpu.pipeline_mode<synchronous>, transform_indices = @transform_11, window_bounds = array<i64: 3, 4, 4>}, {pipeline_mode = #tpu.pipeline_mode<synchronous>, transform_indices = @transform_12, window_bounds = array<i64: 15, 12, 32>}, {pipeline_mode = #tpu.pipeline_mode<synchronous>, transform_indices = @transform_13, window_bounds = array<i64: 1, 32>}, {pipeline_mode = #tpu.pipeline_mode<synchronous>, transform_indices = @transform_14, window_bounds = array<i64: 3, 32, 32>}, {pipeline_mode = #tpu.pipeline_mode<synchronous>, transform_indices = @transform_15, window_bounds = array<i64: 1, 32>}, {pipeline_mode = #tpu.pipeline_mode<synchronous>, transform_indices = @transform_16, window_bounds = array<i64: 3, 32, 32>}, {pipeline_mode = #tpu.pipeline_mode<synchronous>, transform_indices = @transform_17, window_bounds = array<i64: 1, 32>}, {pipeline_mode = #tpu.pipeline_mode<synchronous>, transform_indices = @transform_18, window_bounds = array<i64: 1, 32, 64>}, {pipeline_mode = #tpu.pipeline_mode<synchronous>, transform_indices = @transform_19, window_bounds = array<i64: 1, 64>}, {pipeline_mode = #tpu.pipeline_mode<synchronous>, transform_indices = @transform_20, window_bounds = array<i64: 3, 32, 64>}, {pipeline_mode = #tpu.pipeline_mode<synchronous>, transform_indices = @transform_21, window_bounds = array<i64: 1, 64>}, {pipeline_mode = #tpu.pipeline_mode<synchronous>, transform_indices = @transform_22, window_bounds = array<i64: 3, 64, 64>}, {pipeline_mode = #tpu.pipeline_mode<synchronous>, transform_indices = @transform_23, window_bounds = array<i64: 1, 64>}, {pipeline_mode = #tpu.pipeline_mode<synchronous>, transform_indices = @transform_24, window_bounds = array<i64: 1, 64, 128>}, {pipeline_mode = #tpu.pipeline_mode<synchronous>, transform_indices = @transform_25, window_bounds = array<i64: 1, 128>}, {pipeline_mode = #tpu.pipeline_mode<synchronous>, transform_indices = @transform_26, window_bounds = array<i64: 3, 64, 128>}, {pipeline_mode = #tpu.pipeline_mode<synchronous>, transform_indices = @transform_27, window_bounds = array<i64: 1, 128>}, {pipeline_mode = #tpu.pipeline_mode<synchronous>, transform_indices = @transform_28, window_bounds = array<i64: 3, 128, 128>}, {pipeline_mode = #tpu.pipeline_mode<synchronous>, transform_indices = @transform_29, window_bounds = array<i64: 1, 128>}, {pipeline_mode = #tpu.pipeline_mode<synchronous>, transform_indices = @transform_30, window_bounds = array<i64: 1, 128, 256>}, {pipeline_mode = #tpu.pipeline_mode<synchronous>, transform_indices = @transform_31, window_bounds = array<i64: 1, 256>}, {pipeline_mode = #tpu.pipeline_mode<synchronous>, transform_indices = @transform_32, window_bounds = array<i64: 3, 128, 256>}, {pipeline_mode = #tpu.pipeline_mode<synchronous>, transform_indices = @transform_33, window_bounds = array<i64: 1, 256>}, {pipeline_mode = #tpu.pipeline_mode<synchronous>, transform_indices = @transform_34, window_bounds = array<i64: 3, 256, 256>}, {pipeline_mode = #tpu.pipeline_mode<synchronous>, transform_indices = @transform_35, window_bounds = array<i64: 1, 256>}, {transform_indices = @transform_36, window_bounds = array<i64: 1, 1, 256>}]} {
    %c0 = arith.constant 0 : index
    %c0_0 = arith.constant 0 : index
    %c0_1 = arith.constant 0 : index
    %0 = vector.load %arg1[%c0, %c0_0, %c0_1] : memref<1x64x12xf32, #tpu.memory_space<vmem>>, vector<1x64x12xf32>
    %1 = vector.shape_cast %0 : vector<1x64x12xf32> to vector<64x12xf32>
    %2 = arith.truncf %1 : vector<64x12xf32> to vector<64x12xbf16>
    %cst = arith.constant 0.000000e+00 : f32
    %3 = vector.broadcast %cst : f32 to vector<28x32xf32>
    %c0_2 = arith.constant 0 : index
    %c0_3 = arith.constant 0 : index
    %c0_4 = arith.constant 0 : index
    %4 = vector.load %arg2[%c0_2, %c0_3, %c0_4] : memref<15x28x64xbf16, #tpu.memory_space<vmem>>, vector<1x28x64xbf16>
    %5 = vector.shape_cast %4 : vector<1x28x64xbf16> to vector<28x64xbf16>
    %cst_5 = arith.constant dense<0.000000e+00> : vector<28x12xf32>
    %6 = tpu.matmul %5, %2, %cst_5 {dimension_numbers = #tpu.dot_dimension_numbers<[1], [0], [0], [1], [0, 0, 1, 1], [], []>} : vector<28x64xbf16>, vector<64x12xbf16>, vector<28x12xf32> -> vector<28x12xf32>
    %7 = arith.truncf %6 : vector<28x12xf32> to vector<28x12xbf16>
    %c0_6 = arith.constant 0 : index
    %c0_7 = arith.constant 0 : index
    %c0_8 = arith.constant 0 : index
    %8 = vector.load %arg13[%c0_6, %c0_7, %c0_8] : memref<15x12x32xbf16, #tpu.memory_space<vmem>>, vector<1x12x32xbf16>
    %9 = vector.shape_cast %8 : vector<1x12x32xbf16> to vector<12x32xbf16>
    %cst_9 = arith.constant dense<0.000000e+00> : vector<28x32xf32>
    %10 = tpu.matmul %7, %9, %cst_9 {dimension_numbers = #tpu.dot_dimension_numbers<[1], [0], [0], [1], [0, 0, 1, 1], [], []>} : vector<28x12xbf16>, vector<12x32xbf16>, vector<28x32xf32> -> vector<28x32xf32>
    %11 = arith.addf %3, %10 : vector<28x32xf32>
    %c1 = arith.constant 1 : index
    %c0_10 = arith.constant 0 : index
    %c0_11 = arith.constant 0 : index
    %12 = vector.load %arg2[%c1, %c0_10, %c0_11] : memref<15x28x64xbf16, #tpu.memory_space<vmem>>, vector<1x28x64xbf16>
    %13 = vector.shape_cast %12 : vector<1x28x64xbf16> to vector<28x64xbf16>
    %cst_12 = arith.constant dense<0.000000e+00> : vector<28x12xf32>
    %14 = tpu.matmul %13, %2, %cst_12 {dimension_numbers = #tpu.dot_dimension_numbers<[1], [0], [0], [1], [0, 0, 1, 1], [], []>} : vector<28x64xbf16>, vector<64x12xbf16>, vector<28x12xf32> -> vector<28x12xf32>
    %15 = arith.truncf %14 : vector<28x12xf32> to vector<28x12xbf16>
    %c1_13 = arith.constant 1 : index
    %c0_14 = arith.constant 0 : index
    %c0_15 = arith.constant 0 : index
    %16 = vector.load %arg13[%c1_13, %c0_14, %c0_15] : memref<15x12x32xbf16, #tpu.memory_space<vmem>>, vector<1x12x32xbf16>
    %17 = vector.shape_cast %16 : vector<1x12x32xbf16> to vector<12x32xbf16>
    %cst_16 = arith.constant dense<0.000000e+00> : vector<28x32xf32>
    %18 = tpu.matmul %15, %17, %cst_16 {dimension_numbers = #tpu.dot_dimension_numbers<[1], [0], [0], [1], [0, 0, 1, 1], [], []>} : vector<28x12xbf16>, vector<12x32xbf16>, vector<28x32xf32> -> vector<28x32xf32>
    %19 = arith.addf %11, %18 : vector<28x32xf32>
    %c2 = arith.constant 2 : index
    %c0_17 = arith.constant 0 : index
    %c0_18 = arith.constant 0 : index
    %20 = vector.load %arg2[%c2, %c0_17, %c0_18] : memref<15x28x64xbf16, #tpu.memory_space<vmem>>, vector<1x28x64xbf16>
    %21 = vector.shape_cast %20 : vector<1x28x64xbf16> to vector<28x64xbf16>
    %cst_19 = arith.constant dense<0.000000e+00> : vector<28x12xf32>
    %22 = tpu.matmul %21, %2, %cst_19 {dimension_numbers = #tpu.dot_dimension_numbers<[1], [0], [0], [1], [0, 0, 1, 1], [], []>} : vector<28x64xbf16>, vector<64x12xbf16>, vector<28x12xf32> -> vector<28x12xf32>
    %23 = arith.truncf %22 : vector<28x12xf32> to vector<28x12xbf16>
    %c2_20 = arith.constant 2 : index
    %c0_21 = arith.constant 0 : index
    %c0_22 = arith.constant 0 : index
    %24 = vector.load %arg13[%c2_20, %c0_21, %c0_22] : memref<15x12x32xbf16, #tpu.memory_space<vmem>>, vector<1x12x32xbf16>
    %25 = vector.shape_cast %24 : vector<1x12x32xbf16> to vector<12x32xbf16>
    %cst_23 = arith.constant dense<0.000000e+00> : vector<28x32xf32>
    %26 = tpu.matmul %23, %25, %cst_23 {dimension_numbers = #tpu.dot_dimension_numbers<[1], [0], [0], [1], [0, 0, 1, 1], [], []>} : vector<28x12xbf16>, vector<12x32xbf16>, vector<28x32xf32> -> vector<28x32xf32>
    %27 = arith.addf %19, %26 : vector<28x32xf32>
    %c3 = arith.constant 3 : index
    %c0_24 = arith.constant 0 : index
    %c0_25 = arith.constant 0 : index
    %28 = vector.load %arg2[%c3, %c0_24, %c0_25] : memref<15x28x64xbf16, #tpu.memory_space<vmem>>, vector<1x28x64xbf16>
    %29 = vector.shape_cast %28 : vector<1x28x64xbf16> to vector<28x64xbf16>
    %cst_26 = arith.constant dense<0.000000e+00> : vector<28x12xf32>
    %30 = tpu.matmul %29, %2, %cst_26 {dimension_numbers = #tpu.dot_dimension_numbers<[1], [0], [0], [1], [0, 0, 1, 1], [], []>} : vector<28x64xbf16>, vector<64x12xbf16>, vector<28x12xf32> -> vector<28x12xf32>
    %31 = arith.truncf %30 : vector<28x12xf32> to vector<28x12xbf16>
    %c3_27 = arith.constant 3 : index
    %c0_28 = arith.constant 0 : index
    %c0_29 = arith.constant 0 : index
    %32 = vector.load %arg13[%c3_27, %c0_28, %c0_29] : memref<15x12x32xbf16, #tpu.memory_space<vmem>>, vector<1x12x32xbf16>
    %33 = vector.shape_cast %32 : vector<1x12x32xbf16> to vector<12x32xbf16>
    %cst_30 = arith.constant dense<0.000000e+00> : vector<28x32xf32>
    %34 = tpu.matmul %31, %33, %cst_30 {dimension_numbers = #tpu.dot_dimension_numbers<[1], [0], [0], [1], [0, 0, 1, 1], [], []>} : vector<28x12xbf16>, vector<12x32xbf16>, vector<28x32xf32> -> vector<28x32xf32>
    %35 = arith.addf %27, %34 : vector<28x32xf32>
    %c4 = arith.constant 4 : index
    %c0_31 = arith.constant 0 : index
    %c0_32 = arith.constant 0 : index
    %36 = vector.load %arg2[%c4, %c0_31, %c0_32] : memref<15x28x64xbf16, #tpu.memory_space<vmem>>, vector<1x28x64xbf16>
    %37 = vector.shape_cast %36 : vector<1x28x64xbf16> to vector<28x64xbf16>
    %cst_33 = arith.constant dense<0.000000e+00> : vector<28x12xf32>
    %38 = tpu.matmul %37, %2, %cst_33 {dimension_numbers = #tpu.dot_dimension_numbers<[1], [0], [0], [1], [0, 0, 1, 1], [], []>} : vector<28x64xbf16>, vector<64x12xbf16>, vector<28x12xf32> -> vector<28x12xf32>
    %39 = arith.truncf %38 : vector<28x12xf32> to vector<28x12xbf16>
    %c4_34 = arith.constant 4 : index
    %c0_35 = arith.constant 0 : index
    %c0_36 = arith.constant 0 : index
    %40 = vector.load %arg13[%c4_34, %c0_35, %c0_36] : memref<15x12x32xbf16, #tpu.memory_space<vmem>>, vector<1x12x32xbf16>
    %41 = vector.shape_cast %40 : vector<1x12x32xbf16> to vector<12x32xbf16>
    %cst_37 = arith.constant dense<0.000000e+00> : vector<28x32xf32>
    %42 = tpu.matmul %39, %41, %cst_37 {dimension_numbers = #tpu.dot_dimension_numbers<[1], [0], [0], [1], [0, 0, 1, 1], [], []>} : vector<28x12xbf16>, vector<12x32xbf16>, vector<28x32xf32> -> vector<28x32xf32>
    %43 = arith.addf %35, %42 : vector<28x32xf32>
    %c5 = arith.constant 5 : index
    %c0_38 = arith.constant 0 : index
    %c0_39 = arith.constant 0 : index
    %44 = vector.load %arg2[%c5, %c0_38, %c0_39] : memref<15x28x64xbf16, #tpu.memory_space<vmem>>, vector<1x28x64xbf16>
    %45 = vector.shape_cast %44 : vector<1x28x64xbf16> to vector<28x64xbf16>
    %cst_40 = arith.constant dense<0.000000e+00> : vector<28x12xf32>
    %46 = tpu.matmul %45, %2, %cst_40 {dimension_numbers = #tpu.dot_dimension_numbers<[1], [0], [0], [1], [0, 0, 1, 1], [], []>} : vector<28x64xbf16>, vector<64x12xbf16>, vector<28x12xf32> -> vector<28x12xf32>
    %47 = arith.truncf %46 : vector<28x12xf32> to vector<28x12xbf16>
    %c5_41 = arith.constant 5 : index
    %c0_42 = arith.constant 0 : index
    %c0_43 = arith.constant 0 : index
    %48 = vector.load %arg13[%c5_41, %c0_42, %c0_43] : memref<15x12x32xbf16, #tpu.memory_space<vmem>>, vector<1x12x32xbf16>
    %49 = vector.shape_cast %48 : vector<1x12x32xbf16> to vector<12x32xbf16>
    %cst_44 = arith.constant dense<0.000000e+00> : vector<28x32xf32>
    %50 = tpu.matmul %47, %49, %cst_44 {dimension_numbers = #tpu.dot_dimension_numbers<[1], [0], [0], [1], [0, 0, 1, 1], [], []>} : vector<28x12xbf16>, vector<12x32xbf16>, vector<28x32xf32> -> vector<28x32xf32>
    %51 = arith.addf %43, %50 : vector<28x32xf32>
    %c6 = arith.constant 6 : index
    %c0_45 = arith.constant 0 : index
    %c0_46 = arith.constant 0 : index
    %52 = vector.load %arg2[%c6, %c0_45, %c0_46] : memref<15x28x64xbf16, #tpu.memory_space<vmem>>, vector<1x28x64xbf16>
    %53 = vector.shape_cast %52 : vector<1x28x64xbf16> to vector<28x64xbf16>
    %cst_47 = arith.constant dense<0.000000e+00> : vector<28x12xf32>
    %54 = tpu.matmul %53, %2, %cst_47 {dimension_numbers = #tpu.dot_dimension_numbers<[1], [0], [0], [1], [0, 0, 1, 1], [], []>} : vector<28x64xbf16>, vector<64x12xbf16>, vector<28x12xf32> -> vector<28x12xf32>
    %55 = arith.truncf %54 : vector<28x12xf32> to vector<28x12xbf16>
    %c6_48 = arith.constant 6 : index
    %c0_49 = arith.constant 0 : index
    %c0_50 = arith.constant 0 : index
    %56 = vector.load %arg13[%c6_48, %c0_49, %c0_50] : memref<15x12x32xbf16, #tpu.memory_space<vmem>>, vector<1x12x32xbf16>
    %57 = vector.shape_cast %56 : vector<1x12x32xbf16> to vector<12x32xbf16>
    %cst_51 = arith.constant dense<0.000000e+00> : vector<28x32xf32>
    %58 = tpu.matmul %55, %57, %cst_51 {dimension_numbers = #tpu.dot_dimension_numbers<[1], [0], [0], [1], [0, 0, 1, 1], [], []>} : vector<28x12xbf16>, vector<12x32xbf16>, vector<28x32xf32> -> vector<28x32xf32>
    %59 = arith.addf %51, %58 : vector<28x32xf32>
    %c7 = arith.constant 7 : index
    %c0_52 = arith.constant 0 : index
    %c0_53 = arith.constant 0 : index
    %60 = vector.load %arg2[%c7, %c0_52, %c0_53] : memref<15x28x64xbf16, #tpu.memory_space<vmem>>, vector<1x28x64xbf16>
    %61 = vector.shape_cast %60 : vector<1x28x64xbf16> to vector<28x64xbf16>
    %cst_54 = arith.constant dense<0.000000e+00> : vector<28x12xf32>
    %62 = tpu.matmul %61, %2, %cst_54 {dimension_numbers = #tpu.dot_dimension_numbers<[1], [0], [0], [1], [0, 0, 1, 1], [], []>} : vector<28x64xbf16>, vector<64x12xbf16>, vector<28x12xf32> -> vector<28x12xf32>
    %63 = arith.truncf %62 : vector<28x12xf32> to vector<28x12xbf16>
    %c7_55 = arith.constant 7 : index
    %c0_56 = arith.constant 0 : index
    %c0_57 = arith.constant 0 : index
    %64 = vector.load %arg13[%c7_55, %c0_56, %c0_57] : memref<15x12x32xbf16, #tpu.memory_space<vmem>>, vector<1x12x32xbf16>
    %65 = vector.shape_cast %64 : vector<1x12x32xbf16> to vector<12x32xbf16>
    %cst_58 = arith.constant dense<0.000000e+00> : vector<28x32xf32>
    %66 = tpu.matmul %63, %65, %cst_58 {dimension_numbers = #tpu.dot_dimension_numbers<[1], [0], [0], [1], [0, 0, 1, 1], [], []>} : vector<28x12xbf16>, vector<12x32xbf16>, vector<28x32xf32> -> vector<28x32xf32>
    %67 = arith.addf %59, %66 : vector<28x32xf32>
    %c8 = arith.constant 8 : index
    %c0_59 = arith.constant 0 : index
    %c0_60 = arith.constant 0 : index
    %68 = vector.load %arg2[%c8, %c0_59, %c0_60] : memref<15x28x64xbf16, #tpu.memory_space<vmem>>, vector<1x28x64xbf16>
    %69 = vector.shape_cast %68 : vector<1x28x64xbf16> to vector<28x64xbf16>
    %cst_61 = arith.constant dense<0.000000e+00> : vector<28x12xf32>
    %70 = tpu.matmul %69, %2, %cst_61 {dimension_numbers = #tpu.dot_dimension_numbers<[1], [0], [0], [1], [0, 0, 1, 1], [], []>} : vector<28x64xbf16>, vector<64x12xbf16>, vector<28x12xf32> -> vector<28x12xf32>
    %71 = arith.truncf %70 : vector<28x12xf32> to vector<28x12xbf16>
    %c8_62 = arith.constant 8 : index
    %c0_63 = arith.constant 0 : index
    %c0_64 = arith.constant 0 : index
    %72 = vector.load %arg13[%c8_62, %c0_63, %c0_64] : memref<15x12x32xbf16, #tpu.memory_space<vmem>>, vector<1x12x32xbf16>
    %73 = vector.shape_cast %72 : vector<1x12x32xbf16> to vector<12x32xbf16>
    %cst_65 = arith.constant dense<0.000000e+00> : vector<28x32xf32>
    %74 = tpu.matmul %71, %73, %cst_65 {dimension_numbers = #tpu.dot_dimension_numbers<[1], [0], [0], [1], [0, 0, 1, 1], [], []>} : vector<28x12xbf16>, vector<12x32xbf16>, vector<28x32xf32> -> vector<28x32xf32>
    %75 = arith.addf %67, %74 : vector<28x32xf32>
    %c9 = arith.constant 9 : index
    %c0_66 = arith.constant 0 : index
    %c0_67 = arith.constant 0 : index
    %76 = vector.load %arg2[%c9, %c0_66, %c0_67] : memref<15x28x64xbf16, #tpu.memory_space<vmem>>, vector<1x28x64xbf16>
    %77 = vector.shape_cast %76 : vector<1x28x64xbf16> to vector<28x64xbf16>
    %cst_68 = arith.constant dense<0.000000e+00> : vector<28x12xf32>
    %78 = tpu.matmul %77, %2, %cst_68 {dimension_numbers = #tpu.dot_dimension_numbers<[1], [0], [0], [1], [0, 0, 1, 1], [], []>} : vector<28x64xbf16>, vector<64x12xbf16>, vector<28x12xf32> -> vector<28x12xf32>
    %79 = arith.truncf %78 : vector<28x12xf32> to vector<28x12xbf16>
    %c9_69 = arith.constant 9 : index
    %c0_70 = arith.constant 0 : index
    %c0_71 = arith.constant 0 : index
    %80 = vector.load %arg13[%c9_69, %c0_70, %c0_71] : memref<15x12x32xbf16, #tpu.memory_space<vmem>>, vector<1x12x32xbf16>
    %81 = vector.shape_cast %80 : vector<1x12x32xbf16> to vector<12x32xbf16>
    %cst_72 = arith.constant dense<0.000000e+00> : vector<28x32xf32>
    %82 = tpu.matmul %79, %81, %cst_72 {dimension_numbers = #tpu.dot_dimension_numbers<[1], [0], [0], [1], [0, 0, 1, 1], [], []>} : vector<28x12xbf16>, vector<12x32xbf16>, vector<28x32xf32> -> vector<28x32xf32>
    %83 = arith.addf %75, %82 : vector<28x32xf32>
    %c10 = arith.constant 10 : index
    %c0_73 = arith.constant 0 : index
    %c0_74 = arith.constant 0 : index
    %84 = vector.load %arg2[%c10, %c0_73, %c0_74] : memref<15x28x64xbf16, #tpu.memory_space<vmem>>, vector<1x28x64xbf16>
    %85 = vector.shape_cast %84 : vector<1x28x64xbf16> to vector<28x64xbf16>
    %cst_75 = arith.constant dense<0.000000e+00> : vector<28x12xf32>
    %86 = tpu.matmul %85, %2, %cst_75 {dimension_numbers = #tpu.dot_dimension_numbers<[1], [0], [0], [1], [0, 0, 1, 1], [], []>} : vector<28x64xbf16>, vector<64x12xbf16>, vector<28x12xf32> -> vector<28x12xf32>
    %87 = arith.truncf %86 : vector<28x12xf32> to vector<28x12xbf16>
    %c10_76 = arith.constant 10 : index
    %c0_77 = arith.constant 0 : index
    %c0_78 = arith.constant 0 : index
    %88 = vector.load %arg13[%c10_76, %c0_77, %c0_78] : memref<15x12x32xbf16, #tpu.memory_space<vmem>>, vector<1x12x32xbf16>
    %89 = vector.shape_cast %88 : vector<1x12x32xbf16> to vector<12x32xbf16>
    %cst_79 = arith.constant dense<0.000000e+00> : vector<28x32xf32>
    %90 = tpu.matmul %87, %89, %cst_79 {dimension_numbers = #tpu.dot_dimension_numbers<[1], [0], [0], [1], [0, 0, 1, 1], [], []>} : vector<28x12xbf16>, vector<12x32xbf16>, vector<28x32xf32> -> vector<28x32xf32>
    %91 = arith.addf %83, %90 : vector<28x32xf32>
    %c11 = arith.constant 11 : index
    %c0_80 = arith.constant 0 : index
    %c0_81 = arith.constant 0 : index
    %92 = vector.load %arg2[%c11, %c0_80, %c0_81] : memref<15x28x64xbf16, #tpu.memory_space<vmem>>, vector<1x28x64xbf16>
    %93 = vector.shape_cast %92 : vector<1x28x64xbf16> to vector<28x64xbf16>
    %cst_82 = arith.constant dense<0.000000e+00> : vector<28x12xf32>
    %94 = tpu.matmul %93, %2, %cst_82 {dimension_numbers = #tpu.dot_dimension_numbers<[1], [0], [0], [1], [0, 0, 1, 1], [], []>} : vector<28x64xbf16>, vector<64x12xbf16>, vector<28x12xf32> -> vector<28x12xf32>
    %95 = arith.truncf %94 : vector<28x12xf32> to vector<28x12xbf16>
    %c11_83 = arith.constant 11 : index
    %c0_84 = arith.constant 0 : index
    %c0_85 = arith.constant 0 : index
    %96 = vector.load %arg13[%c11_83, %c0_84, %c0_85] : memref<15x12x32xbf16, #tpu.memory_space<vmem>>, vector<1x12x32xbf16>
    %97 = vector.shape_cast %96 : vector<1x12x32xbf16> to vector<12x32xbf16>
    %cst_86 = arith.constant dense<0.000000e+00> : vector<28x32xf32>
    %98 = tpu.matmul %95, %97, %cst_86 {dimension_numbers = #tpu.dot_dimension_numbers<[1], [0], [0], [1], [0, 0, 1, 1], [], []>} : vector<28x12xbf16>, vector<12x32xbf16>, vector<28x32xf32> -> vector<28x32xf32>
    %99 = arith.addf %91, %98 : vector<28x32xf32>
    %c12 = arith.constant 12 : index
    %c0_87 = arith.constant 0 : index
    %c0_88 = arith.constant 0 : index
    %100 = vector.load %arg2[%c12, %c0_87, %c0_88] : memref<15x28x64xbf16, #tpu.memory_space<vmem>>, vector<1x28x64xbf16>
    %101 = vector.shape_cast %100 : vector<1x28x64xbf16> to vector<28x64xbf16>
    %cst_89 = arith.constant dense<0.000000e+00> : vector<28x12xf32>
    %102 = tpu.matmul %101, %2, %cst_89 {dimension_numbers = #tpu.dot_dimension_numbers<[1], [0], [0], [1], [0, 0, 1, 1], [], []>} : vector<28x64xbf16>, vector<64x12xbf16>, vector<28x12xf32> -> vector<28x12xf32>
    %103 = arith.truncf %102 : vector<28x12xf32> to vector<28x12xbf16>
    %c12_90 = arith.constant 12 : index
    %c0_91 = arith.constant 0 : index
    %c0_92 = arith.constant 0 : index
    %104 = vector.load %arg13[%c12_90, %c0_91, %c0_92] : memref<15x12x32xbf16, #tpu.memory_space<vmem>>, vector<1x12x32xbf16>
    %105 = vector.shape_cast %104 : vector<1x12x32xbf16> to vector<12x32xbf16>
    %cst_93 = arith.constant dense<0.000000e+00> : vector<28x32xf32>
    %106 = tpu.matmul %103, %105, %cst_93 {dimension_numbers = #tpu.dot_dimension_numbers<[1], [0], [0], [1], [0, 0, 1, 1], [], []>} : vector<28x12xbf16>, vector<12x32xbf16>, vector<28x32xf32> -> vector<28x32xf32>
    %107 = arith.addf %99, %106 : vector<28x32xf32>
    %c13 = arith.constant 13 : index
    %c0_94 = arith.constant 0 : index
    %c0_95 = arith.constant 0 : index
    %108 = vector.load %arg2[%c13, %c0_94, %c0_95] : memref<15x28x64xbf16, #tpu.memory_space<vmem>>, vector<1x28x64xbf16>
    %109 = vector.shape_cast %108 : vector<1x28x64xbf16> to vector<28x64xbf16>
    %cst_96 = arith.constant dense<0.000000e+00> : vector<28x12xf32>
    %110 = tpu.matmul %109, %2, %cst_96 {dimension_numbers = #tpu.dot_dimension_numbers<[1], [0], [0], [1], [0, 0, 1, 1], [], []>} : vector<28x64xbf16>, vector<64x12xbf16>, vector<28x12xf32> -> vector<28x12xf32>
    %111 = arith.truncf %110 : vector<28x12xf32> to vector<28x12xbf16>
    %c13_97 = arith.constant 13 : index
    %c0_98 = arith.constant 0 : index
    %c0_99 = arith.constant 0 : index
    %112 = vector.load %arg13[%c13_97, %c0_98, %c0_99] : memref<15x12x32xbf16, #tpu.memory_space<vmem>>, vector<1x12x32xbf16>
    %113 = vector.shape_cast %112 : vector<1x12x32xbf16> to vector<12x32xbf16>
    %cst_100 = arith.constant dense<0.000000e+00> : vector<28x32xf32>
    %114 = tpu.matmul %111, %113, %cst_100 {dimension_numbers = #tpu.dot_dimension_numbers<[1], [0], [0], [1], [0, 0, 1, 1], [], []>} : vector<28x12xbf16>, vector<12x32xbf16>, vector<28x32xf32> -> vector<28x32xf32>
    %115 = arith.addf %107, %114 : vector<28x32xf32>
    %c14 = arith.constant 14 : index
    %c0_101 = arith.constant 0 : index
    %c0_102 = arith.constant 0 : index
    %116 = vector.load %arg2[%c14, %c0_101, %c0_102] : memref<15x28x64xbf16, #tpu.memory_space<vmem>>, vector<1x28x64xbf16>
    %117 = vector.shape_cast %116 : vector<1x28x64xbf16> to vector<28x64xbf16>
    %cst_103 = arith.constant dense<0.000000e+00> : vector<28x12xf32>
    %118 = tpu.matmul %117, %2, %cst_103 {dimension_numbers = #tpu.dot_dimension_numbers<[1], [0], [0], [1], [0, 0, 1, 1], [], []>} : vector<28x64xbf16>, vector<64x12xbf16>, vector<28x12xf32> -> vector<28x12xf32>
    %119 = arith.truncf %118 : vector<28x12xf32> to vector<28x12xbf16>
    %c14_104 = arith.constant 14 : index
    %c0_105 = arith.constant 0 : index
    %c0_106 = arith.constant 0 : index
    %120 = vector.load %arg13[%c14_104, %c0_105, %c0_106] : memref<15x12x32xbf16, #tpu.memory_space<vmem>>, vector<1x12x32xbf16>
    %121 = vector.shape_cast %120 : vector<1x12x32xbf16> to vector<12x32xbf16>
    %cst_107 = arith.constant dense<0.000000e+00> : vector<28x32xf32>
    %122 = tpu.matmul %119, %121, %cst_107 {dimension_numbers = #tpu.dot_dimension_numbers<[1], [0], [0], [1], [0, 0, 1, 1], [], []>} : vector<28x12xbf16>, vector<12x32xbf16>, vector<28x32xf32> -> vector<28x32xf32>
    %123 = arith.addf %115, %122 : vector<28x32xf32>
    %c0_108 = arith.constant 0 : index
    %c0_109 = arith.constant 0 : index
    %124 = vector.load %arg14[%c0_108, %c0_109] : memref<1x32xf32, #tpu.memory_space<vmem>>, vector<1x32xf32>
    %125 = vector.broadcast %124 : vector<1x32xf32> to vector<28x32xf32>
    %126 = arith.addf %123, %125 : vector<28x32xf32>
    %cst_110 = arith.constant 0.000000e+00 : f32
    %127 = vector.broadcast %cst_110 : f32 to vector<28x32xf32>
    %128 = arith.maximumf %126, %127 : vector<28x32xf32>
    %129 = arith.truncf %128 : vector<28x32xf32> to vector<28x32xbf16>
    %cst_111 = arith.constant 0.000000e+00 : f32
    %130 = vector.broadcast %cst_111 : f32 to vector<28x32xf32>
    %c0_112 = arith.constant 0 : index
    %c0_113 = arith.constant 0 : index
    %c0_114 = arith.constant 0 : index
    %131 = vector.load %arg3[%c0_112, %c0_113, %c0_114] : memref<3x28x28xbf16, #tpu.memory_space<vmem>>, vector<1x28x28xbf16>
    %132 = vector.shape_cast %131 : vector<1x28x28xbf16> to vector<28x28xbf16>
    %cst_115 = arith.constant dense<0.000000e+00> : vector<28x32xf32>
    %133 = tpu.matmul %132, %129, %cst_115 {dimension_numbers = #tpu.dot_dimension_numbers<[1], [0], [0], [1], [0, 0, 1, 1], [], []>} : vector<28x28xbf16>, vector<28x32xbf16>, vector<28x32xf32> -> vector<28x32xf32>
    %134 = arith.truncf %133 : vector<28x32xf32> to vector<28x32xbf16>
    %c0_116 = arith.constant 0 : index
    %c0_117 = arith.constant 0 : index
    %c0_118 = arith.constant 0 : index
    %135 = vector.load %arg15[%c0_116, %c0_117, %c0_118] : memref<3x32x32xbf16, #tpu.memory_space<vmem>>, vector<1x32x32xbf16>
    %136 = vector.shape_cast %135 : vector<1x32x32xbf16> to vector<32x32xbf16>
    %cst_119 = arith.constant dense<0.000000e+00> : vector<28x32xf32>
    %137 = tpu.matmul %134, %136, %cst_119 {dimension_numbers = #tpu.dot_dimension_numbers<[1], [0], [0], [1], [0, 0, 1, 1], [], []>} : vector<28x32xbf16>, vector<32x32xbf16>, vector<28x32xf32> -> vector<28x32xf32>
    %138 = arith.addf %130, %137 : vector<28x32xf32>
    %c1_120 = arith.constant 1 : index
    %c0_121 = arith.constant 0 : index
    %c0_122 = arith.constant 0 : index
    %139 = vector.load %arg3[%c1_120, %c0_121, %c0_122] : memref<3x28x28xbf16, #tpu.memory_space<vmem>>, vector<1x28x28xbf16>
    %140 = vector.shape_cast %139 : vector<1x28x28xbf16> to vector<28x28xbf16>
    %cst_123 = arith.constant dense<0.000000e+00> : vector<28x32xf32>
    %141 = tpu.matmul %140, %129, %cst_123 {dimension_numbers = #tpu.dot_dimension_numbers<[1], [0], [0], [1], [0, 0, 1, 1], [], []>} : vector<28x28xbf16>, vector<28x32xbf16>, vector<28x32xf32> -> vector<28x32xf32>
    %142 = arith.truncf %141 : vector<28x32xf32> to vector<28x32xbf16>
    %c1_124 = arith.constant 1 : index
    %c0_125 = arith.constant 0 : index
    %c0_126 = arith.constant 0 : index
    %143 = vector.load %arg15[%c1_124, %c0_125, %c0_126] : memref<3x32x32xbf16, #tpu.memory_space<vmem>>, vector<1x32x32xbf16>
    %144 = vector.shape_cast %143 : vector<1x32x32xbf16> to vector<32x32xbf16>
    %cst_127 = arith.constant dense<0.000000e+00> : vector<28x32xf32>
    %145 = tpu.matmul %142, %144, %cst_127 {dimension_numbers = #tpu.dot_dimension_numbers<[1], [0], [0], [1], [0, 0, 1, 1], [], []>} : vector<28x32xbf16>, vector<32x32xbf16>, vector<28x32xf32> -> vector<28x32xf32>
    %146 = arith.addf %138, %145 : vector<28x32xf32>
    %c2_128 = arith.constant 2 : index
    %c0_129 = arith.constant 0 : index
    %c0_130 = arith.constant 0 : index
    %147 = vector.load %arg3[%c2_128, %c0_129, %c0_130] : memref<3x28x28xbf16, #tpu.memory_space<vmem>>, vector<1x28x28xbf16>
    %148 = vector.shape_cast %147 : vector<1x28x28xbf16> to vector<28x28xbf16>
    %cst_131 = arith.constant dense<0.000000e+00> : vector<28x32xf32>
    %149 = tpu.matmul %148, %129, %cst_131 {dimension_numbers = #tpu.dot_dimension_numbers<[1], [0], [0], [1], [0, 0, 1, 1], [], []>} : vector<28x28xbf16>, vector<28x32xbf16>, vector<28x32xf32> -> vector<28x32xf32>
    %150 = arith.truncf %149 : vector<28x32xf32> to vector<28x32xbf16>
    %c2_132 = arith.constant 2 : index
    %c0_133 = arith.constant 0 : index
    %c0_134 = arith.constant 0 : index
    %151 = vector.load %arg15[%c2_132, %c0_133, %c0_134] : memref<3x32x32xbf16, #tpu.memory_space<vmem>>, vector<1x32x32xbf16>
    %152 = vector.shape_cast %151 : vector<1x32x32xbf16> to vector<32x32xbf16>
    %cst_135 = arith.constant dense<0.000000e+00> : vector<28x32xf32>
    %153 = tpu.matmul %150, %152, %cst_135 {dimension_numbers = #tpu.dot_dimension_numbers<[1], [0], [0], [1], [0, 0, 1, 1], [], []>} : vector<28x32xbf16>, vector<32x32xbf16>, vector<28x32xf32> -> vector<28x32xf32>
    %154 = arith.addf %146, %153 : vector<28x32xf32>
    %c0_136 = arith.constant 0 : index
    %c0_137 = arith.constant 0 : index
    %155 = vector.load %arg16[%c0_136, %c0_137] : memref<1x32xf32, #tpu.memory_space<vmem>>, vector<1x32xf32>
    %156 = vector.broadcast %155 : vector<1x32xf32> to vector<28x32xf32>
    %157 = arith.addf %154, %156 : vector<28x32xf32>
    %cst_138 = arith.constant 0.000000e+00 : f32
    %158 = vector.broadcast %cst_138 : f32 to vector<28x32xf32>
    %159 = arith.maximumf %157, %158 : vector<28x32xf32>
    %160 = arith.truncf %159 : vector<28x32xf32> to vector<28x32xbf16>
    %cst_139 = arith.constant 0.000000e+00 : f32
    %161 = vector.broadcast %cst_139 : f32 to vector<28x32xf32>
    %c0_140 = arith.constant 0 : index
    %c0_141 = arith.constant 0 : index
    %c0_142 = arith.constant 0 : index
    %162 = vector.load %arg3[%c0_140, %c0_141, %c0_142] : memref<3x28x28xbf16, #tpu.memory_space<vmem>>, vector<1x28x28xbf16>
    %163 = vector.shape_cast %162 : vector<1x28x28xbf16> to vector<28x28xbf16>
    %cst_143 = arith.constant dense<0.000000e+00> : vector<28x32xf32>
    %164 = tpu.matmul %163, %160, %cst_143 {dimension_numbers = #tpu.dot_dimension_numbers<[1], [0], [0], [1], [0, 0, 1, 1], [], []>} : vector<28x28xbf16>, vector<28x32xbf16>, vector<28x32xf32> -> vector<28x32xf32>
    %165 = arith.truncf %164 : vector<28x32xf32> to vector<28x32xbf16>
    %c0_144 = arith.constant 0 : index
    %c0_145 = arith.constant 0 : index
    %c0_146 = arith.constant 0 : index
    %166 = vector.load %arg17[%c0_144, %c0_145, %c0_146] : memref<3x32x32xbf16, #tpu.memory_space<vmem>>, vector<1x32x32xbf16>
    %167 = vector.shape_cast %166 : vector<1x32x32xbf16> to vector<32x32xbf16>
    %cst_147 = arith.constant dense<0.000000e+00> : vector<28x32xf32>
    %168 = tpu.matmul %165, %167, %cst_147 {dimension_numbers = #tpu.dot_dimension_numbers<[1], [0], [0], [1], [0, 0, 1, 1], [], []>} : vector<28x32xbf16>, vector<32x32xbf16>, vector<28x32xf32> -> vector<28x32xf32>
    %169 = arith.addf %161, %168 : vector<28x32xf32>
    %c1_148 = arith.constant 1 : index
    %c0_149 = arith.constant 0 : index
    %c0_150 = arith.constant 0 : index
    %170 = vector.load %arg3[%c1_148, %c0_149, %c0_150] : memref<3x28x28xbf16, #tpu.memory_space<vmem>>, vector<1x28x28xbf16>
    %171 = vector.shape_cast %170 : vector<1x28x28xbf16> to vector<28x28xbf16>
    %cst_151 = arith.constant dense<0.000000e+00> : vector<28x32xf32>
    %172 = tpu.matmul %171, %160, %cst_151 {dimension_numbers = #tpu.dot_dimension_numbers<[1], [0], [0], [1], [0, 0, 1, 1], [], []>} : vector<28x28xbf16>, vector<28x32xbf16>, vector<28x32xf32> -> vector<28x32xf32>
    %173 = arith.truncf %172 : vector<28x32xf32> to vector<28x32xbf16>
    %c1_152 = arith.constant 1 : index
    %c0_153 = arith.constant 0 : index
    %c0_154 = arith.constant 0 : index
    %174 = vector.load %arg17[%c1_152, %c0_153, %c0_154] : memref<3x32x32xbf16, #tpu.memory_space<vmem>>, vector<1x32x32xbf16>
    %175 = vector.shape_cast %174 : vector<1x32x32xbf16> to vector<32x32xbf16>
    %cst_155 = arith.constant dense<0.000000e+00> : vector<28x32xf32>
    %176 = tpu.matmul %173, %175, %cst_155 {dimension_numbers = #tpu.dot_dimension_numbers<[1], [0], [0], [1], [0, 0, 1, 1], [], []>} : vector<28x32xbf16>, vector<32x32xbf16>, vector<28x32xf32> -> vector<28x32xf32>
    %177 = arith.addf %169, %176 : vector<28x32xf32>
    %c2_156 = arith.constant 2 : index
    %c0_157 = arith.constant 0 : index
    %c0_158 = arith.constant 0 : index
    %178 = vector.load %arg3[%c2_156, %c0_157, %c0_158] : memref<3x28x28xbf16, #tpu.memory_space<vmem>>, vector<1x28x28xbf16>
    %179 = vector.shape_cast %178 : vector<1x28x28xbf16> to vector<28x28xbf16>
    %cst_159 = arith.constant dense<0.000000e+00> : vector<28x32xf32>
    %180 = tpu.matmul %179, %160, %cst_159 {dimension_numbers = #tpu.dot_dimension_numbers<[1], [0], [0], [1], [0, 0, 1, 1], [], []>} : vector<28x28xbf16>, vector<28x32xbf16>, vector<28x32xf32> -> vector<28x32xf32>
    %181 = arith.truncf %180 : vector<28x32xf32> to vector<28x32xbf16>
    %c2_160 = arith.constant 2 : index
    %c0_161 = arith.constant 0 : index
    %c0_162 = arith.constant 0 : index
    %182 = vector.load %arg17[%c2_160, %c0_161, %c0_162] : memref<3x32x32xbf16, #tpu.memory_space<vmem>>, vector<1x32x32xbf16>
    %183 = vector.shape_cast %182 : vector<1x32x32xbf16> to vector<32x32xbf16>
    %cst_163 = arith.constant dense<0.000000e+00> : vector<28x32xf32>
    %184 = tpu.matmul %181, %183, %cst_163 {dimension_numbers = #tpu.dot_dimension_numbers<[1], [0], [0], [1], [0, 0, 1, 1], [], []>} : vector<28x32xbf16>, vector<32x32xbf16>, vector<28x32xf32> -> vector<28x32xf32>
    %185 = arith.addf %177, %184 : vector<28x32xf32>
    %c0_164 = arith.constant 0 : index
    %c0_165 = arith.constant 0 : index
    %186 = vector.load %arg18[%c0_164, %c0_165] : memref<1x32xf32, #tpu.memory_space<vmem>>, vector<1x32xf32>
    %187 = vector.broadcast %186 : vector<1x32xf32> to vector<28x32xf32>
    %188 = arith.addf %185, %187 : vector<28x32xf32>
    %189 = arith.addf %188, %128 : vector<28x32xf32>
    %cst_166 = arith.constant 0.000000e+00 : f32
    %190 = vector.broadcast %cst_166 : f32 to vector<28x32xf32>
    %191 = arith.maximumf %189, %190 : vector<28x32xf32>
    %192 = arith.truncf %191 : vector<28x32xf32> to vector<28x32xbf16>
    %cst_167 = arith.constant 0.000000e+00 : f32
    %193 = vector.broadcast %cst_167 : f32 to vector<14x64xf32>
    %c0_168 = arith.constant 0 : index
    %c0_169 = arith.constant 0 : index
    %c0_170 = arith.constant 0 : index
    %194 = vector.load %arg4[%c0_168, %c0_169, %c0_170] : memref<1x14x28xbf16, #tpu.memory_space<vmem>>, vector<1x14x28xbf16>
    %195 = vector.shape_cast %194 : vector<1x14x28xbf16> to vector<14x28xbf16>
    %cst_171 = arith.constant dense<0.000000e+00> : vector<14x32xf32>
    %196 = tpu.matmul %195, %192, %cst_171 {dimension_numbers = #tpu.dot_dimension_numbers<[1], [0], [0], [1], [0, 0, 1, 1], [], []>} : vector<14x28xbf16>, vector<28x32xbf16>, vector<14x32xf32> -> vector<14x32xf32>
    %197 = arith.truncf %196 : vector<14x32xf32> to vector<14x32xbf16>
    %c0_172 = arith.constant 0 : index
    %c0_173 = arith.constant 0 : index
    %c0_174 = arith.constant 0 : index
    %198 = vector.load %arg19[%c0_172, %c0_173, %c0_174] : memref<1x32x64xbf16, #tpu.memory_space<vmem>>, vector<1x32x64xbf16>
    %199 = vector.shape_cast %198 : vector<1x32x64xbf16> to vector<32x64xbf16>
    %cst_175 = arith.constant dense<0.000000e+00> : vector<14x64xf32>
    %200 = tpu.matmul %197, %199, %cst_175 {dimension_numbers = #tpu.dot_dimension_numbers<[1], [0], [0], [1], [0, 0, 1, 1], [], []>} : vector<14x32xbf16>, vector<32x64xbf16>, vector<14x64xf32> -> vector<14x64xf32>
    %201 = arith.addf %193, %200 : vector<14x64xf32>
    %c0_176 = arith.constant 0 : index
    %c0_177 = arith.constant 0 : index
    %202 = vector.load %arg20[%c0_176, %c0_177] : memref<1x64xf32, #tpu.memory_space<vmem>>, vector<1x64xf32>
    %203 = vector.broadcast %202 : vector<1x64xf32> to vector<14x64xf32>
    %204 = arith.addf %201, %203 : vector<14x64xf32>
    %cst_178 = arith.constant 0.000000e+00 : f32
    %205 = vector.broadcast %cst_178 : f32 to vector<14x64xf32>
    %c0_179 = arith.constant 0 : index
    %c0_180 = arith.constant 0 : index
    %c0_181 = arith.constant 0 : index
    %206 = vector.load %arg5[%c0_179, %c0_180, %c0_181] : memref<3x14x28xbf16, #tpu.memory_space<vmem>>, vector<1x14x28xbf16>
    %207 = vector.shape_cast %206 : vector<1x14x28xbf16> to vector<14x28xbf16>
    %cst_182 = arith.constant dense<0.000000e+00> : vector<14x32xf32>
    %208 = tpu.matmul %207, %192, %cst_182 {dimension_numbers = #tpu.dot_dimension_numbers<[1], [0], [0], [1], [0, 0, 1, 1], [], []>} : vector<14x28xbf16>, vector<28x32xbf16>, vector<14x32xf32> -> vector<14x32xf32>
    %209 = arith.truncf %208 : vector<14x32xf32> to vector<14x32xbf16>
    %c0_183 = arith.constant 0 : index
    %c0_184 = arith.constant 0 : index
    %c0_185 = arith.constant 0 : index
    %210 = vector.load %arg21[%c0_183, %c0_184, %c0_185] : memref<3x32x64xbf16, #tpu.memory_space<vmem>>, vector<1x32x64xbf16>
    %211 = vector.shape_cast %210 : vector<1x32x64xbf16> to vector<32x64xbf16>
    %cst_186 = arith.constant dense<0.000000e+00> : vector<14x64xf32>
    %212 = tpu.matmul %209, %211, %cst_186 {dimension_numbers = #tpu.dot_dimension_numbers<[1], [0], [0], [1], [0, 0, 1, 1], [], []>} : vector<14x32xbf16>, vector<32x64xbf16>, vector<14x64xf32> -> vector<14x64xf32>
    %213 = arith.addf %205, %212 : vector<14x64xf32>
    %c1_187 = arith.constant 1 : index
    %c0_188 = arith.constant 0 : index
    %c0_189 = arith.constant 0 : index
    %214 = vector.load %arg5[%c1_187, %c0_188, %c0_189] : memref<3x14x28xbf16, #tpu.memory_space<vmem>>, vector<1x14x28xbf16>
    %215 = vector.shape_cast %214 : vector<1x14x28xbf16> to vector<14x28xbf16>
    %cst_190 = arith.constant dense<0.000000e+00> : vector<14x32xf32>
    %216 = tpu.matmul %215, %192, %cst_190 {dimension_numbers = #tpu.dot_dimension_numbers<[1], [0], [0], [1], [0, 0, 1, 1], [], []>} : vector<14x28xbf16>, vector<28x32xbf16>, vector<14x32xf32> -> vector<14x32xf32>
    %217 = arith.truncf %216 : vector<14x32xf32> to vector<14x32xbf16>
    %c1_191 = arith.constant 1 : index
    %c0_192 = arith.constant 0 : index
    %c0_193 = arith.constant 0 : index
    %218 = vector.load %arg21[%c1_191, %c0_192, %c0_193] : memref<3x32x64xbf16, #tpu.memory_space<vmem>>, vector<1x32x64xbf16>
    %219 = vector.shape_cast %218 : vector<1x32x64xbf16> to vector<32x64xbf16>
    %cst_194 = arith.constant dense<0.000000e+00> : vector<14x64xf32>
    %220 = tpu.matmul %217, %219, %cst_194 {dimension_numbers = #tpu.dot_dimension_numbers<[1], [0], [0], [1], [0, 0, 1, 1], [], []>} : vector<14x32xbf16>, vector<32x64xbf16>, vector<14x64xf32> -> vector<14x64xf32>
    %221 = arith.addf %213, %220 : vector<14x64xf32>
    %c2_195 = arith.constant 2 : index
    %c0_196 = arith.constant 0 : index
    %c0_197 = arith.constant 0 : index
    %222 = vector.load %arg5[%c2_195, %c0_196, %c0_197] : memref<3x14x28xbf16, #tpu.memory_space<vmem>>, vector<1x14x28xbf16>
    %223 = vector.shape_cast %222 : vector<1x14x28xbf16> to vector<14x28xbf16>
    %cst_198 = arith.constant dense<0.000000e+00> : vector<14x32xf32>
    %224 = tpu.matmul %223, %192, %cst_198 {dimension_numbers = #tpu.dot_dimension_numbers<[1], [0], [0], [1], [0, 0, 1, 1], [], []>} : vector<14x28xbf16>, vector<28x32xbf16>, vector<14x32xf32> -> vector<14x32xf32>
    %225 = arith.truncf %224 : vector<14x32xf32> to vector<14x32xbf16>
    %c2_199 = arith.constant 2 : index
    %c0_200 = arith.constant 0 : index
    %c0_201 = arith.constant 0 : index
    %226 = vector.load %arg21[%c2_199, %c0_200, %c0_201] : memref<3x32x64xbf16, #tpu.memory_space<vmem>>, vector<1x32x64xbf16>
    %227 = vector.shape_cast %226 : vector<1x32x64xbf16> to vector<32x64xbf16>
    %cst_202 = arith.constant dense<0.000000e+00> : vector<14x64xf32>
    %228 = tpu.matmul %225, %227, %cst_202 {dimension_numbers = #tpu.dot_dimension_numbers<[1], [0], [0], [1], [0, 0, 1, 1], [], []>} : vector<14x32xbf16>, vector<32x64xbf16>, vector<14x64xf32> -> vector<14x64xf32>
    %229 = arith.addf %221, %228 : vector<14x64xf32>
    %c0_203 = arith.constant 0 : index
    %c0_204 = arith.constant 0 : index
    %230 = vector.load %arg22[%c0_203, %c0_204] : memref<1x64xf32, #tpu.memory_space<vmem>>, vector<1x64xf32>
    %231 = vector.broadcast %230 : vector<1x64xf32> to vector<14x64xf32>
    %232 = arith.addf %229, %231 : vector<14x64xf32>
    %cst_205 = arith.constant 0.000000e+00 : f32
    %233 = vector.broadcast %cst_205 : f32 to vector<14x64xf32>
    %234 = arith.maximumf %232, %233 : vector<14x64xf32>
    %235 = arith.truncf %234 : vector<14x64xf32> to vector<14x64xbf16>
    %cst_206 = arith.constant 0.000000e+00 : f32
    %236 = vector.broadcast %cst_206 : f32 to vector<14x64xf32>
    %c0_207 = arith.constant 0 : index
    %c0_208 = arith.constant 0 : index
    %c0_209 = arith.constant 0 : index
    %237 = vector.load %arg6[%c0_207, %c0_208, %c0_209] : memref<3x14x14xbf16, #tpu.memory_space<vmem>>, vector<1x14x14xbf16>
    %238 = vector.shape_cast %237 : vector<1x14x14xbf16> to vector<14x14xbf16>
    %cst_210 = arith.constant dense<0.000000e+00> : vector<14x64xf32>
    %239 = tpu.matmul %238, %235, %cst_210 {dimension_numbers = #tpu.dot_dimension_numbers<[1], [0], [0], [1], [0, 0, 1, 1], [], []>} : vector<14x14xbf16>, vector<14x64xbf16>, vector<14x64xf32> -> vector<14x64xf32>
    %240 = arith.truncf %239 : vector<14x64xf32> to vector<14x64xbf16>
    %c0_211 = arith.constant 0 : index
    %c0_212 = arith.constant 0 : index
    %c0_213 = arith.constant 0 : index
    %241 = vector.load %arg23[%c0_211, %c0_212, %c0_213] : memref<3x64x64xbf16, #tpu.memory_space<vmem>>, vector<1x64x64xbf16>
    %242 = vector.shape_cast %241 : vector<1x64x64xbf16> to vector<64x64xbf16>
    %cst_214 = arith.constant dense<0.000000e+00> : vector<14x64xf32>
    %243 = tpu.matmul %240, %242, %cst_214 {dimension_numbers = #tpu.dot_dimension_numbers<[1], [0], [0], [1], [0, 0, 1, 1], [], []>} : vector<14x64xbf16>, vector<64x64xbf16>, vector<14x64xf32> -> vector<14x64xf32>
    %244 = arith.addf %236, %243 : vector<14x64xf32>
    %c1_215 = arith.constant 1 : index
    %c0_216 = arith.constant 0 : index
    %c0_217 = arith.constant 0 : index
    %245 = vector.load %arg6[%c1_215, %c0_216, %c0_217] : memref<3x14x14xbf16, #tpu.memory_space<vmem>>, vector<1x14x14xbf16>
    %246 = vector.shape_cast %245 : vector<1x14x14xbf16> to vector<14x14xbf16>
    %cst_218 = arith.constant dense<0.000000e+00> : vector<14x64xf32>
    %247 = tpu.matmul %246, %235, %cst_218 {dimension_numbers = #tpu.dot_dimension_numbers<[1], [0], [0], [1], [0, 0, 1, 1], [], []>} : vector<14x14xbf16>, vector<14x64xbf16>, vector<14x64xf32> -> vector<14x64xf32>
    %248 = arith.truncf %247 : vector<14x64xf32> to vector<14x64xbf16>
    %c1_219 = arith.constant 1 : index
    %c0_220 = arith.constant 0 : index
    %c0_221 = arith.constant 0 : index
    %249 = vector.load %arg23[%c1_219, %c0_220, %c0_221] : memref<3x64x64xbf16, #tpu.memory_space<vmem>>, vector<1x64x64xbf16>
    %250 = vector.shape_cast %249 : vector<1x64x64xbf16> to vector<64x64xbf16>
    %cst_222 = arith.constant dense<0.000000e+00> : vector<14x64xf32>
    %251 = tpu.matmul %248, %250, %cst_222 {dimension_numbers = #tpu.dot_dimension_numbers<[1], [0], [0], [1], [0, 0, 1, 1], [], []>} : vector<14x64xbf16>, vector<64x64xbf16>, vector<14x64xf32> -> vector<14x64xf32>
    %252 = arith.addf %244, %251 : vector<14x64xf32>
    %c2_223 = arith.constant 2 : index
    %c0_224 = arith.constant 0 : index
    %c0_225 = arith.constant 0 : index
    %253 = vector.load %arg6[%c2_223, %c0_224, %c0_225] : memref<3x14x14xbf16, #tpu.memory_space<vmem>>, vector<1x14x14xbf16>
    %254 = vector.shape_cast %253 : vector<1x14x14xbf16> to vector<14x14xbf16>
    %cst_226 = arith.constant dense<0.000000e+00> : vector<14x64xf32>
    %255 = tpu.matmul %254, %235, %cst_226 {dimension_numbers = #tpu.dot_dimension_numbers<[1], [0], [0], [1], [0, 0, 1, 1], [], []>} : vector<14x14xbf16>, vector<14x64xbf16>, vector<14x64xf32> -> vector<14x64xf32>
    %256 = arith.truncf %255 : vector<14x64xf32> to vector<14x64xbf16>
    %c2_227 = arith.constant 2 : index
    %c0_228 = arith.constant 0 : index
    %c0_229 = arith.constant 0 : index
    %257 = vector.load %arg23[%c2_227, %c0_228, %c0_229] : memref<3x64x64xbf16, #tpu.memory_space<vmem>>, vector<1x64x64xbf16>
    %258 = vector.shape_cast %257 : vector<1x64x64xbf16> to vector<64x64xbf16>
    %cst_230 = arith.constant dense<0.000000e+00> : vector<14x64xf32>
    %259 = tpu.matmul %256, %258, %cst_230 {dimension_numbers = #tpu.dot_dimension_numbers<[1], [0], [0], [1], [0, 0, 1, 1], [], []>} : vector<14x64xbf16>, vector<64x64xbf16>, vector<14x64xf32> -> vector<14x64xf32>
    %260 = arith.addf %252, %259 : vector<14x64xf32>
    %c0_231 = arith.constant 0 : index
    %c0_232 = arith.constant 0 : index
    %261 = vector.load %arg24[%c0_231, %c0_232] : memref<1x64xf32, #tpu.memory_space<vmem>>, vector<1x64xf32>
    %262 = vector.broadcast %261 : vector<1x64xf32> to vector<14x64xf32>
    %263 = arith.addf %260, %262 : vector<14x64xf32>
    %264 = arith.addf %263, %204 : vector<14x64xf32>
    %cst_233 = arith.constant 0.000000e+00 : f32
    %265 = vector.broadcast %cst_233 : f32 to vector<14x64xf32>
    %266 = arith.maximumf %264, %265 : vector<14x64xf32>
    %267 = arith.truncf %266 : vector<14x64xf32> to vector<14x64xbf16>
    %cst_234 = arith.constant 0.000000e+00 : f32
    %268 = vector.broadcast %cst_234 : f32 to vector<7x128xf32>
    %c0_235 = arith.constant 0 : index
    %c0_236 = arith.constant 0 : index
    %c0_237 = arith.constant 0 : index
    %269 = vector.load %arg7[%c0_235, %c0_236, %c0_237] : memref<1x7x14xbf16, #tpu.memory_space<vmem>>, vector<1x7x14xbf16>
    %270 = vector.shape_cast %269 : vector<1x7x14xbf16> to vector<7x14xbf16>
    %cst_238 = arith.constant dense<0.000000e+00> : vector<7x64xf32>
    %271 = tpu.matmul %270, %267, %cst_238 {dimension_numbers = #tpu.dot_dimension_numbers<[1], [0], [0], [1], [0, 0, 1, 1], [], []>} : vector<7x14xbf16>, vector<14x64xbf16>, vector<7x64xf32> -> vector<7x64xf32>
    %272 = arith.truncf %271 : vector<7x64xf32> to vector<7x64xbf16>
    %c0_239 = arith.constant 0 : index
    %c0_240 = arith.constant 0 : index
    %c0_241 = arith.constant 0 : index
    %273 = vector.load %arg25[%c0_239, %c0_240, %c0_241] : memref<1x64x128xbf16, #tpu.memory_space<vmem>>, vector<1x64x128xbf16>
    %274 = vector.shape_cast %273 : vector<1x64x128xbf16> to vector<64x128xbf16>
    %cst_242 = arith.constant dense<0.000000e+00> : vector<7x128xf32>
    %275 = tpu.matmul %272, %274, %cst_242 {dimension_numbers = #tpu.dot_dimension_numbers<[1], [0], [0], [1], [0, 0, 1, 1], [], []>} : vector<7x64xbf16>, vector<64x128xbf16>, vector<7x128xf32> -> vector<7x128xf32>
    %276 = arith.addf %268, %275 : vector<7x128xf32>
    %c0_243 = arith.constant 0 : index
    %c0_244 = arith.constant 0 : index
    %277 = vector.load %arg26[%c0_243, %c0_244] : memref<1x128xf32, #tpu.memory_space<vmem>>, vector<1x128xf32>
    %278 = vector.broadcast %277 : vector<1x128xf32> to vector<7x128xf32>
    %279 = arith.addf %276, %278 : vector<7x128xf32>
    %cst_245 = arith.constant 0.000000e+00 : f32
    %280 = vector.broadcast %cst_245 : f32 to vector<7x128xf32>
    %c0_246 = arith.constant 0 : index
    %c0_247 = arith.constant 0 : index
    %c0_248 = arith.constant 0 : index
    %281 = vector.load %arg8[%c0_246, %c0_247, %c0_248] : memref<3x7x14xbf16, #tpu.memory_space<vmem>>, vector<1x7x14xbf16>
    %282 = vector.shape_cast %281 : vector<1x7x14xbf16> to vector<7x14xbf16>
    %cst_249 = arith.constant dense<0.000000e+00> : vector<7x64xf32>
    %283 = tpu.matmul %282, %267, %cst_249 {dimension_numbers = #tpu.dot_dimension_numbers<[1], [0], [0], [1], [0, 0, 1, 1], [], []>} : vector<7x14xbf16>, vector<14x64xbf16>, vector<7x64xf32> -> vector<7x64xf32>
    %284 = arith.truncf %283 : vector<7x64xf32> to vector<7x64xbf16>
    %c0_250 = arith.constant 0 : index
    %c0_251 = arith.constant 0 : index
    %c0_252 = arith.constant 0 : index
    %285 = vector.load %arg27[%c0_250, %c0_251, %c0_252] : memref<3x64x128xbf16, #tpu.memory_space<vmem>>, vector<1x64x128xbf16>
    %286 = vector.shape_cast %285 : vector<1x64x128xbf16> to vector<64x128xbf16>
    %cst_253 = arith.constant dense<0.000000e+00> : vector<7x128xf32>
    %287 = tpu.matmul %284, %286, %cst_253 {dimension_numbers = #tpu.dot_dimension_numbers<[1], [0], [0], [1], [0, 0, 1, 1], [], []>} : vector<7x64xbf16>, vector<64x128xbf16>, vector<7x128xf32> -> vector<7x128xf32>
    %288 = arith.addf %280, %287 : vector<7x128xf32>
    %c1_254 = arith.constant 1 : index
    %c0_255 = arith.constant 0 : index
    %c0_256 = arith.constant 0 : index
    %289 = vector.load %arg8[%c1_254, %c0_255, %c0_256] : memref<3x7x14xbf16, #tpu.memory_space<vmem>>, vector<1x7x14xbf16>
    %290 = vector.shape_cast %289 : vector<1x7x14xbf16> to vector<7x14xbf16>
    %cst_257 = arith.constant dense<0.000000e+00> : vector<7x64xf32>
    %291 = tpu.matmul %290, %267, %cst_257 {dimension_numbers = #tpu.dot_dimension_numbers<[1], [0], [0], [1], [0, 0, 1, 1], [], []>} : vector<7x14xbf16>, vector<14x64xbf16>, vector<7x64xf32> -> vector<7x64xf32>
    %292 = arith.truncf %291 : vector<7x64xf32> to vector<7x64xbf16>
    %c1_258 = arith.constant 1 : index
    %c0_259 = arith.constant 0 : index
    %c0_260 = arith.constant 0 : index
    %293 = vector.load %arg27[%c1_258, %c0_259, %c0_260] : memref<3x64x128xbf16, #tpu.memory_space<vmem>>, vector<1x64x128xbf16>
    %294 = vector.shape_cast %293 : vector<1x64x128xbf16> to vector<64x128xbf16>
    %cst_261 = arith.constant dense<0.000000e+00> : vector<7x128xf32>
    %295 = tpu.matmul %292, %294, %cst_261 {dimension_numbers = #tpu.dot_dimension_numbers<[1], [0], [0], [1], [0, 0, 1, 1], [], []>} : vector<7x64xbf16>, vector<64x128xbf16>, vector<7x128xf32> -> vector<7x128xf32>
    %296 = arith.addf %288, %295 : vector<7x128xf32>
    %c2_262 = arith.constant 2 : index
    %c0_263 = arith.constant 0 : index
    %c0_264 = arith.constant 0 : index
    %297 = vector.load %arg8[%c2_262, %c0_263, %c0_264] : memref<3x7x14xbf16, #tpu.memory_space<vmem>>, vector<1x7x14xbf16>
    %298 = vector.shape_cast %297 : vector<1x7x14xbf16> to vector<7x14xbf16>
    %cst_265 = arith.constant dense<0.000000e+00> : vector<7x64xf32>
    %299 = tpu.matmul %298, %267, %cst_265 {dimension_numbers = #tpu.dot_dimension_numbers<[1], [0], [0], [1], [0, 0, 1, 1], [], []>} : vector<7x14xbf16>, vector<14x64xbf16>, vector<7x64xf32> -> vector<7x64xf32>
    %300 = arith.truncf %299 : vector<7x64xf32> to vector<7x64xbf16>
    %c2_266 = arith.constant 2 : index
    %c0_267 = arith.constant 0 : index
    %c0_268 = arith.constant 0 : index
    %301 = vector.load %arg27[%c2_266, %c0_267, %c0_268] : memref<3x64x128xbf16, #tpu.memory_space<vmem>>, vector<1x64x128xbf16>
    %302 = vector.shape_cast %301 : vector<1x64x128xbf16> to vector<64x128xbf16>
    %cst_269 = arith.constant dense<0.000000e+00> : vector<7x128xf32>
    %303 = tpu.matmul %300, %302, %cst_269 {dimension_numbers = #tpu.dot_dimension_numbers<[1], [0], [0], [1], [0, 0, 1, 1], [], []>} : vector<7x64xbf16>, vector<64x128xbf16>, vector<7x128xf32> -> vector<7x128xf32>
    %304 = arith.addf %296, %303 : vector<7x128xf32>
    %c0_270 = arith.constant 0 : index
    %c0_271 = arith.constant 0 : index
    %305 = vector.load %arg28[%c0_270, %c0_271] : memref<1x128xf32, #tpu.memory_space<vmem>>, vector<1x128xf32>
    %306 = vector.broadcast %305 : vector<1x128xf32> to vector<7x128xf32>
    %307 = arith.addf %304, %306 : vector<7x128xf32>
    %cst_272 = arith.constant 0.000000e+00 : f32
    %308 = vector.broadcast %cst_272 : f32 to vector<7x128xf32>
    %309 = arith.maximumf %307, %308 : vector<7x128xf32>
    %310 = arith.truncf %309 : vector<7x128xf32> to vector<7x128xbf16>
    %cst_273 = arith.constant 0.000000e+00 : f32
    %311 = vector.broadcast %cst_273 : f32 to vector<7x128xf32>
    %c0_274 = arith.constant 0 : index
    %c0_275 = arith.constant 0 : index
    %c0_276 = arith.constant 0 : index
    %312 = vector.load %arg9[%c0_274, %c0_275, %c0_276] : memref<3x7x7xbf16, #tpu.memory_space<vmem>>, vector<1x7x7xbf16>
    %313 = vector.shape_cast %312 : vector<1x7x7xbf16> to vector<7x7xbf16>
    %cst_277 = arith.constant dense<0.000000e+00> : vector<7x128xf32>
    %314 = tpu.matmul %313, %310, %cst_277 {dimension_numbers = #tpu.dot_dimension_numbers<[1], [0], [0], [1], [0, 0, 1, 1], [], []>} : vector<7x7xbf16>, vector<7x128xbf16>, vector<7x128xf32> -> vector<7x128xf32>
    %315 = arith.truncf %314 : vector<7x128xf32> to vector<7x128xbf16>
    %c0_278 = arith.constant 0 : index
    %c0_279 = arith.constant 0 : index
    %c0_280 = arith.constant 0 : index
    %316 = vector.load %arg29[%c0_278, %c0_279, %c0_280] : memref<3x128x128xbf16, #tpu.memory_space<vmem>>, vector<1x128x128xbf16>
    %317 = vector.shape_cast %316 : vector<1x128x128xbf16> to vector<128x128xbf16>
    %cst_281 = arith.constant dense<0.000000e+00> : vector<7x128xf32>
    %318 = tpu.matmul %315, %317, %cst_281 {dimension_numbers = #tpu.dot_dimension_numbers<[1], [0], [0], [1], [0, 0, 1, 1], [], []>} : vector<7x128xbf16>, vector<128x128xbf16>, vector<7x128xf32> -> vector<7x128xf32>
    %319 = arith.addf %311, %318 : vector<7x128xf32>
    %c1_282 = arith.constant 1 : index
    %c0_283 = arith.constant 0 : index
    %c0_284 = arith.constant 0 : index
    %320 = vector.load %arg9[%c1_282, %c0_283, %c0_284] : memref<3x7x7xbf16, #tpu.memory_space<vmem>>, vector<1x7x7xbf16>
    %321 = vector.shape_cast %320 : vector<1x7x7xbf16> to vector<7x7xbf16>
    %cst_285 = arith.constant dense<0.000000e+00> : vector<7x128xf32>
    %322 = tpu.matmul %321, %310, %cst_285 {dimension_numbers = #tpu.dot_dimension_numbers<[1], [0], [0], [1], [0, 0, 1, 1], [], []>} : vector<7x7xbf16>, vector<7x128xbf16>, vector<7x128xf32> -> vector<7x128xf32>
    %323 = arith.truncf %322 : vector<7x128xf32> to vector<7x128xbf16>
    %c1_286 = arith.constant 1 : index
    %c0_287 = arith.constant 0 : index
    %c0_288 = arith.constant 0 : index
    %324 = vector.load %arg29[%c1_286, %c0_287, %c0_288] : memref<3x128x128xbf16, #tpu.memory_space<vmem>>, vector<1x128x128xbf16>
    %325 = vector.shape_cast %324 : vector<1x128x128xbf16> to vector<128x128xbf16>
    %cst_289 = arith.constant dense<0.000000e+00> : vector<7x128xf32>
    %326 = tpu.matmul %323, %325, %cst_289 {dimension_numbers = #tpu.dot_dimension_numbers<[1], [0], [0], [1], [0, 0, 1, 1], [], []>} : vector<7x128xbf16>, vector<128x128xbf16>, vector<7x128xf32> -> vector<7x128xf32>
    %327 = arith.addf %319, %326 : vector<7x128xf32>
    %c2_290 = arith.constant 2 : index
    %c0_291 = arith.constant 0 : index
    %c0_292 = arith.constant 0 : index
    %328 = vector.load %arg9[%c2_290, %c0_291, %c0_292] : memref<3x7x7xbf16, #tpu.memory_space<vmem>>, vector<1x7x7xbf16>
    %329 = vector.shape_cast %328 : vector<1x7x7xbf16> to vector<7x7xbf16>
    %cst_293 = arith.constant dense<0.000000e+00> : vector<7x128xf32>
    %330 = tpu.matmul %329, %310, %cst_293 {dimension_numbers = #tpu.dot_dimension_numbers<[1], [0], [0], [1], [0, 0, 1, 1], [], []>} : vector<7x7xbf16>, vector<7x128xbf16>, vector<7x128xf32> -> vector<7x128xf32>
    %331 = arith.truncf %330 : vector<7x128xf32> to vector<7x128xbf16>
    %c2_294 = arith.constant 2 : index
    %c0_295 = arith.constant 0 : index
    %c0_296 = arith.constant 0 : index
    %332 = vector.load %arg29[%c2_294, %c0_295, %c0_296] : memref<3x128x128xbf16, #tpu.memory_space<vmem>>, vector<1x128x128xbf16>
    %333 = vector.shape_cast %332 : vector<1x128x128xbf16> to vector<128x128xbf16>
    %cst_297 = arith.constant dense<0.000000e+00> : vector<7x128xf32>
    %334 = tpu.matmul %331, %333, %cst_297 {dimension_numbers = #tpu.dot_dimension_numbers<[1], [0], [0], [1], [0, 0, 1, 1], [], []>} : vector<7x128xbf16>, vector<128x128xbf16>, vector<7x128xf32> -> vector<7x128xf32>
    %335 = arith.addf %327, %334 : vector<7x128xf32>
    %c0_298 = arith.constant 0 : index
    %c0_299 = arith.constant 0 : index
    %336 = vector.load %arg30[%c0_298, %c0_299] : memref<1x128xf32, #tpu.memory_space<vmem>>, vector<1x128xf32>
    %337 = vector.broadcast %336 : vector<1x128xf32> to vector<7x128xf32>
    %338 = arith.addf %335, %337 : vector<7x128xf32>
    %339 = arith.addf %338, %279 : vector<7x128xf32>
    %cst_300 = arith.constant 0.000000e+00 : f32
    %340 = vector.broadcast %cst_300 : f32 to vector<7x128xf32>
    %341 = arith.maximumf %339, %340 : vector<7x128xf32>
    %342 = arith.truncf %341 : vector<7x128xf32> to vector<7x128xbf16>
    %cst_301 = arith.constant 0.000000e+00 : f32
    %343 = vector.broadcast %cst_301 : f32 to vector<4x256xf32>
    %c0_302 = arith.constant 0 : index
    %c0_303 = arith.constant 0 : index
    %c0_304 = arith.constant 0 : index
    %344 = vector.load %arg10[%c0_302, %c0_303, %c0_304] : memref<1x4x7xbf16, #tpu.memory_space<vmem>>, vector<1x4x7xbf16>
    %345 = vector.shape_cast %344 : vector<1x4x7xbf16> to vector<4x7xbf16>
    %cst_305 = arith.constant dense<0.000000e+00> : vector<4x128xf32>
    %346 = tpu.matmul %345, %342, %cst_305 {dimension_numbers = #tpu.dot_dimension_numbers<[1], [0], [0], [1], [0, 0, 1, 1], [], []>} : vector<4x7xbf16>, vector<7x128xbf16>, vector<4x128xf32> -> vector<4x128xf32>
    %347 = arith.truncf %346 : vector<4x128xf32> to vector<4x128xbf16>
    %c0_306 = arith.constant 0 : index
    %c0_307 = arith.constant 0 : index
    %c0_308 = arith.constant 0 : index
    %348 = vector.load %arg31[%c0_306, %c0_307, %c0_308] : memref<1x128x256xbf16, #tpu.memory_space<vmem>>, vector<1x128x256xbf16>
    %349 = vector.shape_cast %348 : vector<1x128x256xbf16> to vector<128x256xbf16>
    %cst_309 = arith.constant dense<0.000000e+00> : vector<4x256xf32>
    %350 = tpu.matmul %347, %349, %cst_309 {dimension_numbers = #tpu.dot_dimension_numbers<[1], [0], [0], [1], [0, 0, 1, 1], [], []>} : vector<4x128xbf16>, vector<128x256xbf16>, vector<4x256xf32> -> vector<4x256xf32>
    %351 = arith.addf %343, %350 : vector<4x256xf32>
    %c0_310 = arith.constant 0 : index
    %c0_311 = arith.constant 0 : index
    %352 = vector.load %arg32[%c0_310, %c0_311] : memref<1x256xf32, #tpu.memory_space<vmem>>, vector<1x256xf32>
    %353 = vector.broadcast %352 : vector<1x256xf32> to vector<4x256xf32>
    %354 = arith.addf %351, %353 : vector<4x256xf32>
    %cst_312 = arith.constant 0.000000e+00 : f32
    %355 = vector.broadcast %cst_312 : f32 to vector<4x256xf32>
    %c0_313 = arith.constant 0 : index
    %c0_314 = arith.constant 0 : index
    %c0_315 = arith.constant 0 : index
    %356 = vector.load %arg11[%c0_313, %c0_314, %c0_315] : memref<3x4x7xbf16, #tpu.memory_space<vmem>>, vector<1x4x7xbf16>
    %357 = vector.shape_cast %356 : vector<1x4x7xbf16> to vector<4x7xbf16>
    %cst_316 = arith.constant dense<0.000000e+00> : vector<4x128xf32>
    %358 = tpu.matmul %357, %342, %cst_316 {dimension_numbers = #tpu.dot_dimension_numbers<[1], [0], [0], [1], [0, 0, 1, 1], [], []>} : vector<4x7xbf16>, vector<7x128xbf16>, vector<4x128xf32> -> vector<4x128xf32>
    %359 = arith.truncf %358 : vector<4x128xf32> to vector<4x128xbf16>
    %c0_317 = arith.constant 0 : index
    %c0_318 = arith.constant 0 : index
    %c0_319 = arith.constant 0 : index
    %360 = vector.load %arg33[%c0_317, %c0_318, %c0_319] : memref<3x128x256xbf16, #tpu.memory_space<vmem>>, vector<1x128x256xbf16>
    %361 = vector.shape_cast %360 : vector<1x128x256xbf16> to vector<128x256xbf16>
    %cst_320 = arith.constant dense<0.000000e+00> : vector<4x256xf32>
    %362 = tpu.matmul %359, %361, %cst_320 {dimension_numbers = #tpu.dot_dimension_numbers<[1], [0], [0], [1], [0, 0, 1, 1], [], []>} : vector<4x128xbf16>, vector<128x256xbf16>, vector<4x256xf32> -> vector<4x256xf32>
    %363 = arith.addf %355, %362 : vector<4x256xf32>
    %c1_321 = arith.constant 1 : index
    %c0_322 = arith.constant 0 : index
    %c0_323 = arith.constant 0 : index
    %364 = vector.load %arg11[%c1_321, %c0_322, %c0_323] : memref<3x4x7xbf16, #tpu.memory_space<vmem>>, vector<1x4x7xbf16>
    %365 = vector.shape_cast %364 : vector<1x4x7xbf16> to vector<4x7xbf16>
    %cst_324 = arith.constant dense<0.000000e+00> : vector<4x128xf32>
    %366 = tpu.matmul %365, %342, %cst_324 {dimension_numbers = #tpu.dot_dimension_numbers<[1], [0], [0], [1], [0, 0, 1, 1], [], []>} : vector<4x7xbf16>, vector<7x128xbf16>, vector<4x128xf32> -> vector<4x128xf32>
    %367 = arith.truncf %366 : vector<4x128xf32> to vector<4x128xbf16>
    %c1_325 = arith.constant 1 : index
    %c0_326 = arith.constant 0 : index
    %c0_327 = arith.constant 0 : index
    %368 = vector.load %arg33[%c1_325, %c0_326, %c0_327] : memref<3x128x256xbf16, #tpu.memory_space<vmem>>, vector<1x128x256xbf16>
    %369 = vector.shape_cast %368 : vector<1x128x256xbf16> to vector<128x256xbf16>
    %cst_328 = arith.constant dense<0.000000e+00> : vector<4x256xf32>
    %370 = tpu.matmul %367, %369, %cst_328 {dimension_numbers = #tpu.dot_dimension_numbers<[1], [0], [0], [1], [0, 0, 1, 1], [], []>} : vector<4x128xbf16>, vector<128x256xbf16>, vector<4x256xf32> -> vector<4x256xf32>
    %371 = arith.addf %363, %370 : vector<4x256xf32>
    %c2_329 = arith.constant 2 : index
    %c0_330 = arith.constant 0 : index
    %c0_331 = arith.constant 0 : index
    %372 = vector.load %arg11[%c2_329, %c0_330, %c0_331] : memref<3x4x7xbf16, #tpu.memory_space<vmem>>, vector<1x4x7xbf16>
    %373 = vector.shape_cast %372 : vector<1x4x7xbf16> to vector<4x7xbf16>
    %cst_332 = arith.constant dense<0.000000e+00> : vector<4x128xf32>
    %374 = tpu.matmul %373, %342, %cst_332 {dimension_numbers = #tpu.dot_dimension_numbers<[1], [0], [0], [1], [0, 0, 1, 1], [], []>} : vector<4x7xbf16>, vector<7x128xbf16>, vector<4x128xf32> -> vector<4x128xf32>
    %375 = arith.truncf %374 : vector<4x128xf32> to vector<4x128xbf16>
    %c2_333 = arith.constant 2 : index
    %c0_334 = arith.constant 0 : index
    %c0_335 = arith.constant 0 : index
    %376 = vector.load %arg33[%c2_333, %c0_334, %c0_335] : memref<3x128x256xbf16, #tpu.memory_space<vmem>>, vector<1x128x256xbf16>
    %377 = vector.shape_cast %376 : vector<1x128x256xbf16> to vector<128x256xbf16>
    %cst_336 = arith.constant dense<0.000000e+00> : vector<4x256xf32>
    %378 = tpu.matmul %375, %377, %cst_336 {dimension_numbers = #tpu.dot_dimension_numbers<[1], [0], [0], [1], [0, 0, 1, 1], [], []>} : vector<4x128xbf16>, vector<128x256xbf16>, vector<4x256xf32> -> vector<4x256xf32>
    %379 = arith.addf %371, %378 : vector<4x256xf32>
    %c0_337 = arith.constant 0 : index
    %c0_338 = arith.constant 0 : index
    %380 = vector.load %arg34[%c0_337, %c0_338] : memref<1x256xf32, #tpu.memory_space<vmem>>, vector<1x256xf32>
    %381 = vector.broadcast %380 : vector<1x256xf32> to vector<4x256xf32>
    %382 = arith.addf %379, %381 : vector<4x256xf32>
    %cst_339 = arith.constant 0.000000e+00 : f32
    %383 = vector.broadcast %cst_339 : f32 to vector<4x256xf32>
    %384 = arith.maximumf %382, %383 : vector<4x256xf32>
    %385 = arith.truncf %384 : vector<4x256xf32> to vector<4x256xbf16>
    %cst_340 = arith.constant 0.000000e+00 : f32
    %386 = vector.broadcast %cst_340 : f32 to vector<4x256xf32>
    %c0_341 = arith.constant 0 : index
    %c0_342 = arith.constant 0 : index
    %c0_343 = arith.constant 0 : index
    %387 = vector.load %arg12[%c0_341, %c0_342, %c0_343] : memref<3x4x4xbf16, #tpu.memory_space<vmem>>, vector<1x4x4xbf16>
    %388 = vector.shape_cast %387 : vector<1x4x4xbf16> to vector<4x4xbf16>
    %cst_344 = arith.constant dense<0.000000e+00> : vector<4x256xf32>
    %389 = tpu.matmul %388, %385, %cst_344 {dimension_numbers = #tpu.dot_dimension_numbers<[1], [0], [0], [1], [0, 0, 1, 1], [], []>} : vector<4x4xbf16>, vector<4x256xbf16>, vector<4x256xf32> -> vector<4x256xf32>
    %390 = arith.truncf %389 : vector<4x256xf32> to vector<4x256xbf16>
    %c0_345 = arith.constant 0 : index
    %c0_346 = arith.constant 0 : index
    %c0_347 = arith.constant 0 : index
    %391 = vector.load %arg35[%c0_345, %c0_346, %c0_347] : memref<3x256x256xbf16, #tpu.memory_space<vmem>>, vector<1x256x256xbf16>
    %392 = vector.shape_cast %391 : vector<1x256x256xbf16> to vector<256x256xbf16>
    %cst_348 = arith.constant dense<0.000000e+00> : vector<4x256xf32>
    %393 = tpu.matmul %390, %392, %cst_348 {dimension_numbers = #tpu.dot_dimension_numbers<[1], [0], [0], [1], [0, 0, 1, 1], [], []>} : vector<4x256xbf16>, vector<256x256xbf16>, vector<4x256xf32> -> vector<4x256xf32>
    %394 = arith.addf %386, %393 : vector<4x256xf32>
    %c1_349 = arith.constant 1 : index
    %c0_350 = arith.constant 0 : index
    %c0_351 = arith.constant 0 : index
    %395 = vector.load %arg12[%c1_349, %c0_350, %c0_351] : memref<3x4x4xbf16, #tpu.memory_space<vmem>>, vector<1x4x4xbf16>
    %396 = vector.shape_cast %395 : vector<1x4x4xbf16> to vector<4x4xbf16>
    %cst_352 = arith.constant dense<0.000000e+00> : vector<4x256xf32>
    %397 = tpu.matmul %396, %385, %cst_352 {dimension_numbers = #tpu.dot_dimension_numbers<[1], [0], [0], [1], [0, 0, 1, 1], [], []>} : vector<4x4xbf16>, vector<4x256xbf16>, vector<4x256xf32> -> vector<4x256xf32>
    %398 = arith.truncf %397 : vector<4x256xf32> to vector<4x256xbf16>
    %c1_353 = arith.constant 1 : index
    %c0_354 = arith.constant 0 : index
    %c0_355 = arith.constant 0 : index
    %399 = vector.load %arg35[%c1_353, %c0_354, %c0_355] : memref<3x256x256xbf16, #tpu.memory_space<vmem>>, vector<1x256x256xbf16>
    %400 = vector.shape_cast %399 : vector<1x256x256xbf16> to vector<256x256xbf16>
    %cst_356 = arith.constant dense<0.000000e+00> : vector<4x256xf32>
    %401 = tpu.matmul %398, %400, %cst_356 {dimension_numbers = #tpu.dot_dimension_numbers<[1], [0], [0], [1], [0, 0, 1, 1], [], []>} : vector<4x256xbf16>, vector<256x256xbf16>, vector<4x256xf32> -> vector<4x256xf32>
    %402 = arith.addf %394, %401 : vector<4x256xf32>
    %c2_357 = arith.constant 2 : index
    %c0_358 = arith.constant 0 : index
    %c0_359 = arith.constant 0 : index
    %403 = vector.load %arg12[%c2_357, %c0_358, %c0_359] : memref<3x4x4xbf16, #tpu.memory_space<vmem>>, vector<1x4x4xbf16>
    %404 = vector.shape_cast %403 : vector<1x4x4xbf16> to vector<4x4xbf16>
    %cst_360 = arith.constant dense<0.000000e+00> : vector<4x256xf32>
    %405 = tpu.matmul %404, %385, %cst_360 {dimension_numbers = #tpu.dot_dimension_numbers<[1], [0], [0], [1], [0, 0, 1, 1], [], []>} : vector<4x4xbf16>, vector<4x256xbf16>, vector<4x256xf32> -> vector<4x256xf32>
    %406 = arith.truncf %405 : vector<4x256xf32> to vector<4x256xbf16>
    %c2_361 = arith.constant 2 : index
    %c0_362 = arith.constant 0 : index
    %c0_363 = arith.constant 0 : index
    %407 = vector.load %arg35[%c2_361, %c0_362, %c0_363] : memref<3x256x256xbf16, #tpu.memory_space<vmem>>, vector<1x256x256xbf16>
    %408 = vector.shape_cast %407 : vector<1x256x256xbf16> to vector<256x256xbf16>
    %cst_364 = arith.constant dense<0.000000e+00> : vector<4x256xf32>
    %409 = tpu.matmul %406, %408, %cst_364 {dimension_numbers = #tpu.dot_dimension_numbers<[1], [0], [0], [1], [0, 0, 1, 1], [], []>} : vector<4x256xbf16>, vector<256x256xbf16>, vector<4x256xf32> -> vector<4x256xf32>
    %410 = arith.addf %402, %409 : vector<4x256xf32>
    %c0_365 = arith.constant 0 : index
    %c0_366 = arith.constant 0 : index
    %411 = vector.load %arg36[%c0_365, %c0_366] : memref<1x256xf32, #tpu.memory_space<vmem>>, vector<1x256xf32>
    %412 = vector.broadcast %411 : vector<1x256xf32> to vector<4x256xf32>
    %413 = arith.addf %410, %412 : vector<4x256xf32>
    %414 = arith.addf %413, %354 : vector<4x256xf32>
    %cst_367 = arith.constant 0.000000e+00 : f32
    %415 = vector.broadcast %cst_367 : f32 to vector<4x256xf32>
    %416 = arith.maximumf %414, %415 : vector<4x256xf32>
    %cst_368 = arith.constant dense<0.000000e+00> : vector<256xf32>
    %417 = vector.multi_reduction <add>, %416, %cst_368 [0] : vector<4x256xf32> to vector<256xf32>
    %418 = vector.shape_cast %417 : vector<256xf32> to vector<1x256xf32>
    %cst_369 = arith.constant 2.500000e-01 : f32
    %419 = vector.broadcast %cst_369 : f32 to vector<1x256xf32>
    %420 = arith.mulf %418, %419 : vector<1x256xf32>
    %421 = vector.shape_cast %420 : vector<1x256xf32> to vector<1x1x256xf32>
    %c0_370 = arith.constant 0 : index
    %c0_371 = arith.constant 0 : index
    %c0_372 = arith.constant 0 : index
    %422 = vector.load %arg37[%c0_370, %c0_371, %c0_372] : memref<1x1x256xf32, #tpu.memory_space<vmem>>, vector<1x1x256xf32>
    tpu.vector_store %arg37[%c0_370, %c0_371, %c0_372], %421 {strides = array<i32>} : memref<1x1x256xf32, #tpu.memory_space<vmem>>, vector<1x1x256xf32>,
    return
  }
  func.func @transform_0(%arg0: i32) -> (i32, i32, i32) {
    %c0_i32 = arith.constant 0 : i32
    %c0_i32_0 = arith.constant 0 : i32
    %c0_i32_1 = arith.constant 0 : i32
    return %arg0, %c0_i32, %c0_i32_0 : i32, i32, i32
  }
  func.func @transform_1(%arg0: i32) -> (i32, i32, i32) {
    %c0_i32 = arith.constant 0 : i32
    %c0_i32_0 = arith.constant 0 : i32
    %c0_i32_1 = arith.constant 0 : i32
    %c0_i32_2 = arith.constant 0 : i32
    return %c0_i32, %c0_i32_0, %c0_i32_1 : i32, i32, i32
  }
  func.func @transform_2(%arg0: i32) -> (i32, i32, i32) {
    %c0_i32 = arith.constant 0 : i32
    %c0_i32_0 = arith.constant 0 : i32
    %c0_i32_1 = arith.constant 0 : i32
    %c0_i32_2 = arith.constant 0 : i32
    return %c0_i32, %c0_i32_0, %c0_i32_1 : i32, i32, i32
  }
  func.func @transform_3(%arg0: i32) -> (i32, i32, i32) {
    %c0_i32 = arith.constant 0 : i32
    %c0_i32_0 = arith.constant 0 : i32
    %c0_i32_1 = arith.constant 0 : i32
    %c0_i32_2 = arith.constant 0 : i32
    return %c0_i32, %c0_i32_0, %c0_i32_1 : i32, i32, i32
  }
  func.func @transform_4(%arg0: i32) -> (i32, i32, i32) {
    %c0_i32 = arith.constant 0 : i32
    %c0_i32_0 = arith.constant 0 : i32
    %c0_i32_1 = arith.constant 0 : i32
    %c0_i32_2 = arith.constant 0 : i32
    return %c0_i32, %c0_i32_0, %c0_i32_1 : i32, i32, i32
  }
  func.func @transform_5(%arg0: i32) -> (i32, i32, i32) {
    %c0_i32 = arith.constant 0 : i32
    %c0_i32_0 = arith.constant 0 : i32
    %c0_i32_1 = arith.constant 0 : i32
    %c0_i32_2 = arith.constant 0 : i32
    return %c0_i32, %c0_i32_0, %c0_i32_1 : i32, i32, i32
  }
  func.func @transform_6(%arg0: i32) -> (i32, i32, i32) {
    %c0_i32 = arith.constant 0 : i32
    %c0_i32_0 = arith.constant 0 : i32
    %c0_i32_1 = arith.constant 0 : i32
    %c0_i32_2 = arith.constant 0 : i32
    return %c0_i32, %c0_i32_0, %c0_i32_1 : i32, i32, i32
  }
  func.func @transform_7(%arg0: i32) -> (i32, i32, i32) {
    %c0_i32 = arith.constant 0 : i32
    %c0_i32_0 = arith.constant 0 : i32
    %c0_i32_1 = arith.constant 0 : i32
    %c0_i32_2 = arith.constant 0 : i32
    return %c0_i32, %c0_i32_0, %c0_i32_1 : i32, i32, i32
  }
  func.func @transform_8(%arg0: i32) -> (i32, i32, i32) {
    %c0_i32 = arith.constant 0 : i32
    %c0_i32_0 = arith.constant 0 : i32
    %c0_i32_1 = arith.constant 0 : i32
    %c0_i32_2 = arith.constant 0 : i32
    return %c0_i32, %c0_i32_0, %c0_i32_1 : i32, i32, i32
  }
  func.func @transform_9(%arg0: i32) -> (i32, i32, i32) {
    %c0_i32 = arith.constant 0 : i32
    %c0_i32_0 = arith.constant 0 : i32
    %c0_i32_1 = arith.constant 0 : i32
    %c0_i32_2 = arith.constant 0 : i32
    return %c0_i32, %c0_i32_0, %c0_i32_1 : i32, i32, i32
  }
  func.func @transform_10(%arg0: i32) -> (i32, i32, i32) {
    %c0_i32 = arith.constant 0 : i32
    %c0_i32_0 = arith.constant 0 : i32
    %c0_i32_1 = arith.constant 0 : i32
    %c0_i32_2 = arith.constant 0 : i32
    return %c0_i32, %c0_i32_0, %c0_i32_1 : i32, i32, i32
  }
  func.func @transform_11(%arg0: i32) -> (i32, i32, i32) {
    %c0_i32 = arith.constant 0 : i32
    %c0_i32_0 = arith.constant 0 : i32
    %c0_i32_1 = arith.constant 0 : i32
    %c0_i32_2 = arith.constant 0 : i32
    return %c0_i32, %c0_i32_0, %c0_i32_1 : i32, i32, i32
  }
  func.func @transform_12(%arg0: i32) -> (i32, i32, i32) {
    %c0_i32 = arith.constant 0 : i32
    %c0_i32_0 = arith.constant 0 : i32
    %c0_i32_1 = arith.constant 0 : i32
    %c0_i32_2 = arith.constant 0 : i32
    return %c0_i32, %c0_i32_0, %c0_i32_1 : i32, i32, i32
  }
  func.func @transform_13(%arg0: i32) -> (i32, i32) {
    %c0_i32 = arith.constant 0 : i32
    %c0_i32_0 = arith.constant 0 : i32
    %c0_i32_1 = arith.constant 0 : i32
    return %c0_i32, %c0_i32_0 : i32, i32
  }
  func.func @transform_14(%arg0: i32) -> (i32, i32, i32) {
    %c0_i32 = arith.constant 0 : i32
    %c0_i32_0 = arith.constant 0 : i32
    %c0_i32_1 = arith.constant 0 : i32
    %c0_i32_2 = arith.constant 0 : i32
    return %c0_i32, %c0_i32_0, %c0_i32_1 : i32, i32, i32
  }
  func.func @transform_15(%arg0: i32) -> (i32, i32) {
    %c0_i32 = arith.constant 0 : i32
    %c0_i32_0 = arith.constant 0 : i32
    %c0_i32_1 = arith.constant 0 : i32
    return %c0_i32, %c0_i32_0 : i32, i32
  }
  func.func @transform_16(%arg0: i32) -> (i32, i32, i32) {
    %c0_i32 = arith.constant 0 : i32
    %c0_i32_0 = arith.constant 0 : i32
    %c0_i32_1 = arith.constant 0 : i32
    %c0_i32_2 = arith.constant 0 : i32
    return %c0_i32, %c0_i32_0, %c0_i32_1 : i32, i32, i32
  }
  func.func @transform_17(%arg0: i32) -> (i32, i32) {
    %c0_i32 = arith.constant 0 : i32
    %c0_i32_0 = arith.constant 0 : i32
    %c0_i32_1 = arith.constant 0 : i32
    return %c0_i32, %c0_i32_0 : i32, i32
  }
  func.func @transform_18(%arg0: i32) -> (i32, i32, i32) {
    %c0_i32 = arith.constant 0 : i32
    %c0_i32_0 = arith.constant 0 : i32
    %c0_i32_1 = arith.constant 0 : i32
    %c0_i32_2 = arith.constant 0 : i32
    return %c0_i32, %c0_i32_0, %c0_i32_1 : i32, i32, i32
  }
  func.func @transform_19(%arg0: i32) -> (i32, i32) {
    %c0_i32 = arith.constant 0 : i32
    %c0_i32_0 = arith.constant 0 : i32
    %c0_i32_1 = arith.constant 0 : i32
    return %c0_i32, %c0_i32_0 : i32, i32
  }
  func.func @transform_20(%arg0: i32) -> (i32, i32, i32) {
    %c0_i32 = arith.constant 0 : i32
    %c0_i32_0 = arith.constant 0 : i32
    %c0_i32_1 = arith.constant 0 : i32
    %c0_i32_2 = arith.constant 0 : i32
    return %c0_i32, %c0_i32_0, %c0_i32_1 : i32, i32, i32
  }
  func.func @transform_21(%arg0: i32) -> (i32, i32) {
    %c0_i32 = arith.constant 0 : i32
    %c0_i32_0 = arith.constant 0 : i32
    %c0_i32_1 = arith.constant 0 : i32
    return %c0_i32, %c0_i32_0 : i32, i32
  }
  func.func @transform_22(%arg0: i32) -> (i32, i32, i32) {
    %c0_i32 = arith.constant 0 : i32
    %c0_i32_0 = arith.constant 0 : i32
    %c0_i32_1 = arith.constant 0 : i32
    %c0_i32_2 = arith.constant 0 : i32
    return %c0_i32, %c0_i32_0, %c0_i32_1 : i32, i32, i32
  }
  func.func @transform_23(%arg0: i32) -> (i32, i32) {
    %c0_i32 = arith.constant 0 : i32
    %c0_i32_0 = arith.constant 0 : i32
    %c0_i32_1 = arith.constant 0 : i32
    return %c0_i32, %c0_i32_0 : i32, i32
  }
  func.func @transform_24(%arg0: i32) -> (i32, i32, i32) {
    %c0_i32 = arith.constant 0 : i32
    %c0_i32_0 = arith.constant 0 : i32
    %c0_i32_1 = arith.constant 0 : i32
    %c0_i32_2 = arith.constant 0 : i32
    return %c0_i32, %c0_i32_0, %c0_i32_1 : i32, i32, i32
  }
  func.func @transform_25(%arg0: i32) -> (i32, i32) {
    %c0_i32 = arith.constant 0 : i32
    %c0_i32_0 = arith.constant 0 : i32
    %c0_i32_1 = arith.constant 0 : i32
    return %c0_i32, %c0_i32_0 : i32, i32
  }
  func.func @transform_26(%arg0: i32) -> (i32, i32, i32) {
    %c0_i32 = arith.constant 0 : i32
    %c0_i32_0 = arith.constant 0 : i32
    %c0_i32_1 = arith.constant 0 : i32
    %c0_i32_2 = arith.constant 0 : i32
    return %c0_i32, %c0_i32_0, %c0_i32_1 : i32, i32, i32
  }
  func.func @transform_27(%arg0: i32) -> (i32, i32) {
    %c0_i32 = arith.constant 0 : i32
    %c0_i32_0 = arith.constant 0 : i32
    %c0_i32_1 = arith.constant 0 : i32
    return %c0_i32, %c0_i32_0 : i32, i32
  }
  func.func @transform_28(%arg0: i32) -> (i32, i32, i32) {
    %c0_i32 = arith.constant 0 : i32
    %c0_i32_0 = arith.constant 0 : i32
    %c0_i32_1 = arith.constant 0 : i32
    %c0_i32_2 = arith.constant 0 : i32
    return %c0_i32, %c0_i32_0, %c0_i32_1 : i32, i32, i32
  }
  func.func @transform_29(%arg0: i32) -> (i32, i32) {
    %c0_i32 = arith.constant 0 : i32
    %c0_i32_0 = arith.constant 0 : i32
    %c0_i32_1 = arith.constant 0 : i32
    return %c0_i32, %c0_i32_0 : i32, i32
  }
  func.func @transform_30(%arg0: i32) -> (i32, i32, i32) {
    %c0_i32 = arith.constant 0 : i32
    %c0_i32_0 = arith.constant 0 : i32
    %c0_i32_1 = arith.constant 0 : i32
    %c0_i32_2 = arith.constant 0 : i32
    return %c0_i32, %c0_i32_0, %c0_i32_1 : i32, i32, i32
  }
  func.func @transform_31(%arg0: i32) -> (i32, i32) {
    %c0_i32 = arith.constant 0 : i32
    %c0_i32_0 = arith.constant 0 : i32
    %c0_i32_1 = arith.constant 0 : i32
    return %c0_i32, %c0_i32_0 : i32, i32
  }
  func.func @transform_32(%arg0: i32) -> (i32, i32, i32) {
    %c0_i32 = arith.constant 0 : i32
    %c0_i32_0 = arith.constant 0 : i32
    %c0_i32_1 = arith.constant 0 : i32
    %c0_i32_2 = arith.constant 0 : i32
    return %c0_i32, %c0_i32_0, %c0_i32_1 : i32, i32, i32
  }
  func.func @transform_33(%arg0: i32) -> (i32, i32) {
    %c0_i32 = arith.constant 0 : i32
    %c0_i32_0 = arith.constant 0 : i32
    %c0_i32_1 = arith.constant 0 : i32
    return %c0_i32, %c0_i32_0 : i32, i32
  }
  func.func @transform_34(%arg0: i32) -> (i32, i32, i32) {
    %c0_i32 = arith.constant 0 : i32
    %c0_i32_0 = arith.constant 0 : i32
    %c0_i32_1 = arith.constant 0 : i32
    %c0_i32_2 = arith.constant 0 : i32
    return %c0_i32, %c0_i32_0, %c0_i32_1 : i32, i32, i32
  }
  func.func @transform_35(%arg0: i32) -> (i32, i32) {
    %c0_i32 = arith.constant 0 : i32
    %c0_i32_0 = arith.constant 0 : i32
    %c0_i32_1 = arith.constant 0 : i32
    return %c0_i32, %c0_i32_0 : i32, i32
  }
  func.func @transform_36(%arg0: i32) -> (i32, i32, i32) {
    %c0_i32 = arith.constant 0 : i32
    %c0_i32_0 = arith.constant 0 : i32
    %c0_i32_1 = arith.constant 0 : i32
    return %arg0, %c0_i32, %c0_i32_0 : i32, i32, i32
  }
}

</mosaic_0001>

<bundles_post_ra>
// kernel: _lambda_.1
= control target key start
LH: loop header
LB: loop body
LE: loop exit
PB: predicated region body
PF: predicated region fallthrough
CT: control target
= control target key end

     0   :  { %s10402_s6 = smov 1   ;;  %s10403_s10 = smov 2   ;;  %s11646_s0 = inlined_call_operand.smem [shape: u32[37], index: -1, kind: input, shape index: {}] }
   0x1   :  { %s10462_s5 = sld [smem:[%s11646_s0]]   ;;  %s10404_s14 = smov 3  }
   0x2   :  { %s10467_s9 = sld [smem:[%s11646_s0 + %s10402_s6]]   ;;  %s10405_s18 = smov 4  }
   0x3   :  { %s10472_s13 = sld [smem:[%s11646_s0 + %s10403_s10]]   ;;  %s10406_s22 = smov 5  }
   0x4   :  { %s10477_s17 = sld [smem:[%s11646_s0 + %s10404_s14]]   ;;  %s10407_s26 = smov 6  }
   0x5   :  { %s10482_s21 = sld [smem:[%s11646_s0 + %s10405_s18]]   ;;  %s10408_s30 = smov 7  }
   0x6   :  { %s10487_s25 = sld [smem:[%s11646_s0 + %s10406_s22]]   ;;  %s10409_s4 = smov 8  }
   0x7   :  { %s10492_s29 = sld [smem:[%s11646_s0 + %s10407_s26]]   ;;  %s10410_s10 = smov 9  }
   0x8   :  { %s10497_s3 = sld [smem:[%s11646_s0 + %s10408_s30]]   ;;  %s10411_s15 = smov 10  }
   0x9   :  { %s10502_s8 = sld [smem:[%s11646_s0 + %s10409_s4]]   ;;  %s10412_s20 = smov 11  }
   0xa   :  { %11659 = sst [smem:[#allocation17_spill]] %s10477_s17  ;;  %s10413_s26 = smov 12  }
   0xb   :  { %11660 = sst [smem:[#allocation18_spill]] %s10482_s21  ;;  %s10414_s1 = smov 13  }
   0xc   :  { %11661 = sst [smem:[#allocation19_spill]] %s10487_s25  ;;  %s10415_s7 = smov 14  }
   0xd   :  { %11662 = sst [smem:[#allocation20_spill]] %s10492_s29  ;;  %s10417_s22 = smov 16  }
   0xe   :  { %11663 = sst [smem:[#allocation21_spill]] %s10497_s3  ;;  %s10418_s28 = smov 17  }
   0xf   :  { %11664 = sst [smem:[#allocation22_spill]] %s10502_s8 }
  0x10   :  { %s10507_s14 = sld [smem:[%s11646_s0 + %s10410_s10]]  }
  0x11   :  { %s10512_s19 = sld [smem:[%s11646_s0 + %s10411_s15]]   ;;  %s10416_s15 = smov 15  }
  0x12   :  { %s10517_s24 = sld [smem:[%s11646_s0 + %s10412_s20]]  }
  0x13   :  { %s10522_s30 = sld [smem:[%s11646_s0 + %s10413_s26]]  }
  0x14   :  { %s10527_s6 = sld [smem:[%s11646_s0 + %s10414_s1]]  }
  0x15   :  { %s10532_s12 = sld [smem:[%s11646_s0 + %s10415_s7]]   ;;  %s10419_s7 = smov 18  }
  0x16   :  { %11665 = sst [smem:[#allocation23_spill]] %s10507_s14 }
  0x17   :  { %11666 = sst [smem:[#allocation24_spill]] %s10512_s19 }
  0x18   :  { %11667 = sst [smem:[#allocation25_spill]] %s10517_s24 }
  0x19   :  { %s10537_s20 = sld [smem:[%s11646_s0 + %s10416_s15]]   ;;  %s10420_s15 = smov 19  }
  0x1a   :  { %s10542_s27 = sld [smem:[%s11646_s0 + %s10417_s22]]   ;;  %s10421_s22 = smov 20  }
  0x1b   :  { %s10547_s4 = sld [smem:[%s11646_s0 + %s10418_s28]]   ;;  %s10422_s28 = smov 21  }
  0x1c   :  { %s10552_s24 = sld [smem:[%s11646_s0 + %s10419_s7]]   ;;  %s10423_s7 = smov 22  }
  0x1d   :  { %s10557_s19 = sld [smem:[%s11646_s0 + %s10420_s15]]   ;;  %s10424_s15 = smov 23  }
  0x1e   :  { %s10562_s14 = sld [smem:[%s11646_s0 + %s10421_s22]]   ;;  %s10425_s22 = smov 24  }
  0x1f   :  { %s10567_s8 = sld [smem:[%s11646_s0 + %s10422_s28]]   ;;  %s10426_s28 = smov 25  }
  0x20   :  { %s10572_s3 = sld [smem:[%s11646_s0 + %s10423_s7]]   ;;  %s10427_s7 = smov 26  }
  0x21   :  { %s10577_s29 = sld [smem:[%s11646_s0 + %s10424_s15]]   ;;  %s10428_s15 = smov 27  }
  0x22   :  { %s10587_s25 = sld [smem:[%s11646_s0 + %s10426_s28]]   ;;  %s10430_s28 = smov 29  }
  0x23   :  { %11668 = sst [smem:[#allocation26_spill]] %s10557_s19 }
  0x24   :  { %s10582_s19 = sld [smem:[%s11646_s0 + %s10425_s22]]   ;;  %s10429_s22 = smov 28  }
  0x25   :  { %11669 = sst [smem:[#allocation27_spill]] %s10567_s8 }
  0x26   :  { %11670 = sst [smem:[#allocation28_spill]] %s10572_s3 }
  0x27   :  { %11671 = sst [smem:[#allocation29_spill]] %s10577_s29 }
  0x28   :  { %11672 = sst [smem:[#allocation30_spill]] %s10587_s25 }
  0x29   :  { %s10592_s3 = sld [smem:[%s11646_s0 + %s10427_s7]]   ;;  %s10431_s7 = smov 30  }
  0x2a   :  { %s10597_s29 = sld [smem:[%s11646_s0 + %s10428_s15]]   ;;  %s10432_s15 = smov 31  }
  0x2b   :  { %s10602_s8 = sld [smem:[%s11646_s0 + %s10429_s22]]   ;;  %s10433_s22 = smov 32  }
  0x2c   :  { %s10607_s25 = sld [smem:[%s11646_s0 + %s10430_s28]]   ;;  %s10434_s28 = smov 33  }
  0x2d   :  { %s10612_s21 = sld [smem:[%s11646_s0 + %s10431_s7]]   ;;  %s10435_s7 = smov 34  }
  0x2e   :  { %s10632_s17 = sld [smem:[%s11646_s0 + %s10435_s7]]  }
  0x2f   :  { %11673 = sst [smem:[#allocation31_spill]] %s10592_s3 }
  0x30   :  { %11674 = sst [smem:[#allocation32_spill]] %s10597_s29 }
  0x31   :  { %11675 = sst [smem:[#allocation33_spill]] %s10602_s8 }
  0x32   :  { %11676 = sst [smem:[#allocation34_spill]] %s10607_s25 }
  0x33   :  { %s10617_s29 = sld [smem:[%s11646_s0 + %s10432_s15]]   ;;  %s10436_s15 = smov 35  }
  0x34   :  { %s10622_s8 = sld [smem:[%s11646_s0 + %s10433_s22]]   ;;  %s10437_s22 = smov 36  }
  0x35   :  { %s10627_s25 = sld [smem:[%s11646_s0 + %s10434_s28]]  }
  0x39   :  { %11677 = sst [smem:[#allocation35_spill]] %s10617_s29 }
  0x3a   :  { %11678 = sst [smem:[#allocation36_spill]] %s10622_s8 }
  0x3b   :  { %s10637_s29 = sld [smem:[%s11646_s0 + %s10436_s15]]  }
  0x3c   :  { %s10642_s8 = sld [smem:[%s11646_s0 + %s10437_s22]]  }
  0x3d   :  { %78 = vsyncpa [#allocation3], 0 }
  0x3e   :  { %79 = vsyncpa [#allocation5], 0 }
  0x3f   :  { %80 = vsyncpa [#allocation8], 0 }
  0x40   :  { %81 = vsyncpa [#allocation11], 0  ;;  %s10644_s28 = smov 0  }
  0x41 LB: > { %s11679_s3 = sld [smem:[#allocation31_spill]]  ;;  %s10650_s1 = sadd.s32 4294967295, %s10400_s28   ;;  %s10400_s28 = sphi %s10644_s28, %s87_s28  }
  0x42   : > { %p7903_p0 = scmp.ge.s32.totalorder %s10400_s28, 1  ;;  %p879_p1 = scmp.lt.s32.totalorder %s10400_s28, 3 }
  0x43   : > { %p11656_p2 = scmp.eq.s32.totalorder %s10650_s1, 0  ;;  %s10438_s2 = smov [#allocation4]  }
  0x44   : > { %p10655_p3 = pnand %p7903_p0, %p879_p1  ;;  %s946_s7 = sshll.u32 %s10438_s2, 4  ;;  %s10659_s7 = int_to_ptr.vmem [resolvable:$true] %s946_s7 }
  0x45   : > { %s10439_s10 = smov [#allocation7]   ;;  %s10440_s16 = smov [#allocation10]  }
  0x46   : > { %s11680_s0 = scalar_select %p10655_p3, 1, 0 }
  0x47   : > { %p9716_p4 = pneg %p10655_p3  ;;  %s978_s11 = sshll.u32 %s10439_s10, 4  ;;  %s10663_s11 = int_to_ptr.vmem [resolvable:$true] %s978_s11 }
  0x48   : > { %s1016_s18 = sshll.u32 %s10440_s16, 4  ;;  %s10441_s22 = smov [#allocation2]   ;;  %s10671_s18 = int_to_ptr.vmem [resolvable:$true] %s1016_s18 }
  0x49   : > { %p10667_p5 = pnand %p11656_p2, %p9716_p4  ;;  %s10673_s23 = sshll.u32 %s10441_s22, 4  ;;  %s931_s23 = int_to_ptr.vmem [resolvable:$true] %s10673_s23 }
  0x4a   : > { %s10182_s26 = scalar_lea.hbm %s10542_s27, 768 }
  0x4b   : > { %p10183_p6 = scmp.ne.s32.totalorder %s10542_s27, %s10182_s26  ;;  %p10679_p7 = pneg %p10667_p5 }
  0x4c   : > { %p10189_p10 = scmp.lt.u32.totalorder %s10182_s26, %s10542_s27 }
  0x4d   : > { %p10185_p8 = pnand %p10679_p7, %p10183_p6 }
  0x4f   : > { %p10186_p9 = pneg %p10185_p8 }
  0x51   : > { %p10191_p11 = pnand %p10189_p10, %p10186_p9 }
  0x53   : > { %10194 = shalt.err (!%p10191_p11)
}
  0x54   : > { %s10195_s10 = scalar_lea.vmem %s10659_s7, 768  ;;  %p10203_p1 = scmp.lt.s32.totalorder %s10659_s7, %s10659_s7 }
  0x55   : > { %p10196_p12 = scmp.ne.s32.totalorder %s10659_s7, %s10195_s10  ;;  %p10204_p4 = scmp.lt.s32.totalorder %s10195_s10, %s10195_s10 }
  0x57   : > { %p10198_p13 = pnand %p10196_p12, %p10679_p7  ;;  %p10205_p2 = por %p10204_p4, %p10203_p1 }
  0x59   : > { %p10199_p0 = pneg %p10198_p13 }
  0x5b   : > { %p10206_p3 = pnand %p10205_p2, %p10199_p0 }
  0x5d   : > { %10209 = shalt.err (!%p10206_p3)
}
  0x5e   : > { %s10442_s16 = smov 64   ;;  %s10443_s22 = smov 4  }
  0x5f   : > { %9722 = dma.hbm_to_vmem [thread:$0]  (!%p10667_p5), %s10542_s27, 768, %s10659_s7, [#allocation5], %s10442_s16, %s10442_s16, %s10443_s22  }
  0x60   : > { %s10210_s26 = scalar_lea.hbm %s10562_s14, 768 }
  0x61   : > { %p10211_p6 = scmp.ne.s32.totalorder %s10562_s14, %s10210_s26  ;;  %p10217_p3 = scmp.lt.u32.totalorder %s10210_s26, %s10562_s14 }
  0x63   : > { %p10213_p8 = pnand %p10211_p6, %p10679_p7 }
  0x65   : > { %p10214_p2 = pneg %p10213_p8 }
  0x67   : > { %p10219_p9 = pnand %p10217_p3, %p10214_p2 }
  0x69   : > { %10222 = shalt.err (!%p10219_p9)
}
  0x6a   : > { %s10223_s10 = scalar_lea.vmem %s10663_s11, 768  ;;  %p10231_p13 = scmp.lt.s32.totalorder %s10663_s11, %s10663_s11 }
  0x6b   : > { %p10224_p10 = scmp.ne.s32.totalorder %s10663_s11, %s10223_s10  ;;  %p10232_p0 = scmp.lt.s32.totalorder %s10223_s10, %s10223_s10 }
  0x6d   : > { %p10226_p11 = pnand %p10224_p10, %p10679_p7  ;;  %p10233_p1 = por %p10232_p0, %p10231_p13 }
  0x6f   : > { %p10227_p12 = pneg %p10226_p11 }
  0x71   : > { %p10234_p4 = pnand %p10233_p1, %p10227_p12 }
  0x73   : > { %10237 = shalt.err (!%p10234_p4)
}
  0x74   : > { %9728 = dma.hbm_to_vmem [thread:$0]  (!%p10667_p5), %s10562_s14, 768, %s10663_s11, [#allocation8], %s10442_s16, %s10442_s16, %s10443_s22  }
  0x75   : > { %s10238_s7 = scalar_lea.hbm %s11679_s3, 1536 }
  0x76   : > { %p10239_p6 = scmp.ne.s32.totalorder %s11679_s3, %s10238_s7  ;;  %p10245_p3 = scmp.lt.u32.totalorder %s10238_s7, %s11679_s3 }
  0x78   : > { %p10241_p8 = pnand %p10239_p6, %p10679_p7 }
  0x7a   : > { %p10242_p2 = pneg %p10241_p8 }
  0x7c   : > { %p10247_p9 = pnand %p10245_p3, %p10242_p2 }
  0x7e   : > { %10250 = shalt.err (!%p10247_p9)
}
  0x7f   : > { %s10251_s26 = scalar_lea.vmem %s10671_s18, 1536  ;;  %p10259_p13 = scmp.lt.s32.totalorder %s10671_s18, %s10671_s18 }
  0x80   : > { %p10252_p10 = scmp.ne.s32.totalorder %s10671_s18, %s10251_s26  ;;  %p10260_p0 = scmp.lt.s32.totalorder %s10251_s26, %s10251_s26 }
  0x82   : > { %p10254_p11 = pnand %p10252_p10, %p10679_p7  ;;  %p10261_p1 = por %p10260_p0, %p10259_p13 }
  0x84   : > { %p10255_p12 = pneg %p10254_p11 }
  0x86   : > { %p10262_p4 = pnand %p10261_p1, %p10255_p12 }
  0x88   : > { %10265 = shalt.err (!%p10262_p4)
}
  0x89   : > { %9734 = dma.hbm_to_vmem [thread:$0]  (!%p10667_p5), %s11679_s3, 1536, %s10671_s18, [#allocation11], %s10442_s16, %s10442_s16, %s10443_s22  }
  0x8a   : > { %s10266_s11 = scalar_lea.hbm %s10532_s12, 768 }
  0x8b   : > { %p10267_p6 = scmp.ne.s32.totalorder %s10532_s12, %s10266_s11  ;;  %p10273_p3 = scmp.lt.u32.totalorder %s10266_s11, %s10532_s12 }
  0x8d   : > { %p10269_p8 = pnand %p10267_p6, %p10679_p7 }
  0x8f   : > { %p10270_p2 = pneg %p10269_p8 }
  0x91   : > { %p10275_p9 = pnand %p10273_p3, %p10270_p2 }
  0x93   : > { %10278 = shalt.err (!%p10275_p9)
}
  0x94   : > { %s10279_s10 = scalar_lea.vmem %s931_s23, 768  ;;  %p10287_p13 = scmp.lt.s32.totalorder %s931_s23, %s931_s23 }
  0x95   : > { %p10280_p10 = scmp.ne.s32.totalorder %s931_s23, %s10279_s10  ;;  %p10288_p0 = scmp.lt.s32.totalorder %s10279_s10, %s10279_s10 }
  0x97   : > { %p10282_p11 = pnand %p10280_p10, %p10679_p7  ;;  %p10289_p1 = por %p10288_p0, %p10287_p13 }
  0x99   : > { %p10283_p12 = pneg %p10282_p11 }
  0x9b   : > { %p10290_p4 = pnand %p10289_p1, %p10283_p12 }
  0x9d   : > { %10293 = shalt.err (!%p10290_p4)
}
  0x9e   : > { %9719 = dma.hbm_to_vmem [thread:$0]  (!%p10667_p5), %s10532_s12, 768, %s931_s23, [#allocation3], %s10442_s16, %s10442_s16, %s10443_s22  }
  0x9f   : > { %s10444_s18 = smov [#allocation6]   ;;  %s10445_s26 = smov [#allocation9]  }
  0xa0   : > { %s962_s7 = sshll.u32 %s10444_s18, 4  ;;  %s1000_s11 = sshll.u32 %s10445_s26, 4  ;;  %s963_s7 = int_to_ptr.vmem [resolvable:$true] %s962_s7  ;;  %s1001_s11 = int_to_ptr.vmem [resolvable:$true] %s1000_s11 }
  0xa1   : > { %s10294_s10 = scalar_lea.hbm %s10552_s24, 256 }
  0xa2   : > { %p10295_p6 = scmp.ne.s32.totalorder %s10552_s24, %s10294_s10  ;;  %p10301_p3 = scmp.lt.u32.totalorder %s10294_s10, %s10552_s24 }
  0xa4   : > { %p10297_p8 = pnand %p10295_p6, %p10679_p7 }
  0xa6   : > { %p10298_p2 = pneg %p10297_p8 }
  0xa8   : > { %p10303_p9 = pnand %p10301_p3, %p10298_p2 }
  0xaa   : > { %10306 = shalt.err (!%p10303_p9)
}
  0xab   : > { %s10307_s3 = scalar_lea.vmem %s963_s7, 256  ;;  %p10315_p13 = scmp.lt.s32.totalorder %s963_s7, %s963_s7 }
  0xac   : > { %p10308_p10 = scmp.ne.s32.totalorder %s963_s7, %s10307_s3  ;;  %p10316_p0 = scmp.lt.s32.totalorder %s10307_s3, %s10307_s3 }
  0xae   : > { %p10310_p11 = pnand %p10308_p10, %p10679_p7  ;;  %p10317_p1 = por %p10316_p0, %p10315_p13 }
  0xb0   : > { %p10311_p12 = pneg %p10310_p11 }
  0xb2   : > { %p10318_p4 = pnand %p10317_p1, %p10311_p12 }
  0xb4   : > { %10321 = shalt.err (!%p10318_p4)
}
  0xb5   : > { %9725 = dma.hbm_to_vmem [thread:$0]  (!%p10667_p5), %s10552_s24, 256, %s963_s7, [#allocation5], %s10442_s16, %s10442_s16, %s10443_s22  }
  0xb6   : > { %s10322_s23 = scalar_lea.hbm %s10582_s19, 512 }
  0xb7   : > { %p10323_p6 = scmp.ne.s32.totalorder %s10582_s19, %s10322_s23  ;;  %p10329_p3 = scmp.lt.u32.totalorder %s10322_s23, %s10582_s19 }
  0xb9   : > { %p10325_p8 = pnand %p10323_p6, %p10679_p7 }
  0xbb   : > { %p10326_p2 = pneg %p10325_p8 }
  0xbd   : > { %p10331_p9 = pnand %p10329_p3, %p10326_p2 }
  0xbf   : > { %10334 = shalt.err (!%p10331_p9)
}
  0xc0   : > { %s10335_s3 = scalar_lea.vmem %s1001_s11, 512  ;;  %p10343_p13 = scmp.lt.s32.totalorder %s1001_s11, %s1001_s11 }
  0xc1   : > { %p10336_p10 = scmp.ne.s32.totalorder %s1001_s11, %s10335_s3  ;;  %p10344_p0 = scmp.lt.s32.totalorder %s10335_s3, %s10335_s3 }
  0xc3   : > { %p10338_p11 = pnand %p10336_p10, %p10679_p7  ;;  %p10345_p1 = por %p10344_p0, %p10343_p13 }
  0xc5   : > { %p10339_p12 = pneg %p10338_p11 }
  0xc7   : > { %p10346_p4 = pnand %p10345_p1, %p10339_p12 }
  0xc9   : > { %10349 = shalt.err (!%p10346_p4)
}
  0xca   : > { %9731 = dma.hbm_to_vmem [thread:$0]  (!%p10667_p5), %s10582_s19, 512, %s1001_s11, [#allocation8], %s10442_s16, %s10442_s16, %s10443_s22  }
  0xcb   : > { %s10446_s18 = smov [#allocation12]   ;;  %s10350_s26 = scalar_lea.hbm %s10612_s21, 2048 }
  0xcc   : > { %s1038_s7 = sshll.u32 %s10446_s18, 4  ;;  %p10351_p6 = scmp.ne.s32.totalorder %s10612_s21, %s10350_s26  ;;  %s1039_s7 = int_to_ptr.vmem [resolvable:$true] %s1038_s7 }
  0xcd   : > { %p10357_p3 = scmp.lt.u32.totalorder %s10350_s26, %s10612_s21 }
  0xce   : > { %p10353_p8 = pnand %p10351_p6, %p10679_p7 }
  0xd0   : > { %p10354_p2 = pneg %p10353_p8 }
  0xd2   : > { %p10359_p9 = pnand %p10357_p3, %p10354_p2 }
  0xd4   : > { %10362 = shalt.err (!%p10359_p9)
}
  0xd5   : > { %s10363_s10 = scalar_lea.vmem %s1039_s7, 2048  ;;  %p10371_p13 = scmp.lt.s32.totalorder %s1039_s7, %s1039_s7 }
  0xd6   : > { %p10364_p10 = scmp.ne.s32.totalorder %s1039_s7, %s10363_s10  ;;  %p10372_p0 = scmp.lt.s32.totalorder %s10363_s10, %s10363_s10 }
  0xd8   : > { %p10366_p11 = pnand %p10364_p10, %p10679_p7  ;;  %p10373_p1 = por %p10372_p0, %p10371_p13 }
  0xda   : > { %p10367_p12 = pneg %p10366_p11 }
  0xdc   : > { %p10374_p4 = pnand %p10373_p1, %p10367_p12 }
  0xde   : > { %10377 = shalt.err (!%p10374_p4)
}
  0xdf   : > { %s10447_s16 = smov 128   ;;  %s10448_s22 = smov 8  }
  0xe0   : > { %9737 = dma.hbm_to_vmem [thread:$0]  (!%p10667_p5), %s10612_s21, 2048, %s1039_s7, [#allocation11], %s10447_s16, %s10447_s16, %s10448_s22  }
  0xe1   : > { %p11683_p6 = scmp.ne.s32.totalorder %s11680_s0, 0 }
  0xe2   : > { %p11684_p8 = scmp.eq.s32.totalorder (!%p11683_p6), %s10650_s1, 0 }
  0xe3   : > { %1077 = sbr.rel (%p11683_p6) target bundleno = 6617 (0x19d9), region = 164 }
  0xea   : > { %10383 = dma.done.wait (%p11684_p8), [#allocation3], 768   ;;  %p11685_p7 = pmov %p11684_p8 }
  0xec   : > { %10385 = vsyncadd (%p11685_p7), [#allocation3], 4294966528  ;;  %p11686_p2 = pmov %p11685_p7 }
  0xee   : > { %10387 = dma.done.wait (%p11686_p2), [#allocation5], 1024   ;;  %p11687_p3 = pmov %p11686_p2 }
  0xef   : > { %p11688_p9 = pmov %p11686_p2 }
  0xf0   : > { %10389 = vsyncadd (%p11687_p3), [#allocation5], 4294966272 }
  0xf1   : > { %10391 = dma.done.wait (%p11688_p9), [#allocation8], 1280   ;;  %p11689_p5 = pmov %p11686_p2 }
  0xf2   : > { %p11690_p10 = pmov %p11686_p2 }
  0xf3   : > { %10393 = vsyncadd (%p11689_p5), [#allocation8], 4294966016 }
  0xf4   : > { %10395 = dma.done.wait (%p11690_p10), [#allocation11], 3584   ;;  %p11691_p11 = pmov %p11686_p2 }
  0xf5   : > { %p1190_p12 = scmp.lt.s32.totalorder %s10650_s1, 1  ;;  %vm1226_vm0 = vcmask 523264   ;;  %v9812_v8 = vld [vmem:[%s10467_s9 + $0x10] sm:$0xff]   ;;  %v9814_v11 = vld [vmem:[%s10467_s9] sm:$0xff]   ;;  %v9813_v14 = vld [vmem:[%s10467_s9 + $0x18] sm:$0x3f]  }
  0xf6   : > { %10397 = vsyncadd (%p11691_p11), [#allocation11], 4294963712  ;;  %8913 = vmatprep.mubr.msk.bf16.mxu1 %vm1226_vm0, %v9812_v8  ;;  %8901 = vmatprep.mubr.msk.bf16.mxu0 %vm1226_vm0, %v9814_v11  ;;  %v9815_v15 = vld [vmem:[%s10467_s9 + $0x8] sm:$0x3f]   ;;  %v9816_v16 = vld [vmem:[%s10467_s9 + $0x20] sm:$0xff]   ;;  %vm1373_vm1 = vcmask 1045504  }
  0xf7   : > { %s11712_s1 = smov (!%p1190_p12, %s10650_s1), 1  ;;  %v9817_v17 = vld [vmem:[%s10467_s9 + $0x28] sm:$0x3f]   ;;  %v9818_v18 = vld [vmem:[%s10467_s9 + $0x30] sm:$0xff]   ;;  %v9819_v19 = vld [vmem:[%s10467_s9 + $0x38] sm:$0x3f]  }
  0xf8   : > { %s8595_s0 = sshll.u32 %s11712_s1, 6  ;;  %v9820_v20 = vld [vmem:[%s10522_s30 + $0x8] sm:$0x3f]   ;;  %v9821_v22 = vld [vmem:[%s10522_s30] sm:$0x3f]   ;;  %v9826_v23 = vld [vmem:[%s10467_s9 + $0x50] sm:$0xff]  }
  0xf9   : > { %s1194_s15 = scalar_lea.vmem %s10462_s5, %s8595_s0  ;;  %v1375_v21 = vsel %vm1373_vm1, %v9820_v20, 0  ;;  %v9827_v24 = vld [vmem:[%s10467_s9 + $0x58] sm:$0x3f]   ;;  %v9828_v25 = vld [vmem:[%s10467_s9 + $0x60] sm:$0xff]   ;;  %v9829_v26 = vld [vmem:[%s10467_s9 + $0x68] sm:$0x3f]  }
  0xfa   : > { %v1200_v0 = vld [vmem:[%s1194_s15] sm:$0xff]  ;;  %v1201_v1 = vld [vmem:[%s1194_s15 + $0x8] sm:$0xff]  ;;  %v1202_v2 = vld [vmem:[%s1194_s15 + $0x10] sm:$0xff]  ;;  %vm1366_vm2 = vcmask 97280   ;;  %v1438_v41 = vsel %vm1373_vm1, %v9821_v22, 0  ;;  %vm3366_vm3 = vcmask 228352  }
  0xfb   : > { %v10809_v3 = vpack.c.bf16 %v1201_v1, %v1200_v0  ;;  %v1203_v4 = vld [vmem:[%s1194_s15 + $0x18] sm:$0xff]  ;;  %v1204_v6 = vld [vmem:[%s1194_s15 + $0x20] sm:$0xff]  ;;  %v1205_v7 = vld [vmem:[%s1194_s15 + $0x28] sm:$0xff]  ;;  %vm3520_vm4 = vcmask 261120   ;;  %vm10450_vm5 = vmmov 0   ;;  %s11692_s2 = sld [smem:[#allocation17_spill]] }
  0xfc   : > { %v10811_v5 = vpack.c.bf16 %v1203_v4, %v1202_v2  ;;  %v1206_v9 = vld [vmem:[%s1194_s15 + $0x30] sm:$0xff]  ;;  %v10819_v10 = vpack.c.bf16 %v1205_v7, %v1204_v6  ;;  %v1207_v12 = vld [vmem:[%s1194_s15 + $0x38] sm:$0xff]  ;;  %v9824_v58 = vld [vmem:[%s10467_s9 + $0x40] sm:$0xff]   ;;  %s11693_s11 = sld [smem:[#allocation18_spill]]  ;;  %s11694_s23 = sld [smem:[#allocation27_spill]]  ;;  %vm4691_vm6 = vcmask 1046528  }
  0xfd   : > { %8905 = vmatprep.subr.bf16.mxu1 %v10809_v3  ;;  %8893 = vmatprep.subr.bf16.mxu0 %v10809_v3  ;;  %v10828_v13 = vpack.c.bf16 %v1207_v12, %v1206_v9  ;;  %v9830_v27 = vld [vmem:[%s10467_s9 + $0x70] sm:$0xff]   ;;  %v9831_v28 = vld [vmem:[%s10467_s9 + $0x78] sm:$0x3f]   ;;  %v9825_v59 = vld [vmem:[%s10467_s9 + $0x48] sm:$0x3f]   ;;  %s11695_s3 = sld [smem:[#allocation19_spill]] }
  0xfe   : > { %8906 = vmatpush3.bf16.msra.mxu1 %v10809_v3  ;;  %8894 = vmatpush3.bf16.msra.mxu0 %v10809_v3  ;;  %v9822_v42 = vld [vmem:[%s10522_s30 + $0x10] sm:$0x3f]   ;;  %v9823_v46 = vld [vmem:[%s10522_s30 + $0x18] sm:$0x3f]   ;;  %v9832_v60 = vld [vmem:[%s10522_s30 + $0x20] sm:$0x3f]  }
  0xff   : > { %8907 = vmatprep.subr.bf16.mxu1 %v10811_v5  ;;  %8895 = vmatprep.subr.bf16.mxu0 %v10811_v5  ;;  %v1576_v45 = vsel %vm1373_vm1, %v9822_v42, 0  ;;  %v1718_v51 = vsel %vm1373_vm1, %v9823_v46, 0  ;;  %v1860_v63 = vsel %vm1373_vm1, %v9832_v60, 0  ;;  %v9833_v6 = vld [vmem:[%s10522_s30 + $0x28] sm:$0x3f]   ;;  %s11696_s18 = sld [smem:[#allocation28_spill]] }
 0x100   : > { %vm4687_vm7 = vcmask 113664   ;;  %s11697_s7 = sld [smem:[#allocation26_spill]]  ;;  %s11698_s26 = sld [smem:[#allocation29_spill]]  ;;  %vm5599_vm8 = vcmask 1042432   ;;  %vm5600_vm9 = vcmask 1043456   ;;  %vm5595_vm10 = vcmask 56320  }
 0x101   : > { %s11699_s10 = sld [smem:[#allocation20_spill]]  ;;  %s11700_s16 = sld [smem:[#allocation21_spill]]  ;;  %vm6837_vm11 = vcmask 1041408   ;;  %vm6833_vm12 = vcmask 31744  }
 0x102   : > { %8908 = vmatpush3.bf16.msra.mxu1 %v10811_v5  ;;  %8896 = vmatpush3.bf16.msra.mxu0 %v10811_v5  ;;  %s11701_s22 = sld [smem:[#allocation32_spill]]  ;;  %s11702_s0 = sld [smem:[#allocation22_spill]] }
 0x103   : > { %8909 = vmatprep.subr.bf16.mxu1 %v10819_v10  ;;  %8897 = vmatprep.subr.bf16.mxu0 %v10819_v10  ;;  %s11703_s15 = sld [smem:[#allocation33_spill]] }
 0x106   : > { %8910 = vmatpush3.bf16.msra.mxu1 %v10819_v10  ;;  %8898 = vmatpush3.bf16.msra.mxu0 %v10819_v10 }
 0x107   : > { %8911 = vmatprep.subr.bf16.mxu1 %v10828_v13  ;;  %8899 = vmatprep.subr.bf16.mxu0 %v10828_v13 }
 0x10a   : > { %8912 = vmatpush3.bf16.msra.mxu1 %v10828_v13  ;;  %8900 = vmatpush3.bf16.msra.mxu0 %v10828_v13 }
 0x10b   : > { %8929 = vmatprep.subr.bf16.mxu1 %v10809_v3  ;;  %9667 = vmatprep.subr.msk.bf16.mxu0 %vm1373_vm1, %v9820_v20 }
 0x10d   : > { %8914 = vmatmul.mubr.msk.bf16.vlgmr.msra.gmra.mrb[0].mxu1 %vm1226_vm0, %v9813_v14  ;;  %8902 = vmatmul.mubr.msk.bf16.vlgmr.msra.gmra.mrb[0].mxu0 %vm1226_vm0, %v9815_v15 }
 0x10e   : > { %8930 = vmatpush3.bf16.msra.mxu1 %v10809_v3  ;;  %8937 = vmatprep.mubr.msk.bf16.mxu1 %vm1226_vm0, %v9816_v16 }
 0x10f   : > { %8931 = vmatprep.subr.bf16.mxu1 %v10811_v5  ;;  %8918 = vmatpush3.bf16.msra.mxu0 %v1375_v21  ;;  %v9838_v21 = vld [vmem:[%s10467_s9 + $0x90] sm:$0xff]  }
 0x110   : > { %9668 = vmatprep.subr.msk.bf16.mxu0 %vm1373_vm1, %v9821_v22  ;;  %v9839_v22 = vld [vmem:[%s10467_s9 + $0x98] sm:$0x3f]  }
 0x112   : > { %8932 = vmatpush3.bf16.msra.mxu1 %v10811_v5 }
 0x113   : > { %8933 = vmatprep.subr.bf16.mxu1 %v10819_v10 }
 0x116   : > { %8934 = vmatpush3.bf16.msra.mxu1 %v10819_v10 }
 0x117   : > { %8935 = vmatprep.subr.bf16.mxu1 %v10828_v13 }
 0x11a   : > { %8936 = vmatpush3.bf16.msra.mxu1 %v10828_v13 }
 0x11b   : > { %8947 = vmatprep.subr.bf16.mxu1 %v10809_v3 }
 0x11d   : > { %8938 = vmatmul.mubr.msk.bf16.vlgmr.msra.gmra.mrb[4].mxu1 %vm1226_vm0, %v9817_v17 }
 0x11e   : > { %8948 = vmatpush3.bf16.msra.mxu1 %v10809_v3  ;;  %8955 = vmatprep.mubr.msk.bf16.mxu1 %vm1226_vm0, %v9818_v18 }
 0x11f   : > { %8949 = vmatprep.subr.bf16.mxu1 %v10811_v5 }
 0x122   : > { %8950 = vmatpush3.bf16.msra.mxu1 %v10811_v5 }
 0x123   : > { %8951 = vmatprep.subr.bf16.mxu1 %v10819_v10 }
 0x126   : > { %8952 = vmatpush3.bf16.msra.mxu1 %v10819_v10 }
 0x127   : > { %8953 = vmatprep.subr.bf16.mxu1 %v10828_v13 }
 0x12a   : > { %8954 = vmatpush3.bf16.msra.mxu1 %v10828_v13 }
 0x12b   : > { %8983 = vmatprep.subr.bf16.mxu1 %v10809_v3 }
 0x12d   : > { %8956 = vmatmul.mubr.msk.bf16.vlgmr.msra.gmra.mrb[8].mxu1 %vm1226_vm0, %v9819_v19 }
 0x12e   : > { %8984 = vmatpush3.bf16.msra.mxu1 %v10809_v3  ;;  %8991 = vmatprep.mubr.msk.bf16.mxu1 %vm1226_vm0, %v9826_v23  ;;  %v9840_v23 = vld [vmem:[%s10467_s9 + $0xa0] sm:$0xff]  }
 0x12f   : > { %8985 = vmatprep.subr.bf16.mxu1 %v10811_v5 }
 0x132   : > { %8986 = vmatpush3.bf16.msra.mxu1 %v10811_v5 }
 0x133   : > { %8987 = vmatprep.subr.bf16.mxu1 %v10819_v10 }
 0x136   : > { %8988 = vmatpush3.bf16.msra.mxu1 %v10819_v10 }
 0x137   : > { %8989 = vmatprep.subr.bf16.mxu1 %v10828_v13 }
 0x13a   : > { %8990 = vmatpush3.bf16.msra.mxu1 %v10828_v13 }
 0x13b   : > { %9001 = vmatprep.subr.bf16.mxu1 %v10809_v3 }
 0x13d   : > { %8992 = vmatmul.mubr.msk.bf16.vlgmr.msra.gmra.mrb[12].mxu1 %vm1226_vm0, %v9827_v24  ;;  %v9841_v24 = vld [vmem:[%s10467_s9 + $0xa8] sm:$0x3f]  }
 0x13e   : > { %9002 = vmatpush3.bf16.msra.mxu1 %v10809_v3  ;;  %9009 = vmatprep.mubr.msk.bf16.mxu1 %vm1226_vm0, %v9828_v25  ;;  %v9842_v25 = vld [vmem:[%s10467_s9 + $0xb0] sm:$0xff]  }
 0x13f   : > { %9003 = vmatprep.subr.bf16.mxu1 %v10811_v5 }
 0x142   : > { %9004 = vmatpush3.bf16.msra.mxu1 %v10811_v5 }
 0x143   : > { %9005 = vmatprep.subr.bf16.mxu1 %v10819_v10 }
 0x146   : > { %9006 = vmatpush3.bf16.msra.mxu1 %v10819_v10 }
 0x147   : > { %9007 = vmatprep.subr.bf16.mxu1 %v10828_v13 }
 0x14a   : > { %9008 = vmatpush3.bf16.msra.mxu1 %v10828_v13 }
 0x14b   : > { %9019 = vmatprep.subr.bf16.mxu1 %v10809_v3 }
 0x14d   : > { %9010 = vmatmul.mubr.msk.bf16.vlgmr.msra.gmra.mrb[16].mxu1 %vm1226_vm0, %v9829_v26  ;;  %v9843_v26 = vld [vmem:[%s10467_s9 + $0xb8] sm:$0x3f]  }
 0x14e   : > { %9020 = vmatpush3.bf16.msra.mxu1 %v10809_v3  ;;  %9027 = vmatprep.mubr.msk.bf16.mxu1 %vm1226_vm0, %v9830_v27 }
 0x14f   : > { %9021 = vmatprep.subr.bf16.mxu1 %v10811_v5 }
 0x152   : > { %9022 = vmatpush3.bf16.msra.mxu1 %v10811_v5 }
 0x153   : > { %9023 = vmatprep.subr.bf16.mxu1 %v10819_v10 }
 0x156   : > { %9024 = vmatpush3.bf16.msra.mxu1 %v10819_v10 }
 0x157   : > { %9025 = vmatprep.subr.bf16.mxu1 %v10828_v13 }
 0x15a   : > { %9026 = vmatpush3.bf16.msra.mxu1 %v10828_v13 }
 0x15b   : > { %9055 = vmatprep.subr.bf16.mxu1 %v10809_v3 }
 0x15d   : > { %9028 = vmatmul.mubr.msk.bf16.vlgmr.msra.gmra.mrb[20].mxu1 %vm1226_vm0, %v9831_v28 }
 0x15e   : > { %9056 = vmatpush3.bf16.msra.mxu1 %v10809_v3  ;;  %9063 = vmatprep.mubr.msk.bf16.mxu1 %vm1226_vm0, %v9838_v21 }
 0x15f   : > { %9057 = vmatprep.subr.bf16.mxu1 %v10811_v5 }
 0x162   : > { %9058 = vmatpush3.bf16.msra.mxu1 %v10811_v5 }
 0x163   : > { %9059 = vmatprep.subr.bf16.mxu1 %v10819_v10 }
 0x166   : > { %9060 = vmatpush3.bf16.msra.mxu1 %v10819_v10 }
 0x167   : > { %9061 = vmatprep.subr.bf16.mxu1 %v10828_v13 }
 0x16a   : > { %9062 = vmatpush3.bf16.msra.mxu1 %v10828_v13 }
 0x16b   : > { %9073 = vmatprep.subr.bf16.mxu1 %v10809_v3 }
 0x16d   : > { %9064 = vmatmul.mubr.msk.bf16.vlgmr.msra.gmra.mrb[24].mxu1 %vm1226_vm0, %v9839_v22 }
 0x16e   : > { %9074 = vmatpush3.bf16.msra.mxu1 %v10809_v3  ;;  %9081 = vmatprep.mubr.msk.bf16.mxu1 %vm1226_vm0, %v9840_v23 }
 0x16f   : > { %9075 = vmatprep.subr.bf16.mxu1 %v10811_v5 }
 0x172   : > { %9076 = vmatpush3.bf16.msra.mxu1 %v10811_v5 }
 0x173   : > { %9077 = vmatprep.subr.bf16.mxu1 %v10819_v10 }
 0x176   : > { %9078 = vmatpush3.bf16.msra.mxu1 %v10819_v10 }
 0x177   : > { %9079 = vmatprep.subr.bf16.mxu1 %v10828_v13 }
 0x17a   : > { %9080 = vmatpush3.bf16.msra.mxu1 %v10828_v13 }
 0x17b   : > { %9091 = vmatprep.subr.bf16.mxu1 %v10809_v3 }
 0x17d   : > { %9082 = vmatmul.mubr.msk.bf16.vlgmr.msra.gmra.mrb[28].mxu1 %vm1226_vm0, %v9841_v24 }
 0x17e   : > { %9092 = vmatpush3.bf16.msra.mxu1 %v10809_v3  ;;  %9099 = vmatprep.mubr.msk.bf16.mxu1 %vm1226_vm0, %v9842_v25 }
 0x17f   : > { %9093 = vmatprep.subr.bf16.mxu1 %v10811_v5 }
 0x182   : > { %9094 = vmatpush3.bf16.msra.mxu1 %v10811_v5 }
 0x183   : > { %9095 = vmatprep.subr.bf16.mxu1 %v10819_v10 }
 0x186   : > { %9096 = vmatpush3.bf16.msra.mxu1 %v10819_v10 }
 0x187   : > { %9097 = vmatprep.subr.bf16.mxu1 %v10828_v13 }
 0x18a   : > { %9098 = vmatpush3.bf16.msra.mxu1 %v10828_v13 }
 0x18b   : > { %9127 = vmatprep.subr.bf16.mxu1 %v10809_v3 }
 0x18d   : > { %9100 = vmatmul.mubr.msk.bf16.vlgmr.msra.gmra.mrb[32].mxu1 %vm1226_vm0, %v9843_v26 }
 0x18e   : > { %9128 = vmatpush3.bf16.msra.mxu1 %v10809_v3 }
 0x18f   : > { %9129 = vmatprep.subr.bf16.mxu1 %v10811_v5 }
 0x192   : > { %9130 = vmatpush3.bf16.msra.mxu1 %v10811_v5 }
 0x193   : > { %9131 = vmatprep.subr.bf16.mxu1 %v10819_v10 }
 0x196   : > { %9132 = vmatpush3.bf16.msra.mxu1 %v10819_v10 }
 0x197   : > { %9133 = vmatprep.subr.bf16.mxu1 %v10828_v13 }
 0x19a   : > { %9134 = vmatpush3.bf16.msra.mxu1 %v10828_v13 }
 0x19b   : > { %9145 = vmatprep.subr.bf16.mxu1 %v10809_v3 }
 0x1e0   : > { %v8915_v29 = vpop.f32.mrb[0].mxu1  ;;  %v8903_v30 = vpop.f32.mrb[0].mxu0 }
 0x1e1   : > { %v1341_v31 = vpop.f32.mrb[1].mxu1  ;;  %v1267_v32 = vpop.f32.mrb[1].mxu0 }
 0x1e2   : > { %v8916_v33 = vpop.f32.mrb[2].mxu1  ;;  %v8904_v34 = vpop.f32.mrb[2].mxu0 }
 0x1e3   : > { %v1357_v35 = vpack.c.bf16 %v8916_v33, %v8915_v29  ;;  %v1344_v36 = vpop.f32.mrb[3].mxu1  ;;  %v1283_v37 = vpack.c.bf16 %v8904_v34, %v8903_v30  ;;  %v1270_v38 = vpop.f32.mrb[3].mxu0  ;;  %v2002_v33 = vsel %vm1373_vm1, %v9833_v6, 0  ;;  %v9834_v34 = vld [vmem:[%s10522_s30 + $0x30] sm:$0x3f]  }
 0x1e4   : > { %v1356_v39 = vpack.c.bf16 %v1344_v36, %v1341_v31  ;;  %v1282_v40 = vpack.c.bf16 %v1270_v38, %v1267_v32  ;;  %v9835_v36 = vld [vmem:[%s10522_s30 + $0x38] sm:$0x3f]   ;;  %v9836_v38 = vld [vmem:[%s10467_s9 + $0x80] sm:$0xff]  }
 0x1e6   : > { %8919 = vmatprep.mubr.msk.bf16.mxu0 %vm1366_vm2, %v1356_v39  ;;  %v9837_v39 = vld [vmem:[%s10467_s9 + $0x88] sm:$0x3f]  }
 0x1e7   : > { %8920 = vmatmul.mubr.msk.bf16.vlgmr.msra.gmra.mrb[4].mxu0 %vm1366_vm2, %v1357_v35  ;;  %v2144_v35 = vsel %vm1373_vm1, %v9834_v34, 0 }
 0x1e8   : > { %8924 = vmatpush3.bf16.msra.mxu0 %v1438_v41  ;;  %8925 = vmatprep.mubr.msk.bf16.mxu0 %vm1366_vm2, %v1282_v40  ;;  %v9844_v40 = vld [vmem:[%s10522_s30 + $0x40] sm:$0x3f]  }
 0x1e9   : > { %9669 = vmatprep.subr.msk.bf16.mxu0 %vm1373_vm1, %v9822_v42 }
 0x1f0   : > { %v8939_v43 = vpop.f32.mrb[4].mxu1 }
 0x1f1   : > { %v1544_v44 = vpop.f32.mrb[5].mxu1 }
 0x1f2   : > { %v8940_v47 = vpop.f32.mrb[6].mxu1 }
 0x1f3   : > { %8926 = vmatmul.mubr.msk.bf16.vlgmr.msra.gmra.mrb[4].mxu0 %vm1366_vm2, %v1283_v37  ;;  %v1560_v48 = vpack.c.bf16 %v8940_v47, %v8939_v43  ;;  %v1547_v49 = vpop.f32.mrb[7].mxu1  ;;  %v2286_v37 = vsel %vm1373_vm1, %v9835_v36, 0  ;;  %v2428_v43 = vsel %vm1373_vm1, %v9844_v40, 0 }
 0x1f4   : > { %v1559_v50 = vpack.c.bf16 %v1547_v49, %v1544_v44  ;;  %8942 = vmatpush3.bf16.msra.mxu0 %v1576_v45 }
 0x1f5   : > { %9670 = vmatprep.subr.msk.bf16.mxu0 %vm1373_vm1, %v9823_v46 }
 0x1f6   : > { %8943 = vmatprep.mubr.msk.bf16.mxu0 %vm1366_vm2, %v1559_v50 }
 0x1ff   : > { %8944 = vmatmul.mubr.msk.bf16.vlgmr.msra.gmra.mrb[4].mxu0 %vm1366_vm2, %v1560_v48  ;;  %v9845_v48 = vld [vmem:[%s10522_s30 + $0x48] sm:$0x3f]  }
 0x200   : > { %v8957_v52 = vpop.f32.mrb[8].mxu1  ;;  %8960 = vmatpush3.bf16.msra.mxu0 %v1718_v51 }
 0x201   : > { %v1686_v53 = vpop.f32.mrb[9].mxu1  ;;  %8965 = vmatprep.subr.bf16.mxu0 %v10809_v3 }
 0x202   : > { %v8958_v54 = vpop.f32.mrb[10].mxu1 }
 0x203   : > { %v1702_v55 = vpack.c.bf16 %v8958_v54, %v8957_v52  ;;  %v1689_v56 = vpop.f32.mrb[11].mxu1 }
 0x204   : > { %v1701_v57 = vpack.c.bf16 %v1689_v56, %v1686_v53 }
 0x206   : > { %8961 = vmatprep.mubr.msk.bf16.mxu0 %vm1366_vm2, %v1701_v57 }
 0x20b   : > { %8962 = vmatmul.mubr.msk.bf16.vlgmr.msra.gmra.mrb[4].mxu0 %vm1366_vm2, %v1702_v55 }
 0x20c   : > { %8966 = vmatpush3.bf16.msra.mxu0 %v10809_v3  ;;  %8973 = vmatprep.mubr.msk.bf16.mxu0 %vm1226_vm0, %v9824_v58 }
 0x20d   : > { %8967 = vmatprep.subr.bf16.mxu0 %v10811_v5 }
 0x210   : > { %8968 = vmatpush3.bf16.msra.mxu0 %v10811_v5  ;;  %v10943_v61 = vpop.f32.mrb[12].mxu1 }
 0x211   : > { %8969 = vmatprep.subr.bf16.mxu0 %v10819_v10  ;;  %v10946_v62 = vpop.f32.mrb[13].mxu1 }
 0x212   : > { %v10949_v0 = vpop.f32.mrb[14].mxu1 }
 0x213   : > { %v1986_v1 = vpack.c.bf16 %v10949_v0, %v10943_v61  ;;  %v10953_v2 = vpop.f32.mrb[15].mxu1  ;;  %v9850_v61 = vld [vmem:[%s10467_s9 + $0xd0] sm:$0xff]   ;;  %v9853_v0 = vld [vmem:[%s10467_s9 + $0xe8] sm:$0x3f]  }
 0x214   : > { %8970 = vmatpush3.bf16.msra.mxu0 %v10819_v10  ;;  %v1985_v4 = vpack.c.bf16 %v10953_v2, %v10946_v62  ;;  %v9851_v62 = vld [vmem:[%s10467_s9 + $0xd8] sm:$0x3f]   ;;  %9135 = vmatprep.mubr.msk.bf16.mxu1 %vm1226_vm0, %v9850_v61 }
 0x215   : > { %8971 = vmatprep.subr.bf16.mxu0 %v10828_v13  ;;  %9136 = vmatmul.mubr.msk.bf16.vlgmr.msra.gmra.mrb[36].mxu1 %vm1226_vm0, %v9851_v62  ;;  %v9864_v61 = vld [vmem:[#allocation2 + $0x18] sm:$0xff]   ;;  %v9865_v62 = vld [vmem:[#allocation2] sm:$0xff]  }
 0x216   : > { %9146 = vmatpush3.bf16.msra.mxu1 %v10809_v3 }
 0x217   : > { %9147 = vmatprep.subr.bf16.mxu1 %v10811_v5 }
 0x218   : > { %8972 = vmatpush3.bf16.msra.mxu0 %v10828_v13 }
 0x219   : > { %9671 = vmatprep.subr.msk.bf16.mxu0 %vm1373_vm1, %v9832_v60 }
 0x21a   : > { %9148 = vmatpush3.bf16.msra.mxu1 %v10811_v5 }
 0x21b   : > { %8974 = vmatmul.mubr.msk.bf16.vlgmr.msra.gmra.mrb[8].mxu0 %vm1226_vm0, %v9825_v59  ;;  %9149 = vmatprep.subr.bf16.mxu1 %v10819_v10 }
 0x21c   : > { %8978 = vmatpush3.bf16.msra.mxu0 %v1860_v63  ;;  %v9852_v63 = vld [vmem:[%s10467_s9 + $0xe0] sm:$0xff]  }
 0x21d   : > { %9672 = vmatprep.subr.msk.bf16.mxu0 %vm1373_vm1, %v9833_v6  ;;  %9153 = vmatprep.mubr.msk.bf16.mxu1 %vm1226_vm0, %v9852_v63 }
 0x21e   : > { %9150 = vmatpush3.bf16.msra.mxu1 %v10819_v10 }
 0x21f   : > { %9151 = vmatprep.subr.bf16.mxu1 %v10828_v13 }
 0x220   : > { %v10959_v7 = vpop.f32.mrb[16].mxu1 }
 0x221   : > { %v10961_v8 = vpop.f32.mrb[17].mxu1 }
 0x222   : > { %v10963_v9 = vpop.f32.mrb[18].mxu1  ;;  %9152 = vmatpush3.bf16.msra.mxu1 %v10828_v13 }
 0x223   : > { %v2128_v11 = vpack.c.bf16 %v10963_v9, %v10959_v7  ;;  %v2115_v12 = vpop.f32.mrb[19].mxu1  ;;  %v2570_v9 = vsel %vm1373_vm1, %v9845_v48, 0 }
 0x224   : > { %v2127_v14 = vpack.c.bf16 %v2115_v12, %v10961_v8 }
 0x225   : > { %9154 = vmatmul.mubr.msk.bf16.vlgmr.msra.gmra.mrb[40].mxu1 %vm1226_vm0, %v9853_v0 }
 0x230   : > { %v10968_v15 = vpop.f32.mrb[20].mxu1 }
 0x231   : > { %v10970_v16 = vpop.f32.mrb[21].mxu1 }
 0x232   : > { %v10972_v17 = vpop.f32.mrb[22].mxu1 }
 0x233   : > { %v2270_v18 = vpack.c.bf16 %v10972_v17, %v10968_v15  ;;  %v2257_v19 = vpop.f32.mrb[23].mxu1  ;;  %v9849_v17 = vld [vmem:[%s10467_s9 + $0xc8] sm:$0x3f]  }
 0x234   : > { %v2269_v20 = vpack.c.bf16 %v2257_v19, %v10970_v16  ;;  %v9848_v16 = vld [vmem:[%s10467_s9 + $0xc0] sm:$0xff]  }
 0x240   : > { %v9065_v41 = vpop.f32.mrb[24].mxu1 }
 0x241   : > { %v2538_v42 = vpop.f32.mrb[25].mxu1 }
 0x242   : > { %v9066_v44 = vpop.f32.mrb[26].mxu1 }
 0x243   : > { %v2554_v45 = vpack.c.bf16 %v9066_v44, %v9065_v41  ;;  %v2541_v46 = vpop.f32.mrb[27].mxu1 }
 0x244   : > { %v2553_v47 = vpack.c.bf16 %v2541_v46, %v2538_v42 }
 0x250   : > { %v9083_v49 = vpop.f32.mrb[28].mxu1 }
 0x251   : > { %v2680_v50 = vpop.f32.mrb[29].mxu1 }
 0x252   : > { %v9084_v51 = vpop.f32.mrb[30].mxu1 }
 0x253   : > { %v2696_v52 = vpack.c.bf16 %v9084_v51, %v9083_v49  ;;  %v2683_v53 = vpop.f32.mrb[31].mxu1 }
 0x254   : > { %v2695_v54 = vpack.c.bf16 %v2683_v53, %v2680_v50 }
 0x260   : > { %v9101_v55 = vpop.f32.mrb[32].mxu1 }
 0x261   : > { %v2822_v56 = vpop.f32.mrb[33].mxu1 }
 0x262   : > { %v9102_v57 = vpop.f32.mrb[34].mxu1 }
 0x263   : > { %v2838_v58 = vpack.c.bf16 %v9102_v57, %v9101_v55  ;;  %v2825_v59 = vpop.f32.mrb[35].mxu1  ;;  %v9863_v55 = vld [vmem:[#allocation2 + $0x10] sm:$0xff]   ;;  %v11143_v57 = vld [vmem:[%s10472_s13 + $0x18] sm:$0x3f]  }
 0x264   : > { %v2837_v60 = vpack.c.bf16 %v2825_v59, %v2822_v56  ;;  %v11149_v59 = vld [vmem:[%s10472_s13 + $0x20] sm:$0xff]  }
 0x2e8   : > { %v9137_v19 = vpop.f32.mrb[36].mxu1 }
 0x2ee   : > { %v8975_v27 = vpop.f32.mrb[8].mxu0 }
 0x2ef   : > { %v1828_v28 = vpop.f32.mrb[9].mxu0 }
 0x2f0   : > { %v8976_v29 = vpop.f32.mrb[10].mxu0 }
 0x2f1   : > { %v1844_v30 = vpack.c.bf16 %v8976_v29, %v8975_v27  ;;  %v1831_v31 = vpop.f32.mrb[11].mxu0 }
 0x2f2   : > { %v1843_v32 = vpack.c.bf16 %v1831_v31, %v1828_v28 }
 0x2f4   : > { %8979 = vmatprep.mubr.msk.bf16.mxu0 %vm1366_vm2, %v1843_v32 }
 0x2f5   : > { %8980 = vmatmul.mubr.msk.bf16.vlgmr.msra.gmra.mrb[4].mxu0 %vm1366_vm2, %v1844_v30 }
 0x2f6   : > { %8997 = vmatprep.mubr.msk.bf16.mxu0 %vm1366_vm2, %v1985_v4  ;;  %8996 = vmatpush3.bf16.msra.mxu0 %v2002_v33 }
 0x2f7   : > { %9673 = vmatprep.subr.msk.bf16.mxu0 %vm1373_vm1, %v9834_v34 }
 0x301   : > { %8998 = vmatmul.mubr.msk.bf16.vlgmr.msra.gmra.mrb[4].mxu0 %vm1366_vm2, %v1986_v1 }
 0x302   : > { %9014 = vmatpush3.bf16.msra.mxu0 %v2144_v35  ;;  %9015 = vmatprep.mubr.msk.bf16.mxu0 %vm1366_vm2, %v2127_v14  ;;  %v9847_v14 = vld [vmem:[%s10522_s30 + $0x58] sm:$0x3f]  }
 0x303   : > { %9674 = vmatprep.subr.msk.bf16.mxu0 %vm1373_vm1, %v9835_v36  ;;  %v2854_v15 = vsel %vm1373_vm1, %v9847_v14, 0  ;;  %v9856_v36 = vld [vmem:[%s10522_s30 + $0x70] sm:$0x3f]  }
 0x30d   : > { %9016 = vmatmul.mubr.msk.bf16.vlgmr.msra.gmra.mrb[4].mxu0 %vm1366_vm2, %v2128_v11  ;;  %v9846_v11 = vld [vmem:[%s10522_s30 + $0x50] sm:$0x3f]  }
 0x30e   : > { %9032 = vmatpush3.bf16.msra.mxu0 %v2286_v37  ;;  %9033 = vmatprep.mubr.msk.bf16.mxu0 %vm1366_vm2, %v2269_v20  ;;  %v2712_v12 = vsel %vm1373_vm1, %v9846_v11, 0  ;;  %v3106_v20 = vpop.f32.mrb[37].mxu1  ;;  %v3280_v37 = vsel %vm1373_vm1, %v9856_v36, 0 }
 0x30f   : > { %9037 = vmatprep.subr.bf16.mxu0 %v10809_v3  ;;  %v9138_v21 = vpop.f32.mrb[38].mxu1 }
 0x310   : > { %v3122_v22 = vpack.c.bf16 %v9138_v21, %v9137_v19  ;;  %v3109_v23 = vpop.f32.mrb[39].mxu1  ;;  %v9868_v21 = vld [vmem:[#allocation2 + $0x28] sm:$0xff]  }
 0x311   : > { %v9155_v24 = vpop.f32.mrb[40].mxu1 }
 0x319   : > { %9034 = vmatmul.mubr.msk.bf16.vlgmr.msra.gmra.mrb[4].mxu0 %vm1366_vm2, %v2270_v18  ;;  %v9854_v18 = vld [vmem:[%s10522_s30 + $0x60] sm:$0x3f]  }
 0x31a   : > { %9038 = vmatpush3.bf16.msra.mxu0 %v10809_v3  ;;  %9045 = vmatprep.mubr.msk.bf16.mxu0 %vm1226_vm0, %v9836_v38  ;;  %v11112_v38 = vld [vmem:[%s10472_s13 + $0x10] sm:$0xff]  }
 0x31b   : > { %9039 = vmatprep.subr.bf16.mxu0 %v10811_v5 }
 0x31e   : > { %9040 = vmatpush3.bf16.msra.mxu0 %v10811_v5 }
 0x31f   : > { %9041 = vmatprep.subr.bf16.mxu0 %v10819_v10 }
 0x322   : > { %9042 = vmatpush3.bf16.msra.mxu0 %v10819_v10 }
 0x323   : > { %9043 = vmatprep.subr.bf16.mxu0 %v10828_v13 }
 0x326   : > { %9044 = vmatpush3.bf16.msra.mxu0 %v10828_v13 }
 0x327   : > { %9675 = vmatprep.subr.msk.bf16.mxu0 %vm1373_vm1, %v9844_v40  ;;  %v8112_v40 = vld [vmem:[%s10527_s6] ss:$0 sm:$0xff] }
 0x329   : > { %9046 = vmatmul.mubr.msk.bf16.vlgmr.msra.gmra.mrb[12].mxu0 %vm1226_vm0, %v9837_v39  ;;  %v9859_v39 = vld [vmem:[%s10472_s13] sm:$0xff]  }
 0x32a   : > { %9050 = vmatpush3.bf16.msra.mxu0 %v2428_v43  ;;  %9167 = vmatprep.mubr.msk.bf16.mxu1 %vm3366_vm3, %v9859_v39 }
 0x32b   : > { %9676 = vmatprep.subr.msk.bf16.mxu0 %vm1373_vm1, %v9845_v48 }
 0x3fc   : > { %v9047_v1 = vpop.f32.mrb[12].mxu0 }
 0x3fd   : > { %v2396_v2 = vpop.f32.mrb[13].mxu0 }
 0x3fe   : > { %v9048_v4 = vpop.f32.mrb[14].mxu0 }
 0x3ff   : > { %v2412_v6 = vpack.c.bf16 %v9048_v4, %v9047_v1  ;;  %v2399_v7 = vpop.f32.mrb[15].mxu0 }
 0x400   : > { %v2411_v8 = vpack.c.bf16 %v2399_v7, %v2396_v2 }
 0x402   : > { %9051 = vmatprep.mubr.msk.bf16.mxu0 %vm1366_vm2, %v2411_v8 }
 0x403   : > { %9052 = vmatmul.mubr.msk.bf16.vlgmr.msra.gmra.mrb[4].mxu0 %vm1366_vm2, %v2412_v6 }
 0x404   : > { %9069 = vmatprep.mubr.msk.bf16.mxu0 %vm1366_vm2, %v2553_v47  ;;  %9068 = vmatpush3.bf16.msra.mxu0 %v2570_v9 }
 0x405   : > { %9677 = vmatprep.subr.msk.bf16.mxu0 %vm1373_vm1, %v9846_v11 }
 0x40f   : > { %9070 = vmatmul.mubr.msk.bf16.vlgmr.msra.gmra.mrb[4].mxu0 %vm1366_vm2, %v2554_v45 }
 0x410   : > { %9086 = vmatpush3.bf16.msra.mxu0 %v2712_v12  ;;  %9087 = vmatprep.mubr.msk.bf16.mxu0 %vm1366_vm2, %v2695_v54 }
 0x411   : > { %9678 = vmatprep.subr.msk.bf16.mxu0 %vm1373_vm1, %v9847_v14 }
 0x41b   : > { %9088 = vmatmul.mubr.msk.bf16.vlgmr.msra.gmra.mrb[4].mxu0 %vm1366_vm2, %v2696_v52 }
 0x41c   : > { %9104 = vmatpush3.bf16.msra.mxu0 %v2854_v15  ;;  %9105 = vmatprep.mubr.msk.bf16.mxu0 %vm1366_vm2, %v2837_v60  ;;  %v11159_v60 = vld [vmem:[%s10472_s13 + $0x28] sm:$0x3f]  }
 0x41d   : > { %9109 = vmatprep.subr.bf16.mxu0 %v10809_v3  ;;  %v9866_v15 = vld [vmem:[#allocation2 + $0x8] sm:$0xff]  }
 0x427   : > { %9106 = vmatmul.mubr.msk.bf16.vlgmr.msra.gmra.mrb[4].mxu0 %vm1366_vm2, %v2838_v58  ;;  %v11146_v58 = vld [vmem:[%s10472_s13 + $0x8] sm:$0x3f]  }
 0x428   : > { %9110 = vmatpush3.bf16.msra.mxu0 %v10809_v3  ;;  %9117 = vmatprep.mubr.msk.bf16.mxu0 %vm1226_vm0, %v9848_v16  ;;  %v2996_v3 = vsel %vm1373_vm1, %v9854_v18, 0 }
 0x429   : > { %9111 = vmatprep.subr.bf16.mxu0 %v10811_v5 }
 0x42c   : > { %9112 = vmatpush3.bf16.msra.mxu0 %v10811_v5  ;;  %v9855_v5 = vld [vmem:[%s10522_s30 + $0x68] sm:$0x3f]  }
 0x42d   : > { %9113 = vmatprep.subr.bf16.mxu0 %v10819_v10  ;;  %v3138_v35 = vsel %vm1373_vm1, %v9855_v5, 0 }
 0x430   : > { %9114 = vmatpush3.bf16.msra.mxu0 %v10819_v10  ;;  %v3121_v10 = vpack.c.bf16 %v3109_v23, %v3106_v20 }
 0x431   : > { %9115 = vmatprep.subr.bf16.mxu0 %v10828_v13 }
 0x434   : > { %9116 = vmatpush3.bf16.msra.mxu0 %v10828_v13  ;;  %v3248_v13 = vpop.f32.mrb[41].mxu1 }
 0x435   : > { %9679 = vmatprep.subr.msk.bf16.mxu0 %vm1373_vm1, %v9854_v18  ;;  %v9156_v25 = vpop.f32.mrb[42].mxu1  ;;  %v9867_v18 = vld [vmem:[#allocation2 + $0x20] sm:$0xff]  }
 0x436   : > { %v3264_v26 = vpack.c.bf16 %v9156_v25, %v9155_v24  ;;  %v3251_v27 = vpop.f32.mrb[43].mxu1 }
 0x437   : > { %9118 = vmatmul.mubr.msk.bf16.vlgmr.msra.gmra.mrb[16].mxu0 %vm1226_vm0, %v9849_v17  ;;  %v3263_v28 = vpack.c.bf16 %v3251_v27, %v3248_v13 }
 0x438   : > { %9122 = vmatpush3.bf16.msra.mxu0 %v2996_v3 }
 0x439   : > { %9680 = vmatprep.subr.msk.bf16.mxu0 %vm1373_vm1, %v9855_v5 }
 0x50a   : > { %v9119_v29 = vpop.f32.mrb[16].mxu0 }
 0x50b   : > { %v2964_v30 = vpop.f32.mrb[17].mxu0 }
 0x50c   : > { %v9120_v31 = vpop.f32.mrb[18].mxu0 }
 0x50d   : > { %v2980_v32 = vpack.c.bf16 %v9120_v31, %v9119_v29  ;;  %v2967_v33 = vpop.f32.mrb[19].mxu0 }
 0x50e   : > { %v2979_v34 = vpack.c.bf16 %v2967_v33, %v2964_v30 }
 0x510   : > { %9123 = vmatprep.mubr.msk.bf16.mxu0 %vm1366_vm2, %v2979_v34 }
 0x511   : > { %9124 = vmatmul.mubr.msk.bf16.vlgmr.msra.gmra.mrb[4].mxu0 %vm1366_vm2, %v2980_v32 }
 0x512   : > { %9140 = vmatpush3.bf16.msra.mxu0 %v3138_v35  ;;  %9141 = vmatprep.mubr.msk.bf16.mxu0 %vm1366_vm2, %v3121_v10 }
 0x513   : > { %9681 = vmatprep.subr.msk.bf16.mxu0 %vm1373_vm1, %v9856_v36  ;;  %v9869_v36 = vld [vmem:[#allocation4 + $0x10] sm:$0xff]  }
 0x51d   : > { %9142 = vmatmul.mubr.msk.bf16.vlgmr.msra.gmra.mrb[4].mxu0 %vm1366_vm2, %v3122_v22  ;;  %v8145_v22 = vld [vmem:[%s10537_s20] ss:$0 sm:$0xff] }
 0x51e   : > { %9158 = vmatpush3.bf16.msra.mxu0 %v3280_v37  ;;  %9159 = vmatprep.mubr.msk.bf16.mxu0 %vm1366_vm2, %v3263_v28  ;;  %v9870_v37 = vld [vmem:[#allocation4 + $0x18] sm:$0xff]  }
 0x529   : > { %9160 = vmatmul.mubr.msk.bf16.vlgmr.msra.gmra.mrb[4].mxu0 %vm1366_vm2, %v3264_v26 }
 0x52a   : > { %9175 = vmatprep.mubr.msk.bf16.mxu0 %vm3366_vm3, %v11112_v38 }
 0x5fc   : > { %v9161_v41 = vpop.f32.mrb[4].mxu0 }
 0x5fd   : > { %v3316_v42 = vpop.f32.mrb[5].mxu0  ;;  %v11123_v47 = vadd.f32 %v9161_v41, %v8112_v40 }
 0x5fe   : > { %v11119_v43 = vadd.f32 %v8112_v40, %v3316_v42  ;;  %v9162_v44 = vpop.f32.mrb[6].mxu0 }
 0x5ff   : > { %v11121_v45 = vadd.f32 %v9162_v44, %v8112_v40  ;;  %v3319_v46 = vpop.f32.mrb[7].mxu0  ;;  %v3348_v52 = vmax.f32 %v11123_v47, 0.0 }
 0x600   : > { %v11125_v48 = vadd.f32 %v8112_v40, %v3319_v46  ;;  %v3346_v49 = vmax.f32 %v11119_v43, 0.0 }
 0x601   : > { %v3349_v50 = vmax.f32 %v11121_v45, 0.0  ;;  %v9875_v45 = vld [vmem:[%s11692_s2] sm:$0x7f]   ;;  %s11704_s2 = sld [smem:[#allocation30_spill]] }
 0x602   : > { %v3347_v51 = vmax.f32 %v11125_v48, 0.0  ;;  %v9876_v48 = vld [vmem:[#allocation6] sm:$0xff]  }
 0x603   : > { %v3351_v54 = vpack.c.bf16 %v3349_v50, %v3348_v52 }
 0x604   : > { %v3350_v53 = vpack.c.bf16 %v3347_v51, %v3346_v49 }
 0x605   : > { %v3374_v56 = vsel %vm1373_vm1, %v3351_v54, 0 }
 0x606   : > { %9163 = vmatprep.subr.bf16.mxu1 %v3350_v53  ;;  %9171 = vmatprep.subr.bf16.mxu0 %v3350_v53 }
 0x607   : > { %9164 = vmatpush3.bf16.msra.mxu1 %v3350_v53  ;;  %9172 = vmatpush3.bf16.msra.mxu0 %v3350_v53 }
 0x608   : > { %9682 = vmatprep.subr.msk.bf16.mxu1 %vm1373_vm1, %v3351_v54  ;;  %9683 = vmatprep.subr.msk.bf16.mxu0 %vm1373_vm1, %v3351_v54 }
 0x60b   : > { %9166 = vmatpush3.bf16.msra.mxu1 %v3374_v56  ;;  %9174 = vmatpush3.bf16.msra.mxu0 %v3374_v56 }
 0x60c   : > { %9195 = vmatprep.subr.bf16.mxu0 %v3350_v53  ;;  %9179 = vmatprep.subr.bf16.mxu1 %v9863_v55 }
 0x60e   : > { %9176 = vmatmul.mubr.msk.bf16.vlgmr.msra.gmra.mrb[20].mxu0 %vm3366_vm3, %v11143_v57  ;;  %9168 = vmatmul.mubr.msk.bf16.vlgmr.msra.gmra.mrb[44].mxu1 %vm3366_vm3, %v11146_v58 }
 0x60f   : > { %9196 = vmatpush3.bf16.msra.mxu0 %v3350_v53  ;;  %9199 = vmatprep.mubr.msk.bf16.mxu0 %vm3366_vm3, %v11149_v59 }
 0x610   : > { %9684 = vmatprep.subr.msk.bf16.mxu0 %vm1373_vm1, %v3351_v54  ;;  %9180 = vmatpush3.bf16.msra.mxu1 %v9863_v55 }
 0x611   : > { %9181 = vmatprep.subr.bf16.mxu1 %v9864_v61 }
 0x613   : > { %9198 = vmatpush3.bf16.msra.mxu0 %v3374_v56 }
 0x614   : > { %9182 = vmatpush3.bf16.msra.mxu1 %v9864_v61 }
 0x615   : > { %9187 = vmatprep.subr.bf16.mxu1 %v9865_v62 }
 0x616   : > { %9200 = vmatmul.mubr.msk.bf16.vlgmr.msra.gmra.mrb[24].mxu0 %vm3366_vm3, %v11159_v60 }
 0x617   : > { %9215 = vmatprep.mubr.msk.bf16.mxu0 %vm3366_vm3, %v9859_v39 }
 0x6e1   : > { %v9177_v63 = vpop.f32.mrb[20].mxu0  ;;  %v9169_v0 = vpop.f32.mrb[44].mxu1 }
 0x6e2   : > { %v3486_v1 = vpop.f32.mrb[21].mxu0  ;;  %v3410_v2 = vpop.f32.mrb[45].mxu1 }
 0x6e3   : > { %v9178_v4 = vpop.f32.mrb[22].mxu0  ;;  %v9170_v6 = vpop.f32.mrb[46].mxu1 }
 0x6e4   : > { %v3502_v7 = vpack.c.bf16 %v9178_v4, %v9177_v63  ;;  %v3489_v8 = vpop.f32.mrb[23].mxu0  ;;  %v3426_v9 = vpack.c.bf16 %v9170_v6, %v9169_v0  ;;  %v3413_v11 = vpop.f32.mrb[47].mxu1  ;;  %v9874_v4 = vld [vmem:[#allocation4 + $0x28] sm:$0xff]   ;;  %v10449_v6 = vmov 0.0  }
 0x6e5   : > { %v3501_v12 = vpack.c.bf16 %v3489_v8, %v3486_v1  ;;  %v3425_v14 = vpack.c.bf16 %v3413_v11, %v3410_v2 }
 0x6e7   : > { %9183 = vmatprep.mubr.msk.bf16.mxu1 %vm3520_vm4, %v3501_v12 }
 0x6e8   : > { %9184 = vmatmul.mubr.msk.bf16.vlgmr.msra.gmra.mrb[48].mxu1 %vm3520_vm4, %v3502_v7  ;;  %v8164_v7 = vld [vmem:[%s10547_s4] ss:$0 sm:$0xff] }
 0x6e9   : > { %9188 = vmatpush3.bf16.msra.mxu1 %v9865_v62  ;;  %9191 = vmatprep.mubr.msk.bf16.mxu1 %vm3520_vm4, %v3425_v14  ;;  %v9201_v16 = vpop.f32.mrb[24].mxu0  ;;  %v9873_v62 = vld [vmem:[#allocation4 + $0x20] sm:$0xff]  }
 0x6ea   : > { %9189 = vmatprep.subr.bf16.mxu1 %v9866_v15  ;;  %v3698_v17 = vpop.f32.mrb[25].mxu0 }
 0x6eb   : > { %v9202_v3 = vpop.f32.mrb[26].mxu0 }
 0x6ec   : > { %v3714_v19 = vpack.c.bf16 %v9202_v3, %v9201_v16  ;;  %v3701_v20 = vpop.f32.mrb[27].mxu0 }
 0x6ed   : > { %9190 = vmatpush3.bf16.msra.mxu1 %v9866_v15  ;;  %v3713_v5 = vpack.c.bf16 %v3701_v20, %v3698_v17 }
 0x6ee   : > { %9203 = vmatprep.subr.bf16.mxu1 %v9867_v18 }
 0x6f4   : > { %9192 = vmatmul.mubr.msk.bf16.vlgmr.msra.gmra.mrb[48].mxu1 %vm3520_vm4, %v3426_v9 }
 0x6f5   : > { %9204 = vmatpush3.bf16.msra.mxu1 %v9867_v18  ;;  %9207 = vmatprep.mubr.msk.bf16.mxu1 %vm3520_vm4, %v3713_v5 }
 0x6f6   : > { %9205 = vmatprep.subr.bf16.mxu1 %v9868_v21 }
 0x6f9   : > { %9206 = vmatpush3.bf16.msra.mxu1 %v9868_v21 }
 0x6fa   : > { %9227 = vmatprep.subr.bf16.mxu1 %v9869_v36 }
 0x700   : > { %9208 = vmatmul.mubr.msk.bf16.vlgmr.msra.gmra.mrb[48].mxu1 %vm3520_vm4, %v3714_v19 }
 0x701   : > { %9228 = vmatpush3.bf16.msra.mxu1 %v9869_v36 }
 0x702   : > { %9229 = vmatprep.subr.bf16.mxu1 %v9870_v37 }
 0x705   : > { %9230 = vmatpush3.bf16.msra.mxu1 %v9870_v37 }
 0x7d3   : > { %v9209_v23 = vpop.f32.mrb[48].mxu1 }
 0x7d4   : > { %v3800_v10 = vadd.f32 %v9209_v23, %v8145_v22  ;;  %v3772_v24 = vpop.f32.mrb[49].mxu1 }
 0x7d5   : > { %v3798_v13 = vadd.f32 %v8145_v22, %v3772_v24  ;;  %v9210_v25 = vpop.f32.mrb[50].mxu1 }
 0x7d6   : > { %v3801_v26 = vadd.f32 %v9210_v25, %v8145_v22  ;;  %v3775_v27 = vpop.f32.mrb[51].mxu1  ;;  %v3804_v29 = vmax.f32 %v3800_v10, 0.0 }
 0x7d7   : > { %v3799_v28 = vadd.f32 %v8145_v22, %v3775_v27  ;;  %v3802_v31 = vmax.f32 %v3798_v13, 0.0  ;;  %v9879_v27 = vld [vmem:[%s11693_s11 + $0x8] sm:$0x7f]  }
 0x7d8   : > { %v3805_v30 = vmax.f32 %v3801_v26, 0.0 }
 0x7d9   : > { %v3803_v32 = vmax.f32 %v3799_v28, 0.0  ;;  %v9881_v28 = vld [vmem:[#allocation7] sm:$0xff]  }
 0x7da   : > { %v3807_v33 = vpack.c.bf16 %v3805_v30, %v3804_v29 }
 0x7db   : > { %v3806_v34 = vpack.c.bf16 %v3803_v32, %v3802_v31  ;;  %v9882_v31 = vld [vmem:[#allocation7 + $0x18] sm:$0xff]  }
 0x7dc   : > { %v3809_v35 = vsel %vm1373_vm1, %v3807_v33, 0 }
 0x7dd   : > { %9211 = vmatprep.subr.bf16.mxu0 %v3806_v34 }
 0x7de   : > { %9212 = vmatpush3.bf16.msra.mxu0 %v3806_v34 }
 0x7df   : > { %9685 = vmatprep.subr.msk.bf16.mxu0 %vm1373_vm1, %v3807_v33 }
 0x7e2   : > { %9214 = vmatpush3.bf16.msra.mxu0 %v3809_v35 }
 0x7e3   : > { %9219 = vmatprep.subr.bf16.mxu0 %v3806_v34 }
 0x7e5   : > { %9216 = vmatmul.mubr.msk.bf16.vlgmr.msra.gmra.mrb[28].mxu0 %vm3366_vm3, %v11146_v58 }
 0x7e6   : > { %9220 = vmatpush3.bf16.msra.mxu0 %v3806_v34  ;;  %9223 = vmatprep.mubr.msk.bf16.mxu0 %vm3366_vm3, %v11112_v38  ;;  %v9871_v38 = vld [vmem:[#allocation4] sm:$0xff]  }
 0x7e7   : > { %9686 = vmatprep.subr.msk.bf16.mxu0 %vm1373_vm1, %v3807_v33  ;;  %9235 = vmatprep.subr.bf16.mxu1 %v9871_v38 }
 0x7ea   : > { %9222 = vmatpush3.bf16.msra.mxu0 %v3809_v35 }
 0x7eb   : > { %9243 = vmatprep.subr.bf16.mxu0 %v3806_v34 }
 0x7ed   : > { %9224 = vmatmul.mubr.msk.bf16.vlgmr.msra.gmra.mrb[32].mxu0 %vm3366_vm3, %v11143_v57 }
 0x7ee   : > { %9244 = vmatpush3.bf16.msra.mxu0 %v3806_v34  ;;  %9247 = vmatprep.mubr.msk.bf16.mxu0 %vm3366_vm3, %v11149_v59  ;;  %v9872_v59 = vld [vmem:[#allocation4 + $0x8] sm:$0xff]  }
 0x7ef   : > { %9687 = vmatprep.subr.msk.bf16.mxu0 %vm1373_vm1, %v3807_v33  ;;  %v9883_v33 = vld [vmem:[#allocation7 + $0x8] sm:$0xff]  }
 0x7f2   : > { %9246 = vmatpush3.bf16.msra.mxu0 %v3809_v35 }
 0x7f3   : > { %9259 = vmatprep.subr.bf16.mxu0 %v10449_v6 }
 0x7f5   : > { %9248 = vmatmul.mubr.msk.bf16.vlgmr.msra.gmra.mrb[36].mxu0 %vm3366_vm3, %v11159_v60 }
 0x7f6   : > { %9263 = vmatprep.mubr.msk.bf16.mxu0 %vm10450_vm5, %v10449_v6 }
 0x8b8   : > { %v9217_v39 = vpop.f32.mrb[28].mxu0 }
 0x8b9   : > { %v3845_v40 = vpop.f32.mrb[29].mxu0 }
 0x8ba   : > { %v9218_v41 = vpop.f32.mrb[30].mxu0 }
 0x8bb   : > { %v3861_v42 = vpack.c.bf16 %v9218_v41, %v9217_v39  ;;  %v3848_v44 = vpop.f32.mrb[31].mxu0  ;;  %v9884_v41 = vld [vmem:[%s11693_s11 + $0x10] sm:$0x7f]  }
 0x8bc   : > { %v3860_v46 = vpack.c.bf16 %v3848_v44, %v3845_v40 }
 0x8c0   : > { %v9225_v53 = vpop.f32.mrb[32].mxu0 }
 0x8c1   : > { %v3900_v54 = vpop.f32.mrb[33].mxu0 }
 0x8c2   : > { %v9226_v55 = vpop.f32.mrb[34].mxu0 }
 0x8c3   : > { %v3916_v56 = vpack.c.bf16 %v9226_v55, %v9225_v53  ;;  %v3903_v57 = vpop.f32.mrb[35].mxu0  ;;  %v9885_v53 = vld [vmem:[#allocation7 + $0x20] sm:$0xff]   ;;  %v9886_v55 = vld [vmem:[#allocation7 + $0x28] sm:$0xff]  }
 0x8c4   : > { %v3915_v58 = vpack.c.bf16 %v3903_v57, %v3900_v54 }
 0x8c6   : > { %9231 = vmatprep.mubr.msk.bf16.mxu1 %vm3520_vm4, %v3915_v58 }
 0x8c7   : > { %9232 = vmatmul.mubr.msk.bf16.vlgmr.msra.gmra.mrb[52].mxu1 %vm3520_vm4, %v3916_v56 }
 0x8c8   : > { %9239 = vmatprep.mubr.msk.bf16.mxu1 %vm3520_vm4, %v3860_v46  ;;  %9236 = vmatpush3.bf16.msra.mxu1 %v9871_v38  ;;  %v9249_v60 = vpop.f32.mrb[36].mxu0 }
 0x8c9   : > { %9237 = vmatprep.subr.bf16.mxu1 %v9872_v59  ;;  %v4090_v61 = vpop.f32.mrb[37].mxu0 }
 0x8ca   : > { %v9250_v63 = vpop.f32.mrb[38].mxu0 }
 0x8cb   : > { %v4106_v0 = vpack.c.bf16 %v9250_v63, %v9249_v60  ;;  %v4093_v1 = vpop.f32.mrb[39].mxu0 }
 0x8cc   : > { %9238 = vmatpush3.bf16.msra.mxu1 %v9872_v59  ;;  %v4105_v2 = vpack.c.bf16 %v4093_v1, %v4090_v61 }
 0x8cd   : > { %9251 = vmatprep.subr.bf16.mxu1 %v9873_v62 }
 0x8d3   : > { %9240 = vmatmul.mubr.msk.bf16.vlgmr.msra.gmra.mrb[52].mxu1 %vm3520_vm4, %v3861_v42 }
 0x8d4   : > { %9252 = vmatpush3.bf16.msra.mxu1 %v9873_v62  ;;  %9255 = vmatprep.mubr.msk.bf16.mxu1 %vm3520_vm4, %v4105_v2 }
 0x8d5   : > { %9253 = vmatprep.subr.bf16.mxu1 %v9874_v4 }
 0x8d8   : > { %9254 = vmatpush3.bf16.msra.mxu1 %v9874_v4 }
 0x8d9   : > { %9275 = vmatprep.subr.bf16.mxu1 %v10449_v6 }
 0x8df   : > { %9256 = vmatmul.mubr.msk.bf16.vlgmr.msra.gmra.mrb[52].mxu1 %vm3520_vm4, %v4106_v0 }
 0x8e0   : > { %9279 = vmatprep.mubr.msk.bf16.mxu1 %vm10450_vm5, %v10449_v6 }
 0x9b2   : > { %v9257_v8 = vpop.f32.mrb[52].mxu1 }
 0x9b3   : > { %v4192_v9 = vadd.f32 %v9257_v8, %v8164_v7  ;;  %v4164_v11 = vpop.f32.mrb[53].mxu1 }
 0x9b4   : > { %v4190_v12 = vadd.f32 %v8164_v7, %v4164_v11  ;;  %v9258_v14 = vpop.f32.mrb[54].mxu1 }
 0x9b5   : > { %v4196_v15 = vadd.f32 %v4192_v9, %v3348_v52  ;;  %v4193_v16 = vadd.f32 %v9258_v14, %v8164_v7  ;;  %v4167_v17 = vpop.f32.mrb[55].mxu1 }
 0x9b6   : > { %v4194_v18 = vadd.f32 %v4190_v12, %v3346_v49  ;;  %v4191_v3 = vadd.f32 %v8164_v7, %v4167_v17  ;;  %v9877_v49 = vld [vmem:[#allocation6 + $0x8] sm:$0xff]   ;;  %v8190_v7 = vld [vmem:[%s11694_s23] ss:$0 sm:$0xff]  ;;  %s11705_s23 = sld [smem:[#allocation34_spill]] }
 0x9b7   : > { %v4197_v19 = vadd.f32 %v4193_v16, %v3349_v50  ;;  %v4200_v5 = vmax.f32 %v4196_v15, 0.0  ;;  %v9878_v50 = vld [vmem:[%s11693_s11] sm:$0x7f]  }
 0x9b8   : > { %v4195_v20 = vadd.f32 %v4191_v3, %v3347_v51  ;;  %v4198_v22 = vmax.f32 %v4194_v18, 0.0  ;;  %v9880_v51 = vld [vmem:[#allocation7 + $0x10] sm:$0xff]  }
 0x9b9   : > { %v4201_v21 = vmax.f32 %v4197_v19, 0.0 }
 0x9ba   : > { %v4199_v23 = vmax.f32 %v4195_v20, 0.0  ;;  %v9887_v20 = vld [vmem:[%s11695_s3 + $0x8] sm:$0x7f]  }
 0x9bb   : > { %v4203_v10 = vpack.c.bf16 %v4201_v21, %v4200_v5  ;;  %v9888_v5 = vld [vmem:[%s11695_s3] sm:$0x7f]  }
 0x9bc   : > { %v4202_v47 = vpack.c.bf16 %v4199_v23, %v4198_v22  ;;  %v9890_v21 = vld [vmem:[%s11696_s18 + $0x20] sm:$0xff]   ;;  %v9891_v22 = vld [vmem:[%s11696_s18 + $0x28] sm:$0xff]   ;;  %v9889_v23 = vld [vmem:[%s11695_s3 + $0x10] sm:$0x7f]  }
 0x9bd   : > { %v4215_v43 = vsel %vm1373_vm1, %v4203_v10, 0  ;;  %v9892_v10 = vld [vmem:[%s11696_s18 + $0x30] sm:$0xff]  }
 0x9be   : > { %9260 = vmatpush3.bf16.msra.mxu0 %v4202_v47  ;;  %9276 = vmatpush3.bf16.msra.mxu1 %v4202_v47 }
 0x9bf   : > { %9261 = vmatprep.subr.bf16.mxu0 %v10449_v6  ;;  %9277 = vmatprep.subr.bf16.mxu1 %v10449_v6 }
 0x9c2   : > { %9262 = vmatpush3.bf16.msra.mxu0 %v4215_v43  ;;  %9278 = vmatpush3.bf16.msra.mxu1 %v4215_v43 }
 0x9c3   : > { %9267 = vmatprep.subr.bf16.mxu0 %v10449_v6  ;;  %9291 = vmatprep.subr.bf16.mxu1 %v10449_v6 }
 0x9c5   : > { %9264 = vmatmul.mubr.msk.bf16.vlgmr.msra.gmra.mrb[40].mxu0 %vm3366_vm3, %v9875_v45  ;;  %9280 = vmatmul.mubr.msk.bf16.vlgmr.msra.gmra.mrb[56].mxu1 %vm3366_vm3, %v9878_v50 }
 0x9c6   : > { %9268 = vmatpush3.bf16.msra.mxu0 %v9876_v48  ;;  %9271 = vmatprep.mubr.msk.bf16.mxu0 %vm10450_vm5, %v10449_v6 }
 0x9c7   : > { %9269 = vmatprep.subr.bf16.mxu0 %v10449_v6  ;;  %9295 = vmatprep.mubr.msk.bf16.mxu1 %vm10450_vm5, %v10449_v6 }
 0x9c8   : > { %9292 = vmatpush3.bf16.msra.mxu1 %v9880_v51  ;;  %v9894_v51 = vld [vmem:[%s11696_s18] sm:$0xff]  }
 0x9c9   : > { %9293 = vmatprep.subr.bf16.mxu1 %v10449_v6 }
 0x9ca   : > { %9270 = vmatpush3.bf16.msra.mxu0 %v9877_v49 }
 0x9cb   : > { %9283 = vmatprep.subr.bf16.mxu0 %v10449_v6 }
 0x9cc   : > { %9294 = vmatpush3.bf16.msra.mxu1 %v9882_v31 }
 0x9cd   : > { %9307 = vmatprep.subr.bf16.mxu1 %v10449_v6 }
 0xa98   : > { %v4251_v52 = vpop.f32.mrb[40].mxu0  ;;  %v4370_v29 = vpop.f32.mrb[56].mxu1 }
 0xa99   : > { %v9265_v24 = vpop.f32.mrb[41].mxu0  ;;  %v9281_v30 = vpop.f32.mrb[57].mxu1 }
 0xa9a   : > { %v4254_v13 = vpop.f32.mrb[42].mxu0  ;;  %v4373_v32 = vpop.f32.mrb[58].mxu1  ;;  %v9896_v30 = vld [vmem:[%s11696_s18 + $0x10] sm:$0xff]  }
 0xa9b   : > { %v4258_v25 = vpack.c.bf16 %v4254_v13, %v4251_v52  ;;  %v9266_v26 = vpop.f32.mrb[43].mxu0  ;;  %v4377_v34 = vpack.c.bf16 %v4373_v32, %v4370_v29  ;;  %v9282_v35 = vpop.f32.mrb[59].mxu1 }
 0xa9c   : > { %v9898_v35 = vld [vmem:[%s11696_s18 + $0x40] sm:$0xff]  }
 0xa9d   : > { %9272 = vmatmul.mubr.msk.bf16.vlgmr.msra.gmra.mrb[44].mxu0 %vm3520_vm4, %v4258_v25 }
 0xa9e   : > { %9284 = vmatpush3.bf16.msra.mxu0 %v4202_v47  ;;  %9287 = vmatprep.mubr.msk.bf16.mxu0 %vm10450_vm5, %v10449_v6 }
 0xa9f   : > { %9285 = vmatprep.subr.bf16.mxu0 %v10449_v6 }
 0xaa2   : > { %9286 = vmatpush3.bf16.msra.mxu0 %v4215_v43 }
 0xaa3   : > { %9299 = vmatprep.subr.bf16.mxu0 %v10449_v6 }
 0xaa5   : > { %9288 = vmatmul.mubr.msk.bf16.vlgmr.msra.gmra.mrb[48].mxu0 %vm3366_vm3, %v9879_v27  ;;  %v9895_v27 = vld [vmem:[%s11696_s18 + $0x8] sm:$0xff]  }
 0xaa6   : > { %9300 = vmatpush3.bf16.msra.mxu0 %v9881_v28  ;;  %9303 = vmatprep.mubr.msk.bf16.mxu0 %vm10450_vm5, %v10449_v6 }
 0xaa7   : > { %9301 = vmatprep.subr.bf16.mxu0 %v10449_v6 }
 0xaaa   : > { %9302 = vmatpush3.bf16.msra.mxu0 %v9883_v33 }
 0xaab   : > { %9315 = vmatprep.subr.bf16.mxu0 %v10449_v6 }
 0xaad   : > { %9304 = vmatmul.mubr.msk.bf16.vlgmr.msra.gmra.mrb[52].mxu0 %vm3520_vm4, %v4377_v34  ;;  %v9897_v34 = vld [vmem:[%s11696_s18 + $0x18] sm:$0xff]  }
 0xaae   : > { %9319 = vmatprep.mubr.msk.bf16.mxu0 %vm10450_vm5, %v10449_v6  ;;  %9316 = vmatpush3.bf16.msra.mxu0 %v9885_v53 }
 0xaaf   : > { %9317 = vmatprep.subr.bf16.mxu0 %v10449_v6 }
 0xab2   : > { %9318 = vmatpush3.bf16.msra.mxu0 %v9886_v55 }
 0xab3   : > { %9329 = vmatprep.subr.bf16.mxu0 %v10449_v6 }
 0xb78   : > { %v4427_v36 = vpop.f32.mrb[48].mxu0 }
 0xb79   : > { %v9289_v37 = vpop.f32.mrb[49].mxu0 }
 0xb7a   : > { %v4430_v38 = vpop.f32.mrb[50].mxu0  ;;  %v9900_v37 = vld [vmem:[%s11696_s18 + $0x50] sm:$0xff]  }
 0xb7b   : > { %v4434_v39 = vpack.c.bf16 %v4430_v38, %v4427_v36  ;;  %v9290_v40 = vpop.f32.mrb[51].mxu0  ;;  %v9899_v36 = vld [vmem:[%s11696_s18 + $0x48] sm:$0xff]   ;;  %v9901_v38 = vld [vmem:[%s11696_s18 + $0x58] sm:$0xff]  }
 0xb7d   : > { %9296 = vmatmul.mubr.msk.bf16.vlgmr.msra.gmra.mrb[60].mxu1 %vm3520_vm4, %v4434_v39  ;;  %v8167_v39 = vld [vmem:[%s11697_s7] ss:$0 sm:$0xff]  ;;  %s11706_s7 = sld [smem:[#allocation23_spill]] }
 0xb7e   : > { %9308 = vmatpush3.bf16.msra.mxu1 %v4202_v47  ;;  %9311 = vmatprep.mubr.msk.bf16.mxu1 %vm10450_vm5, %v10449_v6  ;;  %v9893_v47 = vld [vmem:[%s11696_s18 + $0x38] sm:$0xff]  }
 0xb7f   : > { %9309 = vmatprep.subr.bf16.mxu1 %v10449_v6 }
 0xb80   : > { %v4545_v42 = vpop.f32.mrb[52].mxu0 }
 0xb81   : > { %v9305_v44 = vpop.f32.mrb[53].mxu0 }
 0xb82   : > { %9310 = vmatpush3.bf16.msra.mxu1 %v4215_v43  ;;  %v4548_v46 = vpop.f32.mrb[54].mxu0 }
 0xb83   : > { %9323 = vmatprep.subr.bf16.mxu1 %v10449_v6  ;;  %v9306_v54 = vpop.f32.mrb[55].mxu0 }
 0xb85   : > { %9312 = vmatmul.mubr.msk.bf16.vlgmr.msra.gmra.mrb[64].mxu1 %vm3366_vm3, %v9884_v41  ;;  %v8232_v41 = vld [vmem:[%s11698_s26] ss:$0 sm:$0xff]  ;;  %s11707_s26 = sld [smem:[#allocation24_spill]] }
 0xb86   : > { %9325 = vmatprep.mubr.msk.bf16.mxu1 %vm10450_vm5, %v10449_v6 }
 0xc50   : > { %v4489_v56 = vpop.f32.mrb[60].mxu1 }
 0xc51   : > { %v4546_v57 = vadd.f32 %v4545_v42, %v4489_v56  ;;  %v9297_v58 = vpop.f32.mrb[61].mxu1 }
 0xc52   : > { %v4492_v59 = vpop.f32.mrb[62].mxu1 }
 0xc53   : > { %v4549_v60 = vadd.f32 %v4548_v46, %v4492_v59  ;;  %v9298_v61 = vpop.f32.mrb[63].mxu1 }
 0xc54   : > { %v5089_v61 = vld [vmem:[%s11699_s10] sm:$0xf]  ;;  %s11708_s10 = sld [smem:[#allocation36_spill]] }
 0xc58   : > { %v4597_v62 = vpop.f32.mrb[64].mxu1 }
 0xc59   : > { %v9313_v63 = vpop.f32.mrb[65].mxu1 }
 0xc5a   : > { %v4600_v0 = vpop.f32.mrb[66].mxu1  ;;  %v9903_v63 = vld [vmem:[#allocation9 + $0x8] sm:$0xff]  }
 0xc5b   : > { %v4604_v1 = vpack.c.bf16 %v4600_v0, %v4597_v62  ;;  %v9314_v2 = vpop.f32.mrb[67].mxu1  ;;  %v9902_v62 = vld [vmem:[#allocation9] sm:$0xff]   ;;  %v9904_v0 = vld [vmem:[#allocation9 + $0x10] sm:$0xff]  }
 0xc5c   : > { %v9906_v2 = vld [vmem:[#allocation10] sm:$0xff]  }
 0xc5d   : > { %9320 = vmatmul.mubr.msk.bf16.vlgmr.msra.gmra.mrb[56].mxu0 %vm3520_vm4, %v4604_v1  ;;  %v9905_v1 = vld [vmem:[#allocation9 + $0x18] sm:$0xff]  }
 0xc5e   : > { %9331 = vmatprep.mubr.msk.bf16.mxu0 %vm10450_vm5, %v10449_v6 }
 0xd30   : > { %v4659_v4 = vpop.f32.mrb[56].mxu0 }
 0xd31   : > { %v4666_v8 = vadd.f32 %v4659_v4, %v4546_v57  ;;  %v9321_v9 = vpop.f32.mrb[57].mxu0  ;;  %v9907_v4 = vld [vmem:[#allocation10 + $0x8] sm:$0xff]  }
 0xd32   : > { %v4662_v11 = vpop.f32.mrb[58].mxu0 }
 0xd33   : > { %v4675_v12 = vadd.f32 %v8190_v7, %v4666_v8  ;;  %v4667_v14 = vadd.f32 %v4662_v11, %v4549_v60  ;;  %v9322_v15 = vpop.f32.mrb[59].mxu0 }
 0xd34   : > { %v5219_v15 = vld [vmem:[%s11700_s16] sm:$0xf] }
 0xd35   : > { %v4676_v16 = vadd.f32 %v8190_v7, %v4667_v14  ;;  %v4677_v17 = vmax.f32 %v4675_v12, 0.0  ;;  %v9909_v7 = vld [vmem:[#allocation10 + $0x10] sm:$0xff]  }
 0xd37   : > { %v4678_v18 = vmax.f32 %v4676_v16, 0.0  ;;  %v8241_v16 = vld [vmem:[%s11700_s16 + $0x4] sm:$0xf] }
 0xd39   : > { %v4679_v3 = vpack.c.bf16 %v4678_v18, %v4677_v17  ;;  %v9908_v17 = vld [vmem:[#allocation10 + $0x20] sm:$0xff]   ;;  %v9910_v18 = vld [vmem:[#allocation10 + $0x28] sm:$0xff]  }
 0xd3b   : > { %v4693_v19 = vsel %vm4691_vm6, %v4679_v3, 0  ;;  %v9911_v3 = vld [vmem:[#allocation10 + $0x18] sm:$0xff]  }
 0xd3c   : > { %9324 = vmatpush3.bf16.msra.mxu1 %v4693_v19  ;;  %9330 = vmatpush3.bf16.msra.mxu0 %v4693_v19 }
 0xd3d   : > { %9359 = vmatprep.subr.bf16.mxu1 %v10449_v6  ;;  %9335 = vmatprep.subr.bf16.mxu0 %v10449_v6 }
 0xd3f   : > { %9332 = vmatmul.mubr.msk.bf16.vlgmr.msra.gmra.mrb[60].mxu0 %vm4687_vm7, %v9887_v20  ;;  %9326 = vmatmul.mubr.msk.bf16.vlgmr.msra.gmra.mrb[68].mxu1 %vm4687_vm7, %v9888_v5  ;;  %v9913_v20 = vld [vmem:[#allocation10 + $0x38] sm:$0xff]  }
 0xd40   : > { %9360 = vmatpush3.bf16.msra.mxu1 %v4693_v19  ;;  %9361 = vmatprep.mubr.msk.bf16.mxu1 %vm10450_vm5, %v10449_v6  ;;  %v9912_v19 = vld [vmem:[#allocation10 + $0x30] sm:$0xff]  }
 0xd41   : > { %9336 = vmatpush3.bf16.msra.mxu0 %v9890_v21  ;;  %9343 = vmatprep.mubr.msk.bf16.mxu0 %vm10450_vm5, %v10449_v6 }
 0xd42   : > { %9337 = vmatprep.subr.bf16.mxu0 %v10449_v6  ;;  %9377 = vmatprep.subr.bf16.mxu1 %v10449_v6 }
 0xd45   : > { %9338 = vmatpush3.bf16.msra.mxu0 %v9891_v22 }
 0xd46   : > { %9339 = vmatprep.subr.bf16.mxu0 %v10449_v6 }
 0xd47   : > { %9362 = vmatmul.mubr.msk.bf16.vlgmr.msra.gmra.mrb[72].mxu1 %vm4687_vm7, %v9889_v23 }
 0xd48   : > { %9379 = vmatprep.mubr.msk.bf16.mxu1 %vm10450_vm5, %v10449_v6 }
 0xd49   : > { %9340 = vmatpush3.bf16.msra.mxu0 %v9892_v10 }
 0xd4a   : > { %9341 = vmatprep.subr.bf16.mxu0 %v10449_v6 }
 0xd4d   : > { %9342 = vmatpush3.bf16.msra.mxu0 %v9893_v47 }
 0xd4e   : > { %9347 = vmatprep.subr.bf16.mxu0 %v10449_v6 }
 0xe12   : > { %v4790_v43 = vpop.f32.mrb[60].mxu0  ;;  %v4729_v45 = vpop.f32.mrb[68].mxu1 }
 0xe13   : > { %v9333_v48 = vpop.f32.mrb[61].mxu0  ;;  %v9327_v49 = vpop.f32.mrb[69].mxu1 }
 0xe14   : > { %v4793_v50 = vpop.f32.mrb[62].mxu0  ;;  %v4732_v52 = vpop.f32.mrb[70].mxu1 }
 0xe15   : > { %v4797_v24 = vpack.c.bf16 %v4793_v50, %v4790_v43  ;;  %v9334_v13 = vpop.f32.mrb[63].mxu0  ;;  %v4736_v25 = vpack.c.bf16 %v4732_v52, %v4729_v45  ;;  %v9328_v26 = vpop.f32.mrb[71].mxu1  ;;  %v8253_v50 = vld [vmem:[%s11700_s16 + $0x8] sm:$0xf] }
 0xe16   : > { %v9915_v52 = vld [vmem:[#allocation10 + $0x48] sm:$0xff]   ;;  %v9917_v13 = vld [vmem:[#allocation10 + $0x58] sm:$0xff]  }
 0xe17   : > { %9344 = vmatmul.mubr.msk.bf16.vlgmr.msra.gmra.mrb[44].mxu0 %vm1226_vm0, %v4797_v24  ;;  %v9916_v24 = vld [vmem:[#allocation10 + $0x50] sm:$0xff]  }
 0xe18   : > { %9348 = vmatpush3.bf16.msra.mxu0 %v9894_v51  ;;  %9355 = vmatprep.mubr.msk.bf16.mxu0 %vm10450_vm5, %v10449_v6  ;;  %v9914_v51 = vld [vmem:[#allocation10 + $0x40] sm:$0xff]  }
 0xe19   : > { %9349 = vmatprep.subr.bf16.mxu0 %v10449_v6 }
 0xe1a   : > { %v4988_v28 = vpop.f32.mrb[72].mxu1 }
 0xe1b   : > { %v9363_v29 = vpop.f32.mrb[73].mxu1 }
 0xe1c   : > { %9350 = vmatpush3.bf16.msra.mxu0 %v9895_v27  ;;  %v4991_v31 = vpop.f32.mrb[74].mxu1 }
 0xe1d   : > { %9351 = vmatprep.subr.bf16.mxu0 %v10449_v6  ;;  %v4995_v32 = vpack.c.bf16 %v4991_v31, %v4988_v28  ;;  %v9364_v33 = vpop.f32.mrb[75].mxu1 }
 0xe20   : > { %9352 = vmatpush3.bf16.msra.mxu0 %v9896_v30 }
 0xe21   : > { %9353 = vmatprep.subr.bf16.mxu0 %v10449_v6 }
 0xe24   : > { %9354 = vmatpush3.bf16.msra.mxu0 %v9897_v34 }
 0xe25   : > { %9365 = vmatprep.subr.bf16.mxu0 %v10449_v6 }
 0xe27   : > { %9356 = vmatmul.mubr.msk.bf16.vlgmr.msra.gmra.mrb[44].mxu0 %vm1226_vm0, %v4736_v25 }
 0xe28   : > { %9366 = vmatpush3.bf16.msra.mxu0 %v9898_v35  ;;  %9373 = vmatprep.mubr.msk.bf16.mxu0 %vm10450_vm5, %v10449_v6 }
 0xe29   : > { %9367 = vmatprep.subr.bf16.mxu0 %v10449_v6 }
 0xe2c   : > { %9368 = vmatpush3.bf16.msra.mxu0 %v9899_v36 }
 0xe2d   : > { %9369 = vmatprep.subr.bf16.mxu0 %v10449_v6 }
 0xe30   : > { %9370 = vmatpush3.bf16.msra.mxu0 %v9900_v37 }
 0xe31   : > { %9371 = vmatprep.subr.bf16.mxu0 %v10449_v6 }
 0xe34   : > { %9372 = vmatpush3.bf16.msra.mxu0 %v9901_v38 }
 0xe35   : > { %9419 = vmatprep.subr.bf16.mxu0 %v10449_v6 }
 0xe37   : > { %9374 = vmatmul.mubr.msk.bf16.vlgmr.msra.gmra.mrb[44].mxu0 %vm1226_vm0, %v4995_v32 }
 0xe38   : > { %9427 = vmatprep.mubr.msk.bf16.mxu0 %vm10450_vm5, %v10449_v6  ;;  %9420 = vmatpush3.bf16.msra.mxu0 %v9906_v2  ;;  %v9921_v2 = vld [vmem:[%s11703_s15 + $0x58] sm:$0xff]  }
 0xe39   : > { %9421 = vmatprep.subr.bf16.mxu0 %v10449_v6 }
 0xe3c   : > { %9422 = vmatpush3.bf16.msra.mxu0 %v9907_v4  ;;  %v9922_v4 = vld [vmem:[%s11703_s15 + $0x60] sm:$0xff]  }
 0xe3d   : > { %9423 = vmatprep.subr.bf16.mxu0 %v10449_v6 }
 0xe40   : > { %9424 = vmatpush3.bf16.msra.mxu0 %v9909_v7  ;;  %v9923_v7 = vld [vmem:[%s11703_s15 + $0x68] sm:$0xff]  }
 0xe41   : > { %9425 = vmatprep.subr.bf16.mxu0 %v10449_v6 }
 0xe44   : > { %9426 = vmatpush3.bf16.msra.mxu0 %v9911_v3 }
 0xe45   : > { %9437 = vmatprep.subr.bf16.mxu0 %v10449_v6 }
 0xf0a   : > { %v5066_v40 = vpop.f32.mrb[44].mxu0 }
 0xf0b   : > { %v9551_v42 = vadd.f32 %v8167_v39, %v5066_v40  ;;  %v9375_v44 = vpop.f32.mrb[45].mxu0  ;;  %v8260_v40 = vld [vmem:[%s11701_s22] ss:$0 sm:$0xff]  ;;  %s11709_s22 = sld [smem:[#allocation25_spill]] }
 0xf0c   : > { %v5069_v46 = vpop.f32.mrb[46].mxu0 }
 0xf0d   : > { %v9552_v53 = vadd.f32 %v9551_v42, %v8232_v41  ;;  %v9553_v54 = vadd.f32 %v8167_v39, %v5069_v46  ;;  %v9376_v55 = vpop.f32.mrb[47].mxu0 }
 0xf0f   : > { %v9554_v56 = vadd.f32 %v9553_v54, %v8232_v41  ;;  %v5086_v57 = vmax.f32 %v9552_v53, 0.0  ;;  %v10451_v53 = vmov 65535  }
 0xf10   : > { %v5601_v54 = vsel %vm5599_vm8, 4294967295, %v10451_v53  ;;  %v9965_v53 = vld [vmem:[#allocation12 + $0x74] ss:$8 sps:$4 sm:$0xff]  }
 0xf11   : > { %v5087_v58 = vmax.f32 %v9554_v56, 0.0 }
 0xf13   : > { %v5088_v59 = vpack.c.bf16 %v5087_v58, %v5086_v57  ;;  %v11360_v57 = vsel %vm5600_vm9, %v5601_v54, 0  ;;  %v9963_v54 = vld [vmem:[#allocation12 + $0x70] ss:$8 sps:$4 sm:$0xff]  }
 0xf15   : > { %v11304_v60 = vsel %vm4691_vm6, %v5088_v59, 0 }
 0xf16   : > { %9378 = vmatpush3.bf16.msra.mxu1 %v11304_v60 }
 0xf17   : > { %9383 = vmatprep.subr.bf16.mxu1 %v10449_v6 }
 0xf19   : > { %9380 = vmatmul.mubr.msk.bf16.vlgmr.msra.gmra.mrb[76].mxu1 %vm4687_vm7, %v5089_v61  ;;  %v8296_v61 = vld [vmem:[%s11702_s0 + $0x8] sm:$0xf] }
 0xf1a   : > { %9384 = vmatpush3.bf16.msra.mxu1 %v9902_v62  ;;  %9391 = vmatprep.mubr.msk.bf16.mxu1 %vm10450_vm5, %v10449_v6  ;;  %v8262_v62 = vld [vmem:[%s11702_s0 + $0x4] sm:$0xf] }
 0xf1b   : > { %9385 = vmatprep.subr.bf16.mxu1 %v10449_v6 }
 0xf1e   : > { %9386 = vmatpush3.bf16.msra.mxu1 %v9903_v63  ;;  %v9918_v63 = vld [vmem:[%s11703_s15 + $0x40] sm:$0xff]  }
 0xf1f   : > { %9387 = vmatprep.subr.bf16.mxu1 %v10449_v6 }
 0xf22   : > { %9388 = vmatpush3.bf16.msra.mxu1 %v9904_v0  ;;  %v9919_v0 = vld [vmem:[%s11703_s15 + $0x48] sm:$0xff]  }
 0xf23   : > { %9389 = vmatprep.subr.bf16.mxu1 %v10449_v6 }
 0xf26   : > { %9390 = vmatpush3.bf16.msra.mxu1 %v9905_v1  ;;  %v9920_v1 = vld [vmem:[%s11703_s15 + $0x50] sm:$0xff]  }
 0xf27   : > { %9395 = vmatprep.subr.bf16.mxu1 %v10449_v6 }
 0xfec   : > { %v5130_v8 = vpop.f32.mrb[76].mxu1 }
 0xfed   : > { %v5136_v9 = vpack.c.bf16 %v5130_v8, %v5130_v8  ;;  %v9381_v11 = vpop.f32.mrb[77].mxu1  ;;  %v9924_v8 = vld [vmem:[%s11703_s15 + $0x70] sm:$0xff]  }
 0xfee   : > { %v5133_v12 = vpop.f32.mrb[78].mxu1 }
 0xfef   : > { %v9382_v14 = vpop.f32.mrb[79].mxu1  ;;  %9392 = vmatmul.mubr.msk.bf16.vlgmr.msra.gmra.mrb[80].mxu1 %vm1226_vm0, %v5136_v9  ;;  %v9925_v9 = vld [vmem:[%s11703_s15 + $0x78] sm:$0xff]  }
 0xff0   : > { %9396 = vmatpush3.bf16.msra.mxu1 %v11304_v60  ;;  %9397 = vmatprep.mubr.msk.bf16.mxu1 %vm10450_vm5, %v10449_v6 }
 0xff1   : > { %9401 = vmatprep.subr.bf16.mxu1 %v10449_v6 }
 0xff7   : > { %9398 = vmatmul.mubr.msk.bf16.vlgmr.msra.gmra.mrb[84].mxu1 %vm4687_vm7, %v5219_v15 }
 0xff8   : > { %9402 = vmatpush3.bf16.msra.mxu1 %v11304_v60  ;;  %9403 = vmatprep.mubr.msk.bf16.mxu1 %vm10450_vm5, %v10449_v6 }
 0xff9   : > { %9407 = vmatprep.subr.bf16.mxu1 %v10449_v6 }
 0xfff   : > { %9404 = vmatmul.mubr.msk.bf16.vlgmr.msra.gmra.mrb[88].mxu1 %vm4687_vm7, %v8241_v16 }
0x1000   : > { %9408 = vmatpush3.bf16.msra.mxu1 %v9908_v17  ;;  %9415 = vmatprep.mubr.msk.bf16.mxu1 %vm10450_vm5, %v10449_v6 }
0x1001   : > { %9409 = vmatprep.subr.bf16.mxu1 %v10449_v6 }
0x1004   : > { %9410 = vmatpush3.bf16.msra.mxu1 %v9910_v18 }
0x1005   : > { %9411 = vmatprep.subr.bf16.mxu1 %v10449_v6 }
0x1008   : > { %9412 = vmatpush3.bf16.msra.mxu1 %v9912_v19 }
0x1009   : > { %9413 = vmatprep.subr.bf16.mxu1 %v10449_v6 }
0x100c   : > { %9414 = vmatpush3.bf16.msra.mxu1 %v9913_v20  ;;  %v9926_v20 = vld [vmem:[%s11703_s15] sm:$0xff]  }
0x100d   : > { %9431 = vmatprep.subr.bf16.mxu1 %v10449_v6 }
0x10ca   : > { %v5257_v5 = vpop.f32.mrb[84].mxu1 }
0x10cb   : > { %v5263_v21 = vpack.c.bf16 %v5257_v5, %v5257_v5  ;;  %v9399_v22 = vpop.f32.mrb[85].mxu1 }
0x10cc   : > { %v5260_v23 = vpop.f32.mrb[86].mxu1 }
0x10cd   : > { %v9400_v10 = vpop.f32.mrb[87].mxu1  ;;  %9428 = vmatmul.mubr.msk.bf16.vlgmr.msra.gmra.mrb[64].mxu0 %vm1226_vm0, %v5263_v21 }
0x10ce   : > { %9445 = vmatprep.mubr.msk.bf16.mxu0 %vm10450_vm5, %v10449_v6  ;;  %9438 = vmatpush3.bf16.msra.mxu0 %v9914_v51  ;;  %v9927_v10 = vld [vmem:[%s11703_s15 + $0x8] sm:$0xff]   ;;  %v9934_v51 = vld [vmem:[%s11703_s15 + $0x80] sm:$0xff]  }
0x10cf   : > { %9439 = vmatprep.subr.bf16.mxu0 %v10449_v6 }
0x10d2   : > { %v5311_v47 = vpop.f32.mrb[88].mxu1  ;;  %9440 = vmatpush3.bf16.msra.mxu0 %v9915_v52 }
0x10d3   : > { %v5317_v43 = vpack.c.bf16 %v5311_v47, %v5311_v47  ;;  %v9405_v45 = vpop.f32.mrb[89].mxu1  ;;  %9441 = vmatprep.subr.bf16.mxu0 %v10449_v6  ;;  %v9928_v47 = vld [vmem:[%s11703_s15 + $0x10] sm:$0xff]  }
0x10d4   : > { %v5314_v48 = vpop.f32.mrb[90].mxu1  ;;  %v9930_v45 = vld [vmem:[%s11703_s15 + $0x20] sm:$0xff]  }
0x10d5   : > { %v9406_v49 = vpop.f32.mrb[91].mxu1  ;;  %9416 = vmatmul.mubr.msk.bf16.vlgmr.msra.gmra.mrb[92].mxu1 %vm1226_vm0, %v5317_v43  ;;  %v9929_v43 = vld [vmem:[%s11703_s15 + $0x18] sm:$0xff]   ;;  %v9931_v48 = vld [vmem:[%s11703_s15 + $0x28] sm:$0xff]  }
0x10d6   : > { %9432 = vmatpush3.bf16.msra.mxu1 %v11304_v60  ;;  %9433 = vmatprep.mubr.msk.bf16.mxu1 %vm10450_vm5, %v10449_v6  ;;  %v5594_v60 = vld [vmem:[%s11702_s0] sm:$0xf]  ;;  %v9932_v49 = vld [vmem:[%s11703_s15 + $0x30] sm:$0xff]  }
0x10d7   : > { %9449 = vmatprep.subr.bf16.mxu1 %v10449_v6  ;;  %9442 = vmatpush3.bf16.msra.mxu0 %v9916_v24  ;;  %v9935_v24 = vld [vmem:[%s11703_s15 + $0x88] sm:$0xff]  }
0x10d8   : > { %9443 = vmatprep.subr.bf16.mxu0 %v10449_v6 }
0x10db   : > { %9444 = vmatpush3.bf16.msra.mxu0 %v9917_v13  ;;  %v9936_v13 = vld [vmem:[%s11703_s15 + $0x90] sm:$0xff]  }
0x10dc   : > { %9501 = vmatprep.subr.bf16.mxu0 %v10449_v6 }
0x10dd   : > { %9434 = vmatmul.mubr.msk.bf16.vlgmr.msra.gmra.mrb[96].mxu1 %vm4687_vm7, %v8253_v50  ;;  %v9933_v50 = vld [vmem:[%s11703_s15 + $0x38] sm:$0xff]  }
0x10de   : > { %9451 = vmatprep.mubr.msk.bf16.mxu1 %vm10450_vm5, %v10449_v6 }
0x11a0   : > { %v5455_v25 = vpop.f32.mrb[64].mxu0 }
0x11a1   : > { %v9429_v26 = vpop.f32.mrb[65].mxu0 }
0x11a2   : > { %v5458_v27 = vpop.f32.mrb[66].mxu0  ;;  %v9938_v26 = vld [vmem:[%s11703_s15 + $0xa0] sm:$0xff]  }
0x11a3   : > { %v9430_v28 = vpop.f32.mrb[67].mxu0  ;;  %v9939_v27 = vld [vmem:[%s11703_s15 + $0xa8] sm:$0xff]  }
0x11a4   : > { %v9940_v28 = vld [vmem:[%s11703_s15 + $0xb0] sm:$0xff]  }
0x11a8   : > { %v5388_v29 = vpop.f32.mrb[92].mxu1 }
0x11a9   : > { %v5456_v30 = vadd.f32 %v5455_v25, %v5388_v29  ;;  %v9417_v31 = vpop.f32.mrb[93].mxu1  ;;  %v9937_v25 = vld [vmem:[%s11703_s15 + $0x98] sm:$0xff]  }
0x11aa   : > { %v5391_v32 = vpop.f32.mrb[94].mxu1  ;;  %v9941_v29 = vld [vmem:[%s11703_s15 + $0xb8] sm:$0xff]   ;;  %v9942_v31 = vld [vmem:[#allocation12] ss:$8 sps:$4 sm:$0xff]  }
0x11ab   : > { %v9418_v33 = vpop.f32.mrb[95].mxu1  ;;  %v9944_v32 = vld [vmem:[#allocation12 + $0x4] ss:$8 sps:$4 sm:$0xff]  }
0x11ac   : > { %v9947_v33 = vld [vmem:[#allocation12 + $0x14] ss:$8 sps:$4 sm:$0xff]  }
0x11b0   : > { %v5500_v34 = vpop.f32.mrb[96].mxu1 }
0x11b1   : > { %v5506_v35 = vpack.c.bf16 %v5500_v34, %v5500_v34  ;;  %v9435_v36 = vpop.f32.mrb[97].mxu1  ;;  %v9945_v34 = vld [vmem:[#allocation12 + $0x10] ss:$8 sps:$4 sm:$0xff]  }
0x11b2   : > { %v5503_v37 = vpop.f32.mrb[98].mxu1  ;;  %v9948_v36 = vld [vmem:[#allocation12 + $0x20] ss:$8 sps:$4 sm:$0xff]  }
0x11b3   : > { %v9436_v38 = vpop.f32.mrb[99].mxu1  ;;  %9446 = vmatmul.mubr.msk.bf16.vlgmr.msra.gmra.mrb[68].mxu0 %vm1226_vm0, %v5506_v35  ;;  %v9950_v35 = vld [vmem:[#allocation12 + $0x24] ss:$8 sps:$4 sm:$0xff]   ;;  %v9953_v37 = vld [vmem:[#allocation12 + $0x34] ss:$8 sps:$4 sm:$0xff]  }
0x11b4   : > { %9503 = vmatprep.mubr.msk.bf16.mxu0 %vm10450_vm5, %v10449_v6  ;;  %v9951_v38 = vld [vmem:[#allocation12 + $0x30] ss:$8 sps:$4 sm:$0xff]  }
0x1286   : > { %v5577_v39 = vpop.f32.mrb[68].mxu0 }
0x1287   : > { %v5583_v41 = vadd.f32 %v5577_v39, %v5456_v30  ;;  %v9447_v42 = vpop.f32.mrb[69].mxu0  ;;  %v9956_v39 = vld [vmem:[#allocation12 + $0x44] ss:$8 sps:$4 sm:$0xff]  }
0x1288   : > { %v5580_v44 = vpop.f32.mrb[70].mxu0  ;;  %v9957_v42 = vld [vmem:[#allocation12 + $0x50] ss:$8 sps:$4 sm:$0xff]  }
0x1289   : > { %v5591_v46 = vadd.f32 %v8260_v40, %v5583_v41  ;;  %v9448_v55 = vpop.f32.mrb[71].mxu0  ;;  %v9954_v40 = vld [vmem:[#allocation12 + $0x40] ss:$8 sps:$4 sm:$0xff]   ;;  %v9959_v41 = vld [vmem:[#allocation12 + $0x54] ss:$8 sps:$4 sm:$0xff]  }
0x128a   : > { %v9962_v44 = vld [vmem:[#allocation12 + $0x64] ss:$8 sps:$4 sm:$0xff]   ;;  %v8234_v55 = vld [vmem:[%s11704_s2] ss:$0 sm:$0xff]  ;;  %s11710_s2 = sld [smem:[#allocation35_spill]] }
0x128b   : > { %v5592_v56 = vmax.f32 %v5591_v46, 0.0  ;;  %v9960_v46 = vld [vmem:[#allocation12 + $0x60] ss:$8 sps:$4 sm:$0xff]  }
0x128d   : > { %v5593_v58 = vpack.c.bf16 %v5592_v56, %v5592_v56 }
0x128f   : > { %v5604_v59 = vand.u32 %v11360_v57, %v5593_v58  ;;  %v8322_v58 = vld [vmem:[%s11705_s23] ss:$0 sm:$0xff]  ;;  %s7922_s23 = sshll.u32 %s11712_s1, 1 }
0x1291   : > { %9450 = vmatpush3.bf16.msra.mxu1 %v5604_v59  ;;  %9502 = vmatpush3.bf16.msra.mxu0 %v5604_v59 }
0x1292   : > { %9455 = vmatprep.subr.bf16.mxu1 %v10449_v6  ;;  %9527 = vmatprep.subr.bf16.mxu0 %v10449_v6 }
0x1294   : > { %9452 = vmatmul.mubr.msk.bf16.vlgmr.msra.gmra.mrb[100].mxu1 %vm5595_vm10, %v5594_v60  ;;  %9504 = vmatmul.mubr.msk.bf16.vlgmr.msra.gmra.mrb[72].mxu0 %vm5595_vm10, %v8296_v61 }
0x1295   : > { %9456 = vmatpush3.bf16.msra.mxu1 %v5604_v59  ;;  %9457 = vmatprep.mubr.msk.bf16.mxu1 %vm10450_vm5, %v10449_v6 }
0x1296   : > { %9461 = vmatprep.subr.bf16.mxu1 %v10449_v6  ;;  %9529 = vmatprep.mubr.msk.bf16.mxu0 %vm10450_vm5, %v10449_v6 }
0x129c   : > { %9458 = vmatmul.mubr.msk.bf16.vlgmr.msra.gmra.mrb[104].mxu1 %vm5595_vm10, %v8262_v62 }
0x129d   : > { %9462 = vmatpush3.bf16.msra.mxu1 %v9918_v63  ;;  %9477 = vmatprep.mubr.msk.bf16.mxu1 %vm10450_vm5, %v10449_v6 }
0x129e   : > { %9463 = vmatprep.subr.bf16.mxu1 %v10449_v6 }
0x12a1   : > { %9464 = vmatpush3.bf16.msra.mxu1 %v9919_v0 }
0x12a2   : > { %9465 = vmatprep.subr.bf16.mxu1 %v10449_v6 }
0x12a5   : > { %9466 = vmatpush3.bf16.msra.mxu1 %v9920_v1 }
0x12a6   : > { %9467 = vmatprep.subr.bf16.mxu1 %v10449_v6 }
0x12a9   : > { %9468 = vmatpush3.bf16.msra.mxu1 %v9921_v2 }
0x12aa   : > { %9469 = vmatprep.subr.bf16.mxu1 %v10449_v6 }
0x12ad   : > { %9470 = vmatpush3.bf16.msra.mxu1 %v9922_v4  ;;  %v6065_v4 = vld [vmem:[%s11706_s7] sm:$0x3]  ;;  %s1198_s7 = scalar_lea.vmem %s10642_s8, %s7922_s23 }
0x12ae   : > { %9471 = vmatprep.subr.bf16.mxu1 %v10449_v6 }
0x12b1   : > { %9472 = vmatpush3.bf16.msra.mxu1 %v9923_v7  ;;  %v6262_v7 = vld [vmem:[%s11707_s26] sm:$0x3] }
0x12b2   : > { %9473 = vmatprep.subr.bf16.mxu1 %v10449_v6 }
0x12b5   : > { %9474 = vmatpush3.bf16.msra.mxu1 %v9924_v8  ;;  %v10452_v8 = vmov 0  }
0x12b6   : > { %9475 = vmatprep.subr.bf16.mxu1 %v10449_v6 }
0x12b9   : > { %9476 = vmatpush3.bf16.msra.mxu1 %v9925_v9  ;;  %v9966_v9 = vld [vmem:[%s11708_s10 + $0x80] ss:$8 sps:$4 sm:$0xff]  }
0x12ba   : > { %9481 = vmatprep.subr.bf16.mxu1 %v10449_v6 }
0x1367   : > { %v5640_v11 = vpop.f32.mrb[100].mxu1  ;;  %v11394_v12 = vpop.f32.mrb[72].mxu0 }
0x1368   : > { %v9453_v14 = vpop.f32.mrb[101].mxu1  ;;  %v9505_v15 = vpop.f32.mrb[73].mxu0  ;;  %v5646_v52 = vpack.c.bf16 %v5640_v11, %v5640_v11  ;;  %v5947_v30 = vpack.c.bf16 %v11394_v12, %v11394_v12  ;;  %v9968_v11 = vld [vmem:[%s11708_s10 + $0x84] ss:$8 sps:$4 sm:$0xff]   ;;  %v9971_v12 = vld [vmem:[%s11708_s10 + $0x94] ss:$8 sps:$4 sm:$0xff]  }
0x1369   : > { %v5643_v16 = vpop.f32.mrb[102].mxu1  ;;  %v5944_v17 = vpop.f32.mrb[74].mxu0  ;;  %v9969_v14 = vld [vmem:[%s11708_s10 + $0x90] ss:$8 sps:$4 sm:$0xff]   ;;  %v9974_v15 = vld [vmem:[%s11708_s10 + $0xa4] ss:$8 sps:$4 sm:$0xff]  }
0x136a   : > { %v9454_v18 = vpop.f32.mrb[103].mxu1  ;;  %v9506_v3 = vpop.f32.mrb[75].mxu0  ;;  %v9972_v16 = vld [vmem:[%s11708_s10 + $0xa0] ss:$8 sps:$4 sm:$0xff]   ;;  %v9977_v17 = vld [vmem:[%s11708_s10 + $0xb4] ss:$8 sps:$4 sm:$0xff]  }
0x136b   : > { %v9975_v18 = vld [vmem:[%s11708_s10 + $0xb0] ss:$8 sps:$4 sm:$0xff]   ;;  %v9980_v3 = vld [vmem:[%s11708_s10 + $0xc4] ss:$8 sps:$4 sm:$0xff]  }
0x136f   : > { %v5702_v19 = vpop.f32.mrb[104].mxu1 }
0x1370   : > { %v5708_v5 = vpack.c.bf16 %v5702_v19, %v5702_v19  ;;  %v9459_v21 = vpop.f32.mrb[105].mxu1  ;;  %v9978_v19 = vld [vmem:[%s11708_s10 + $0xc0] ss:$8 sps:$4 sm:$0xff]  }
0x1371   : > { %v5705_v22 = vpop.f32.mrb[106].mxu1  ;;  %v9986_v21 = vld [vmem:[%s11708_s10 + $0xe4] ss:$8 sps:$4 sm:$0xff]  }
0x1372   : > { %v9460_v23 = vpop.f32.mrb[107].mxu1  ;;  %9478 = vmatmul.mubr.bf16.vlgmr.msra.gmra.mrb[80].mxu1 %v5708_v5  ;;  %v9981_v5 = vld [vmem:[%s11708_s10 + $0xd0] ss:$8 sps:$4 sm:$0xff]   ;;  %v9984_v22 = vld [vmem:[%s11708_s10 + $0xe0] ss:$8 sps:$4 sm:$0xff]  }
0x1373   : > { %9482 = vmatpush3.bf16.msra.mxu1 %v9926_v20  ;;  %9497 = vmatprep.mubr.msk.bf16.mxu1 %vm10450_vm5, %v10449_v6  ;;  %v9983_v20 = vld [vmem:[%s11708_s10 + $0xd4] ss:$8 sps:$4 sm:$0xff]  }
0x1374   : > { %9483 = vmatprep.subr.bf16.mxu1 %v10449_v6  ;;  %v9989_v23 = vld [vmem:[%s11708_s10 + $0xf4] ss:$8 sps:$4 sm:$0xff]  }
0x1377   : > { %9484 = vmatpush3.bf16.msra.mxu1 %v9927_v10  ;;  %v9987_v10 = vld [vmem:[%s11708_s10 + $0xf0] ss:$8 sps:$4 sm:$0xff]  }
0x1378   : > { %9485 = vmatprep.subr.bf16.mxu1 %v10449_v6 }
0x137b   : > { %9486 = vmatpush3.bf16.msra.mxu1 %v9928_v47  ;;  %v9992_v47 = vld [vmem:[%s11708_s10 + $0x4] ss:$8 sps:$4 sm:$0xff]  }
0x137c   : > { %9487 = vmatprep.subr.bf16.mxu1 %v10449_v6 }
0x137f   : > { %9488 = vmatpush3.bf16.msra.mxu1 %v9929_v43 }
0x1380   : > { %9489 = vmatprep.subr.bf16.mxu1 %v10449_v6 }
0x1383   : > { %9490 = vmatpush3.bf16.msra.mxu1 %v9930_v45 }
0x1384   : > { %9491 = vmatprep.subr.bf16.mxu1 %v10449_v6 }
0x1387   : > { %9492 = vmatpush3.bf16.msra.mxu1 %v9931_v48 }
0x1388   : > { %9493 = vmatprep.subr.bf16.mxu1 %v10449_v6 }
0x138b   : > { %9494 = vmatpush3.bf16.msra.mxu1 %v9932_v49  ;;  %v10016_v49 = vld [vmem:[%s11708_s10 + $0x104] ss:$8 sps:$4 sm:$0xff]  }
0x138c   : > { %9495 = vmatprep.subr.bf16.mxu1 %v10449_v6 }
0x138f   : > { %9496 = vmatpush3.bf16.msra.mxu1 %v9933_v50 }
0x1390   : > { %9507 = vmatprep.subr.bf16.mxu1 %v10449_v6 }
0x1392   : > { %9498 = vmatmul.mubr.bf16.vlgmr.msra.gmra.mrb[80].mxu1 %v5646_v52  ;;  %v8391_v52 = vld [vmem:[%s11707_s26 + $0x4] sm:$0x3] }
0x1393   : > { %9508 = vmatpush3.bf16.msra.mxu1 %v9934_v51  ;;  %9523 = vmatprep.mubr.msk.bf16.mxu1 %vm10450_vm5, %v10449_v6 }
0x1394   : > { %9509 = vmatprep.subr.bf16.mxu1 %v10449_v6 }
0x1397   : > { %9510 = vmatpush3.bf16.msra.mxu1 %v9935_v24 }
0x1398   : > { %9511 = vmatprep.subr.bf16.mxu1 %v10449_v6 }
0x139b   : > { %9512 = vmatpush3.bf16.msra.mxu1 %v9936_v13  ;;  %v10014_v13 = vld [vmem:[%s11708_s10 + $0x100] ss:$8 sps:$4 sm:$0xff]  }
0x139c   : > { %9513 = vmatprep.subr.bf16.mxu1 %v10449_v6 }
0x139f   : > { %9514 = vmatpush3.bf16.msra.mxu1 %v9937_v25 }
0x13a0   : > { %9515 = vmatprep.subr.bf16.mxu1 %v10449_v6 }
0x13a3   : > { %9516 = vmatpush3.bf16.msra.mxu1 %v9938_v26  ;;  %v10019_v26 = vld [vmem:[%s11708_s10 + $0x114] ss:$8 sps:$4 sm:$0xff]  }
0x13a4   : > { %9517 = vmatprep.subr.bf16.mxu1 %v10449_v6 }
0x13a7   : > { %9518 = vmatpush3.bf16.msra.mxu1 %v9939_v27 }
0x13a8   : > { %9519 = vmatprep.subr.bf16.mxu1 %v10449_v6 }
0x13ab   : > { %9520 = vmatpush3.bf16.msra.mxu1 %v9940_v28 }
0x13ac   : > { %9521 = vmatprep.subr.bf16.mxu1 %v10449_v6 }
0x13af   : > { %9522 = vmatpush3.bf16.msra.mxu1 %v9941_v29  ;;  %v10017_v29 = vld [vmem:[%s11708_s10 + $0x110] ss:$8 sps:$4 sm:$0xff]  }
0x13b0   : > { %6221 = vmatprep.subr.bf16.mxu1 %v9944_v32 }
0x13b2   : > { %9524 = vmatmul.mubr.bf16.vlgmr.msra.gmra.mrb[80].mxu1 %v5947_v30 }
0x13b3   : > { %6222 = vmatpush1.bf16.msra.mxu1 %v9942_v31  ;;  %6253 = vmatprep.mubr.bf16.mxu1 %v10452_v8  ;;  %v9990_v31 = vld [vmem:[%s11708_s10] ss:$8 sps:$4 sm:$0xff]  }
0x13b4   : > { %6223 = vmatprep.subr.bf16.mxu1 %v9947_v33  ;;  %v9995_v33 = vld [vmem:[%s11708_s10 + $0x14] ss:$8 sps:$4 sm:$0xff]  }
0x13b7   : > { %6224 = vmatpush1.bf16.msra.mxu1 %v9945_v34 }
0x13b8   : > { %6225 = vmatprep.subr.bf16.mxu1 %v9950_v35  ;;  %v10020_v35 = vld [vmem:[%s11708_s10 + $0x120] ss:$8 sps:$4 sm:$0xff]  }
0x13bb   : > { %6226 = vmatpush1.bf16.msra.mxu1 %v9948_v36 }
0x13bc   : > { %6227 = vmatprep.subr.bf16.mxu1 %v9953_v37  ;;  %v10025_v37 = vld [vmem:[%s11708_s10 + $0x134] ss:$8 sps:$4 sm:$0xff]  }
0x13bf   : > { %6228 = vmatpush1.bf16.msra.mxu1 %v9951_v38 }
0x13c0   : > { %6229 = vmatprep.subr.bf16.mxu1 %v9956_v39  ;;  %v9993_v39 = vld [vmem:[%s11708_s10 + $0x10] ss:$8 sps:$4 sm:$0xff]  }
0x13c3   : > { %6230 = vmatpush1.bf16.msra.mxu1 %v9954_v40  ;;  %v9998_v40 = vld [vmem:[%s11708_s10 + $0x24] ss:$8 sps:$4 sm:$0xff]  }
0x13c4   : > { %6231 = vmatprep.subr.bf16.mxu1 %v9959_v41  ;;  %v10023_v41 = vld [vmem:[%s11708_s10 + $0x130] ss:$8 sps:$4 sm:$0xff]  }
0x13c7   : > { %6232 = vmatpush1.bf16.msra.mxu1 %v9957_v42  ;;  %v10028_v42 = vld [vmem:[%s11708_s10 + $0x144] ss:$8 sps:$4 sm:$0xff]  }
0x13c8   : > { %6233 = vmatprep.subr.bf16.mxu1 %v9962_v44  ;;  %v9996_v44 = vld [vmem:[%s11708_s10 + $0x20] ss:$8 sps:$4 sm:$0xff]  }
0x13cb   : > { %6234 = vmatpush1.bf16.msra.mxu1 %v9960_v46  ;;  %v10001_v46 = vld [vmem:[%s11708_s10 + $0x34] ss:$8 sps:$4 sm:$0xff]  }
0x13cc   : > { %6235 = vmatprep.subr.bf16.mxu1 %v9965_v53  ;;  %v10026_v53 = vld [vmem:[%s11708_s10 + $0x140] ss:$8 sps:$4 sm:$0xff]  }
0x13cf   : > { %6236 = vmatpush1.bf16.msra.mxu1 %v9963_v54  ;;  %v10031_v54 = vld [vmem:[%s11708_s10 + $0x154] ss:$8 sps:$4 sm:$0xff]  }
0x13d0   : > { %9545 = vmatprep.subr.bf16.mxu1 %v10449_v6 }
0x1485   : > { %v6047_v56 = vpop.f32.mrb[80].mxu1 }
0x1486   : > { %v9555_v59 = vadd.f32 %v8234_v55, %v6047_v56  ;;  %v9525_v60 = vpop.f32.mrb[81].mxu1  ;;  %v9999_v55 = vld [vmem:[%s11708_s10 + $0x30] ss:$8 sps:$4 sm:$0xff]   ;;  %v10004_v56 = vld [vmem:[%s11708_s10 + $0x44] ss:$8 sps:$4 sm:$0xff]  }
0x1487   : > { %v6050_v61 = vpop.f32.mrb[82].mxu1  ;;  %v10002_v60 = vld [vmem:[%s11708_s10 + $0x40] ss:$8 sps:$4 sm:$0xff]  }
0x1488   : > { %v9556_v62 = vadd.f32 %v9555_v59, %v8322_v58  ;;  %v9526_v63 = vpop.f32.mrb[83].mxu1  ;;  %v10029_v58 = vld [vmem:[%s11708_s10 + $0x150] ss:$8 sps:$4 sm:$0xff]   ;;  %v10034_v59 = vld [vmem:[%s11708_s10 + $0x164] ss:$8 sps:$4 sm:$0xff]  }
0x1489   : > { %v10007_v61 = vld [vmem:[%s11708_s10 + $0x54] ss:$8 sps:$4 sm:$0xff]  }
0x148a   : > { %v6063_v0 = vmax.f32 %v9556_v62, 0.0  ;;  %v10032_v62 = vld [vmem:[%s11708_s10 + $0x160] ss:$8 sps:$4 sm:$0xff]   ;;  %v10037_v63 = vld [vmem:[%s11708_s10 + $0x174] ss:$8 sps:$4 sm:$0xff]  }
0x148c   : > { %v6064_v1 = vpack.c.bf16 %v6063_v0, %v6063_v0  ;;  %v10005_v0 = vld [vmem:[%s11708_s10 + $0x50] ss:$8 sps:$4 sm:$0xff]  }
0x148e   : > { %v6070_v2 = vand.u32 %v6064_v1, %v11360_v57  ;;  %v8341_v57 = vld [vmem:[%s11707_s26 + $0x2] sm:$0x3]  ;;  %v10010_v1 = vld [vmem:[%s11708_s10 + $0x64] ss:$8 sps:$4 sm:$0xff]  }
0x1490   : > { %9528 = vmatpush3.bf16.msra.mxu0 %v6070_v2 }
0x1491   : > { %9533 = vmatprep.subr.bf16.mxu0 %v10449_v6 }
0x1493   : > { %9530 = vmatmul.mubr.msk.bf16.vlgmr.msra.gmra.mrb[76].mxu0 %vm5595_vm10, %v6065_v4  ;;  %v10008_v4 = vld [vmem:[%s11708_s10 + $0x60] ss:$8 sps:$4 sm:$0xff]  }
0x1494   : > { %9534 = vmatpush3.bf16.msra.mxu0 %v6070_v2  ;;  %9535 = vmatprep.mubr.msk.bf16.mxu0 %vm10450_vm5, %v10449_v6 }
0x1495   : > { %9539 = vmatprep.subr.bf16.mxu0 %v10449_v6 }
0x149b   : > { %9536 = vmatmul.mubr.msk.bf16.vlgmr.msra.gmra.mrb[80].mxu0 %vm5595_vm10, %v6262_v7  ;;  %v10013_v7 = vld [vmem:[%s11708_s10 + $0x74] ss:$8 sps:$4 sm:$0xff]  }
0x149c   : > { %9540 = vmatpush3.bf16.msra.mxu0 %v6070_v2  ;;  %9541 = vmatprep.mubr.msk.bf16.mxu0 %vm10450_vm5, %v10449_v6 }
0x149d   : > { %6466 = vmatprep.subr.bf16.mxu0 %v9968_v11  ;;  %v10040_v11 = vld [vmem:[%s10632_s17 + $0x104] ss:$8 sps:$4 sm:$0xff]  }
0x14a3   : > { %9542 = vmatmul.mubr.msk.bf16.vlgmr.msra.gmra.mrb[84].mxu0 %vm5595_vm10, %v8341_v57  ;;  %v10011_v57 = vld [vmem:[%s11708_s10 + $0x70] ss:$8 sps:$4 sm:$0xff]  }
0x14a4   : > { %6498 = vmatprep.mubr.bf16.mxu0 %v10452_v8  ;;  %6467 = vmatpush1.bf16.msra.mxu0 %v9966_v9 }
0x14a5   : > { %6468 = vmatprep.subr.bf16.mxu0 %v9971_v12 }
0x14a8   : > { %6469 = vmatpush1.bf16.msra.mxu0 %v9969_v14  ;;  %v10038_v14 = vld [vmem:[%s10632_s17 + $0x100] ss:$8 sps:$4 sm:$0xff]  }
0x14a9   : > { %6470 = vmatprep.subr.bf16.mxu0 %v9974_v15 }
0x14ac   : > { %6471 = vmatpush1.bf16.msra.mxu0 %v9972_v16 }
0x14ad   : > { %6472 = vmatprep.subr.bf16.mxu0 %v9977_v17  ;;  %v10043_v17 = vld [vmem:[%s10632_s17 + $0x114] ss:$8 sps:$4 sm:$0xff]  }
0x14b0   : > { %6473 = vmatpush1.bf16.msra.mxu0 %v9975_v18 }
0x14b1   : > { %6474 = vmatprep.subr.bf16.mxu0 %v9980_v3 }
0x14b4   : > { %6475 = vmatpush1.bf16.msra.mxu0 %v9978_v19  ;;  %v10041_v19 = vld [vmem:[%s10632_s17 + $0x110] ss:$8 sps:$4 sm:$0xff]  }
0x14b5   : > { %6476 = vmatprep.subr.bf16.mxu0 %v9983_v20  ;;  %v10046_v20 = vld [vmem:[%s10632_s17 + $0x124] ss:$8 sps:$4 sm:$0xff]  }
0x14b8   : > { %6477 = vmatpush1.bf16.msra.mxu0 %v9981_v5 }
0x14b9   : > { %6478 = vmatprep.subr.bf16.mxu0 %v9986_v21  ;;  %v10044_v21 = vld [vmem:[%s10632_s17 + $0x120] ss:$8 sps:$4 sm:$0xff]  }
0x14bc   : > { %6479 = vmatpush1.bf16.msra.mxu0 %v9984_v22 }
0x14bd   : > { %6480 = vmatprep.subr.bf16.mxu0 %v9989_v23  ;;  %v10049_v23 = vld [vmem:[%s10632_s17 + $0x134] ss:$8 sps:$4 sm:$0xff]  }
0x14c0   : > { %6481 = vmatpush1.bf16.msra.mxu0 %v9987_v10 }
0x14c1   : > { %6587 = vmatprep.subr.bf16.mxu0 %v9992_v47 }
0x1566   : > { %v6106_v43 = vpop.f32.mrb[76].mxu0 }
0x1567   : > { %v6112_v45 = vpack.c.bf16 %v6106_v43, %v6106_v43  ;;  %v9531_v48 = vpop.f32.mrb[77].mxu0  ;;  %v10047_v43 = vld [vmem:[%s10632_s17 + $0x130] ss:$8 sps:$4 sm:$0xff]  }
0x1568   : > { %v6109_v50 = vpop.f32.mrb[78].mxu0  ;;  %v10050_v48 = vld [vmem:[%s10632_s17 + $0x140] ss:$8 sps:$4 sm:$0xff]  }
0x1569   : > { %v9532_v51 = vpop.f32.mrb[79].mxu0  ;;  %6254 = vmatmul.mubr.bf16.vlgmr.msra.gmra.mrb[108].mxu1 %v6112_v45  ;;  %v10052_v45 = vld [vmem:[%s10632_s17 + $0x144] ss:$8 sps:$4 sm:$0xff]   ;;  %v10053_v50 = vld [vmem:[%s10632_s17 + $0x150] ss:$8 sps:$4 sm:$0xff]  }
0x156a   : > { %9546 = vmatpush3.bf16.msra.mxu1 %v6070_v2  ;;  %9547 = vmatprep.mubr.msk.bf16.mxu1 %vm10450_vm5, %v10449_v6  ;;  %v10022_v6 = vld [vmem:[%s11708_s10 + $0x124] ss:$8 sps:$4 sm:$0xff]   ;;  %v10035_v2 = vld [vmem:[%s11708_s10 + $0x170] ss:$8 sps:$4 sm:$0xff]  }
0x156b   : > { %6771 = vmatprep.subr.bf16.mxu1 %v10016_v49  ;;  %v10055_v49 = vld [vmem:[%s10632_s17 + $0x154] ss:$8 sps:$4 sm:$0xff]   ;;  %v10058_v51 = vld [vmem:[%s10632_s17 + $0x164] ss:$8 sps:$4 sm:$0xff]  }
0x156e   : > { %v11472_v24 = vpop.f32.mrb[80].mxu0 }
0x156f   : > { %v9537_v25 = vpop.f32.mrb[81].mxu0  ;;  %v6306_v9 = vpack.c.bf16 %v11472_v24, %v11472_v24  ;;  %v10061_v24 = vld [vmem:[%s10632_s17 + $0x174] ss:$8 sps:$4 sm:$0xff]  }
0x1570   : > { %v6303_v27 = vpop.f32.mrb[82].mxu0  ;;  %v10064_v25 = vld [vmem:[%s10632_s17 + $0x184] ss:$8 sps:$4 sm:$0xff]  }
0x1571   : > { %9548 = vmatmul.mubr.msk.bf16.vlgmr.msra.gmra.mrb[112].mxu1 %vm5595_vm10, %v8391_v52  ;;  %v9538_v28 = vpop.f32.mrb[83].mxu0  ;;  %v10056_v52 = vld [vmem:[%s10632_s17 + $0x160] ss:$8 sps:$4 sm:$0xff]   ;;  %v10067_v27 = vld [vmem:[%s10632_s17 + $0x194] ss:$8 sps:$4 sm:$0xff]  }
0x1572   : > { %6772 = vmatpush1.bf16.msra.mxu1 %v10014_v13  ;;  %6803 = vmatprep.mubr.bf16.mxu1 %v10452_v8  ;;  %v10059_v13 = vld [vmem:[%s10632_s17 + $0x170] ss:$8 sps:$4 sm:$0xff]  }
0x1573   : > { %6773 = vmatprep.subr.bf16.mxu1 %v10019_v26  ;;  %v10062_v26 = vld [vmem:[%s10632_s17 + $0x180] ss:$8 sps:$4 sm:$0xff]   ;;  %v10065_v28 = vld [vmem:[%s10632_s17 + $0x190] ss:$8 sps:$4 sm:$0xff]  }
0x1576   : > { %v6362_v30 = vpop.f32.mrb[84].mxu0  ;;  %6774 = vmatpush1.bf16.msra.mxu1 %v10017_v29  ;;  %v10070_v29 = vld [vmem:[%s10632_s17 + $0x1a4] ss:$8 sps:$4 sm:$0xff]  }
0x1577   : > { %v6368_v32 = vpack.c.bf16 %v6362_v30, %v6362_v30  ;;  %v9543_v34 = vpop.f32.mrb[85].mxu0  ;;  %6775 = vmatprep.subr.bf16.mxu1 %v10022_v6  ;;  %v10068_v30 = vld [vmem:[%s10632_s17 + $0x1a0] ss:$8 sps:$4 sm:$0xff]  }
0x1578   : > { %v6365_v36 = vpop.f32.mrb[86].mxu0 }
0x1579   : > { %6499 = vmatmul.mubr.bf16.vlgmr.msra.gmra.mrb[88].mxu0 %v6368_v32  ;;  %v9544_v38 = vpop.f32.mrb[87].mxu0 }
0x157a   : > { %6588 = vmatpush1.bf16.msra.mxu0 %v9990_v31  ;;  %6619 = vmatprep.mubr.bf16.mxu0 %v10452_v8  ;;  %v10076_v38 = vld [vmem:[%s10632_s17 + $0x1c4] ss:$8 sps:$4 sm:$0xff]  }
0x157b   : > { %6589 = vmatprep.subr.bf16.mxu0 %v9995_v33  ;;  %6776 = vmatpush1.bf16.msra.mxu1 %v10020_v35  ;;  %v10073_v33 = vld [vmem:[%s10632_s17 + $0x1b4] ss:$8 sps:$4 sm:$0xff]  }
0x157c   : > { %6777 = vmatprep.subr.bf16.mxu1 %v10025_v37  ;;  %v10071_v37 = vld [vmem:[%s10632_s17 + $0x1b0] ss:$8 sps:$4 sm:$0xff]  }
0x157e   : > { %6590 = vmatpush1.bf16.msra.mxu0 %v9993_v39  ;;  %v10074_v39 = vld [vmem:[%s10632_s17 + $0x1c0] ss:$8 sps:$4 sm:$0xff]  }
0x157f   : > { %6591 = vmatprep.subr.bf16.mxu0 %v9998_v40  ;;  %6778 = vmatpush1.bf16.msra.mxu1 %v10023_v41  ;;  %v10079_v40 = vld [vmem:[%s10632_s17 + $0x1d4] ss:$8 sps:$4 sm:$0xff]   ;;  %v10077_v41 = vld [vmem:[%s10632_s17 + $0x1d0] ss:$8 sps:$4 sm:$0xff]  }
0x1580   : > { %6779 = vmatprep.subr.bf16.mxu1 %v10028_v42  ;;  %v10082_v42 = vld [vmem:[%s10632_s17 + $0x1e4] ss:$8 sps:$4 sm:$0xff]  }
0x1582   : > { %6592 = vmatpush1.bf16.msra.mxu0 %v9996_v44  ;;  %v10080_v44 = vld [vmem:[%s10632_s17 + $0x1e0] ss:$8 sps:$4 sm:$0xff]  }
0x1583   : > { %6593 = vmatprep.subr.bf16.mxu0 %v10001_v46  ;;  %6780 = vmatpush1.bf16.msra.mxu1 %v10026_v53  ;;  %v10085_v46 = vld [vmem:[%s10632_s17 + $0x1f4] ss:$8 sps:$4 sm:$0xff]   ;;  %v10083_v53 = vld [vmem:[%s10632_s17 + $0x1f0] ss:$8 sps:$4 sm:$0xff]  }
0x1584   : > { %6781 = vmatprep.subr.bf16.mxu1 %v10031_v54  ;;  %v6131_v54 = vlaneseq }
0x1586   : > { %6594 = vmatpush1.bf16.msra.mxu0 %v9999_v55  ;;  %v11543_v55 = vshrl.u32 %v6131_v54, 7  ;;  %vm7740_vm13 = vcmp.lt.s32.totalorder %v6131_v54, 256 }
0x1587   : > { %6595 = vmatprep.subr.bf16.mxu0 %v10004_v56  ;;  %6782 = vmatpush1.bf16.msra.mxu1 %v10029_v58  ;;  %v6814_v58 = vld [vmem:[%s10627_s25] sm:$0x3] }
0x1588   : > { %6783 = vmatprep.subr.bf16.mxu1 %v10034_v59  ;;  %v11546_v56 = vsub.s32 0, %v11543_v55  ;;  %v11550_v59 = vsub.s32 1, %v11543_v55 }
0x158a   : > { %6596 = vmatpush1.bf16.msra.mxu0 %v10002_v60  ;;  %v6819_v60 = vrot.slane %v6814_v58, %v11546_v56 }
0x158b   : > { %6597 = vmatprep.subr.bf16.mxu0 %v10007_v61  ;;  %6784 = vmatpush1.bf16.msra.mxu1 %v10032_v62  ;;  %v6823_v62 = vrot.slane %v6814_v58, %v11550_v59  ;;  %v10137_v58 = vld [vmem:[%s10632_s17 + $0x210] ss:$8 sps:$4 sm:$0xff]  }
0x158c   : > { %6785 = vmatprep.subr.bf16.mxu1 %v10037_v63 }
0x158e   : > { %6598 = vmatpush1.bf16.msra.mxu0 %v10005_v0 }
0x158f   : > { %6599 = vmatprep.subr.bf16.mxu0 %v10010_v1  ;;  %6786 = vmatpush1.bf16.msra.mxu1 %v10035_v2 }
0x1590   : > { %7160 = vmatprep.subr.bf16.mxu1 %v10040_v11 }
0x1592   : > { %6600 = vmatpush1.bf16.msra.mxu0 %v10008_v4 }
0x1593   : > { %6601 = vmatprep.subr.bf16.mxu0 %v10013_v7 }
0x1596   : > { %6602 = vmatpush1.bf16.msra.mxu0 %v10011_v57 }
0x1599   : > { %6620 = vmatmul.mubr.bf16.vlgmr.msra.gmra.mrb[92].mxu0 %v6306_v9 }
0x159a   : > { %6876 = vmatprep.mubr.bf16.mxu0 %v10452_v8 }
0x1644   : > { %v6667_v12 = vpop.f32.mrb[112].mxu1 }
0x1645   : > { %v6673_v15 = vpack.c.bf16 %v6667_v12, %v6667_v12  ;;  %v9549_v16 = vpop.f32.mrb[113].mxu1 }
0x1646   : > { %v6670_v18 = vpop.f32.mrb[114].mxu1  ;;  %v6832_v16 = vld [vmem:[%s11709_s22] sm:$0x3] }
0x1647   : > { %v9550_v3 = vpop.f32.mrb[115].mxu1  ;;  %6804 = vmatmul.mubr.bf16.vlgmr.msra.gmra.mrb[116].mxu1 %v6673_v15  ;;  %v8427_v18 = vld [vmem:[%s11709_s22 + $0x2] sm:$0x3] }
0x1648   : > { %7161 = vmatpush1.bf16.msra.mxu1 %v10038_v14  ;;  %v10086_v3 = vld [vmem:[%s10632_s17] ss:$8 sps:$4 sm:$0xff]  }
0x1649   : > { %7162 = vmatprep.subr.bf16.mxu1 %v10043_v17  ;;  %v10088_v17 = vld [vmem:[%s10632_s17 + $0x4] ss:$8 sps:$4 sm:$0xff]  }
0x164c   : > { %v6500_v5 = vpop.f32.mrb[88].mxu0  ;;  %7163 = vmatpush1.bf16.msra.mxu1 %v10041_v19  ;;  %v10091_v19 = vld [vmem:[%s10632_s17 + $0x14] ss:$8 sps:$4 sm:$0xff]  }
0x164d   : > { %v6502_v22 = vpop.f32.mrb[89].mxu0  ;;  %7164 = vmatprep.subr.bf16.mxu1 %v10046_v20  ;;  %v10089_v20 = vld [vmem:[%s10632_s17 + $0x10] ss:$8 sps:$4 sm:$0xff]  }
0x164e   : > { %v6504_v10 = vpop.f32.mrb[90].mxu0 }
0x164f   : > { %v6505_v47 = vpop.f32.mrb[91].mxu0  ;;  %v10100_v10 = vld [vmem:[%s10632_s17 + $0x44] ss:$8 sps:$4 sm:$0xff]  }
0x1650   : > { %7165 = vmatpush1.bf16.msra.mxu1 %v10044_v21  ;;  %v10092_v21 = vld [vmem:[%s10632_s17 + $0x20] ss:$8 sps:$4 sm:$0xff]  }
0x1651   : > { %7166 = vmatprep.subr.bf16.mxu1 %v10049_v23  ;;  %v10095_v23 = vld [vmem:[%s10632_s17 + $0x30] ss:$8 sps:$4 sm:$0xff]   ;;  %v10098_v47 = vld [vmem:[%s10632_s17 + $0x40] ss:$8 sps:$4 sm:$0xff]  }
0x1654   : > { %7167 = vmatpush1.bf16.msra.mxu1 %v10047_v43  ;;  %v10103_v43 = vld [vmem:[%s10632_s17 + $0x54] ss:$8 sps:$4 sm:$0xff]  }
0x1655   : > { %7168 = vmatprep.subr.bf16.mxu1 %v10052_v45  ;;  %v10101_v45 = vld [vmem:[%s10632_s17 + $0x50] ss:$8 sps:$4 sm:$0xff]  }
0x1658   : > { %7169 = vmatpush1.bf16.msra.mxu1 %v10050_v48  ;;  %v10106_v48 = vld [vmem:[%s10632_s17 + $0x64] ss:$8 sps:$4 sm:$0xff]  }
0x1659   : > { %7170 = vmatprep.subr.bf16.mxu1 %v10055_v49  ;;  %v10104_v49 = vld [vmem:[%s10632_s17 + $0x60] ss:$8 sps:$4 sm:$0xff]  }
0x165c   : > { %7171 = vmatpush1.bf16.msra.mxu1 %v10053_v50  ;;  %v10109_v50 = vld [vmem:[%s10632_s17 + $0x74] ss:$8 sps:$4 sm:$0xff]  }
0x165d   : > { %7172 = vmatprep.subr.bf16.mxu1 %v10058_v51  ;;  %v10107_v51 = vld [vmem:[%s10632_s17 + $0x70] ss:$8 sps:$4 sm:$0xff]  }
0x1660   : > { %7173 = vmatpush1.bf16.msra.mxu1 %v10056_v52  ;;  %v10112_v52 = vld [vmem:[%s10632_s17 + $0x84] ss:$8 sps:$4 sm:$0xff]  }
0x1661   : > { %7174 = vmatprep.subr.bf16.mxu1 %v10061_v24  ;;  %v10110_v24 = vld [vmem:[%s10632_s17 + $0x80] ss:$8 sps:$4 sm:$0xff]  }
0x1664   : > { %7175 = vmatpush1.bf16.msra.mxu1 %v10059_v13  ;;  %v10115_v13 = vld [vmem:[%s10632_s17 + $0x94] ss:$8 sps:$4 sm:$0xff]  }
0x1665   : > { %7176 = vmatprep.subr.bf16.mxu1 %v10064_v25  ;;  %v10113_v25 = vld [vmem:[%s10632_s17 + $0x90] ss:$8 sps:$4 sm:$0xff]  }
0x1668   : > { %7177 = vmatpush1.bf16.msra.mxu1 %v10062_v26  ;;  %v10118_v26 = vld [vmem:[%s10632_s17 + $0xa4] ss:$8 sps:$4 sm:$0xff]  }
0x1669   : > { %7178 = vmatprep.subr.bf16.mxu1 %v10067_v27  ;;  %v10116_v27 = vld [vmem:[%s10632_s17 + $0xa0] ss:$8 sps:$4 sm:$0xff]  }
0x166c   : > { %v6621_v6 = vpop.f32.mrb[92].mxu0  ;;  %7179 = vmatpush1.bf16.msra.mxu1 %v10065_v28  ;;  %v10121_v28 = vld [vmem:[%s10632_s17 + $0xb4] ss:$8 sps:$4 sm:$0xff]  }
0x166d   : > { %v6622_v31 = vadd.f32 %v6621_v6, %v6500_v5  ;;  %v6623_v32 = vpop.f32.mrb[93].mxu0  ;;  %7180 = vmatprep.subr.bf16.mxu1 %v10070_v29  ;;  %v10094_v5 = vld [vmem:[%s10632_s17 + $0x24] ss:$8 sps:$4 sm:$0xff]   ;;  %v10119_v29 = vld [vmem:[%s10632_s17 + $0xb0] ss:$8 sps:$4 sm:$0xff]  }
0x166e   : > { %v6624_v34 = vadd.f32 %v6623_v32, %v6502_v22  ;;  %v6625_v35 = vpop.f32.mrb[94].mxu0  ;;  %v10097_v22 = vld [vmem:[%s10632_s17 + $0x34] ss:$8 sps:$4 sm:$0xff]   ;;  %v10124_v6 = vld [vmem:[%s10632_s17 + $0xc4] ss:$8 sps:$4 sm:$0xff]  }
0x166f   : > { %v6626_v36 = vpop.f32.mrb[95].mxu0  ;;  %v10125_v32 = vld [vmem:[%s10632_s17 + $0xd0] ss:$8 sps:$4 sm:$0xff]   ;;  %v10133_v35 = vld [vmem:[%s10632_s17 + $0xf4] ss:$8 sps:$4 sm:$0xff]  }
0x1670   : > { %7181 = vmatpush1.bf16.msra.mxu1 %v10068_v30  ;;  %v10122_v30 = vld [vmem:[%s10632_s17 + $0xc0] ss:$8 sps:$4 sm:$0xff]   ;;  %v10131_v36 = vld [vmem:[%s10632_s17 + $0xf0] ss:$8 sps:$4 sm:$0xff]  }
0x1671   : > { %7182 = vmatprep.subr.bf16.mxu1 %v10073_v33  ;;  %v10130_v33 = vld [vmem:[%s10632_s17 + $0xe4] ss:$8 sps:$4 sm:$0xff]  }
0x1674   : > { %7183 = vmatpush1.bf16.msra.mxu1 %v10071_v37  ;;  %v10136_v37 = vld [vmem:[%s10632_s17 + $0x204] ss:$8 sps:$4 sm:$0xff]  }
0x1675   : > { %7184 = vmatprep.subr.bf16.mxu1 %v10076_v38 }
0x1678   : > { %7185 = vmatpush1.bf16.msra.mxu1 %v10074_v39 }
0x1679   : > { %7186 = vmatprep.subr.bf16.mxu1 %v10079_v40 }
0x167c   : > { %7187 = vmatpush1.bf16.msra.mxu1 %v10077_v41 }
0x167d   : > { %7188 = vmatprep.subr.bf16.mxu1 %v10082_v42  ;;  %v10134_v42 = vld [vmem:[%s10632_s17 + $0x200] ss:$8 sps:$4 sm:$0xff]  }
0x1680   : > { %7189 = vmatpush1.bf16.msra.mxu1 %v10080_v44 }
0x1681   : > { %7190 = vmatprep.subr.bf16.mxu1 %v10085_v46 }
0x1684   : > { %7191 = vmatpush1.bf16.msra.mxu1 %v10083_v53  ;;  %v10139_v53 = vld [vmem:[%s10632_s17 + $0x214] ss:$8 sps:$4 sm:$0xff]  }
0x171a   : > { %v6805_v61 = vpop.f32.mrb[116].mxu1 }
0x171b   : > { %v6812_v63 = vadd.f32 %v6805_v61, %v6622_v31  ;;  %v6807_v0 = vpop.f32.mrb[117].mxu1  ;;  %v10127_v31 = vld [vmem:[%s10632_s17 + $0xd4] ss:$8 sps:$4 sm:$0xff]  }
0x171c   : > { %v6813_v1 = vadd.f32 %v6807_v0, %v6624_v34  ;;  %v6809_v2 = vpop.f32.mrb[118].mxu1  ;;  %v10128_v34 = vld [vmem:[%s10632_s17 + $0xe0] ss:$8 sps:$4 sm:$0xff]  }
0x171d   : > { %v6826_v4 = vadd.f32 %v6819_v60, %v6812_v63  ;;  %v6810_v7 = vpop.f32.mrb[119].mxu1  ;;  %v10142_v60 = vld [vmem:[%s10632_s17 + $0x224] ss:$8 sps:$4 sm:$0xff]  }
0x171e   : > { %v6827_v57 = vadd.f32 %v6823_v62, %v6813_v1  ;;  %v10145_v7 = vld [vmem:[%s10632_s17 + $0x234] ss:$8 sps:$4 sm:$0xff]  }
0x171f   : > { %v6828_v9 = vmax.f32 %v6826_v4, 0.0  ;;  %v10140_v4 = vld [vmem:[%s10632_s17 + $0x220] ss:$8 sps:$4 sm:$0xff]  }
0x1720   : > { %v6829_v11 = vmax.f32 %v6827_v57, 0.0  ;;  %v10143_v57 = vld [vmem:[%s10632_s17 + $0x230] ss:$8 sps:$4 sm:$0xff]  }
0x1721   : > { %v6830_v12 = vpack.c.bf16 %v6828_v9, %v6828_v9  ;;  %v10148_v9 = vld [vmem:[%s10632_s17 + $0x244] ss:$8 sps:$4 sm:$0xff]  }
0x1722   : > { %v6831_v14 = vpack.c.bf16 %v6829_v11, %v6829_v11  ;;  %v8526_v11 = vld [vmem:[%s11709_s22 + $0x4] sm:$0x3] }
0x1723   : > { %v11554_v15 = vsel %vm6837_vm11, %v6830_v12, 0  ;;  %v10146_v12 = vld [vmem:[%s10632_s17 + $0x240] ss:$8 sps:$4 sm:$0xff]  }
0x1724   : > { %8425 = vmatprep.subr.msk.bf16.mxu0 %vm6837_vm11, %v6831_v14  ;;  %8527 = vmatprep.subr.msk.bf16.mxu1 %vm6837_vm11, %v6831_v14 }
0x1725   : > { %6845 = vmatpush1.bf16.msra.mxu0 %v11554_v15 }
0x1726   : > { %8428 = vmatprep.subr.msk.bf16.mxu0 %vm6837_vm11, %v6831_v14  ;;  %v10151_v14 = vld [vmem:[%s10632_s17 + $0x254] ss:$8 sps:$4 sm:$0xff]  }
0x1728   : > { %8426 = vmatmul.mubr.msk.bf16.vlgmr.msra.gmra.mrb[96].mxu0 %vm6833_vm12, %v6832_v16  ;;  %v10152_v16 = vld [vmem:[%s10632_s17 + $0x260] ss:$8 sps:$4 sm:$0xff]  }
0x1729   : > { %6925 = vmatpush1.bf16.msra.mxu0 %v11554_v15  ;;  %6956 = vmatprep.mubr.bf16.mxu0 %v10452_v8 }
0x172a   : > { %7361 = vmatprep.subr.bf16.mxu0 %v10088_v17  ;;  %v10157_v17 = vld [vmem:[%s10632_s17 + $0x274] ss:$8 sps:$4 sm:$0xff]  }
0x1730   : > { %8429 = vmatmul.mubr.msk.bf16.vlgmr.msra.gmra.mrb[100].mxu0 %vm6833_vm12, %v8427_v18  ;;  %v10155_v18 = vld [vmem:[%s10632_s17 + $0x270] ss:$8 sps:$4 sm:$0xff]  }
0x1731   : > { %7362 = vmatpush1.bf16.msra.mxu0 %v10086_v3  ;;  %v10160_v3 = vld [vmem:[%s10632_s17 + $0x284] ss:$8 sps:$4 sm:$0xff]  }
0x1732   : > { %7363 = vmatprep.subr.bf16.mxu0 %v10091_v19  ;;  %v10158_v19 = vld [vmem:[%s10632_s17 + $0x280] ss:$8 sps:$4 sm:$0xff]  }
0x1735   : > { %7364 = vmatpush1.bf16.msra.mxu0 %v10089_v20  ;;  %v10163_v20 = vld [vmem:[%s10632_s17 + $0x294] ss:$8 sps:$4 sm:$0xff]  }
0x1736   : > { %7365 = vmatprep.subr.bf16.mxu0 %v10094_v5  ;;  %v10161_v5 = vld [vmem:[%s10632_s17 + $0x290] ss:$8 sps:$4 sm:$0xff]  }
0x1739   : > { %7366 = vmatpush1.bf16.msra.mxu0 %v10092_v21  ;;  %v10166_v21 = vld [vmem:[%s10632_s17 + $0x2a4] ss:$8 sps:$4 sm:$0xff]  }
0x173a   : > { %7367 = vmatprep.subr.bf16.mxu0 %v10097_v22  ;;  %v10164_v22 = vld [vmem:[%s10632_s17 + $0x2a0] ss:$8 sps:$4 sm:$0xff]  }
0x173d   : > { %7368 = vmatpush1.bf16.msra.mxu0 %v10095_v23  ;;  %v10169_v23 = vld [vmem:[%s10632_s17 + $0x2b4] ss:$8 sps:$4 sm:$0xff]  }
0x173e   : > { %7369 = vmatprep.subr.bf16.mxu0 %v10100_v10  ;;  %v10167_v10 = vld [vmem:[%s10632_s17 + $0x2b0] ss:$8 sps:$4 sm:$0xff]  }
0x1741   : > { %7370 = vmatpush1.bf16.msra.mxu0 %v10098_v47  ;;  %v10172_v47 = vld [vmem:[%s10632_s17 + $0x2c4] ss:$8 sps:$4 sm:$0xff]  }
0x1742   : > { %7371 = vmatprep.subr.bf16.mxu0 %v10103_v43  ;;  %v10170_v43 = vld [vmem:[%s10632_s17 + $0x2c0] ss:$8 sps:$4 sm:$0xff]  }
0x1745   : > { %7372 = vmatpush1.bf16.msra.mxu0 %v10101_v45  ;;  %v10175_v45 = vld [vmem:[%s10632_s17 + $0x2d4] ss:$8 sps:$4 sm:$0xff]  }
0x1746   : > { %7373 = vmatprep.subr.bf16.mxu0 %v10106_v48  ;;  %v10173_v48 = vld [vmem:[%s10632_s17 + $0x2d0] ss:$8 sps:$4 sm:$0xff]  }
0x1749   : > { %7374 = vmatpush1.bf16.msra.mxu0 %v10104_v49  ;;  %v10176_v49 = vld [vmem:[%s10632_s17 + $0x2e0] ss:$8 sps:$4 sm:$0xff]  }
0x174a   : > { %7375 = vmatprep.subr.bf16.mxu0 %v10109_v50  ;;  %v10178_v50 = vld [vmem:[%s10632_s17 + $0x2e4] ss:$8 sps:$4 sm:$0xff]  }
0x174d   : > { %7376 = vmatpush1.bf16.msra.mxu0 %v10107_v51  ;;  %v10181_v51 = vld [vmem:[%s10632_s17 + $0x2f4] ss:$8 sps:$4 sm:$0xff]  }
0x174e   : > { %7377 = vmatprep.subr.bf16.mxu0 %v10112_v52  ;;  %v10179_v52 = vld [vmem:[%s10632_s17 + $0x2f0] ss:$8 sps:$4 sm:$0xff]  }
0x1751   : > { %7378 = vmatpush1.bf16.msra.mxu0 %v10110_v24 }
0x1752   : > { %7379 = vmatprep.subr.bf16.mxu0 %v10115_v13 }
0x1755   : > { %7380 = vmatpush1.bf16.msra.mxu0 %v10113_v25 }
0x1756   : > { %7381 = vmatprep.subr.bf16.mxu0 %v10118_v26 }
0x1759   : > { %7382 = vmatpush1.bf16.msra.mxu0 %v10116_v27 }
0x175a   : > { %7383 = vmatprep.subr.bf16.mxu0 %v10121_v28 }
0x175d   : > { %7384 = vmatpush1.bf16.msra.mxu0 %v10119_v29 }
0x175e   : > { %7385 = vmatprep.subr.bf16.mxu0 %v10124_v6 }
0x1761   : > { %7386 = vmatpush1.bf16.msra.mxu0 %v10122_v30 }
0x1762   : > { %7387 = vmatprep.subr.bf16.mxu0 %v10127_v31 }
0x1765   : > { %7388 = vmatpush1.bf16.msra.mxu0 %v10125_v32  ;;  %v6129_v32 = vld [vmem:[%s11710_s2] sm:$0x3] }
0x1766   : > { %7389 = vmatprep.subr.bf16.mxu0 %v10130_v33  ;;  %v6134_v33 = vrot.slane %v6129_v32, %v11546_v56 }
0x1769   : > { %7390 = vmatpush1.bf16.msra.mxu0 %v10128_v34  ;;  %v6138_v34 = vrot.slane %v6129_v32, %v11550_v59 }
0x176a   : > { %7391 = vmatprep.subr.bf16.mxu0 %v10133_v35  ;;  %v7686_v35 = vld [vmem:[%s10637_s29] sm:$0x3] }
0x176d   : > { %7392 = vmatpush1.bf16.msra.mxu0 %v10131_v36 }
0x176e   : > { %7643 = vmatprep.subr.bf16.mxu0 %v10136_v37  ;;  %v7691_v37 = vrot.slane %v7686_v35, %v11546_v56 }
0x17fb   : > { %v6878_v38 = vpop.f32.mrb[96].mxu0 }
0x17fc   : > { %v6880_v39 = vpop.f32.mrb[97].mxu0  ;;  %v6885_v44 = vpack.c.bf16 %v6878_v38, %v6878_v38 }
0x17fd   : > { %v6886_v40 = vpack.c.bf16 %v6880_v39, %v6880_v39  ;;  %v6882_v41 = vpop.f32.mrb[98].mxu0 }
0x17fe   : > { %v6883_v46 = vpop.f32.mrb[99].mxu0 }
0x17ff   : > { %7393 = vmatprep.mubr.bf16.mxu0 %v6886_v40  ;;  %v7695_v40 = vrot.slane %v7686_v35, %v11550_v59 }
0x1800   : > { %7394 = vmatmul.mubr.bf16.vlgmr.msra.gmra.mrb[104].mxu0 %v6885_v44 }
0x1801   : > { %7644 = vmatpush1.bf16.msra.mxu0 %v10134_v42 }
0x1802   : > { %7645 = vmatprep.subr.bf16.mxu0 %v10139_v53 }
0x1803   : > { %v6958_v61 = vpop.f32.mrb[100].mxu0 }
0x1804   : > { %v6960_v62 = vpop.f32.mrb[101].mxu0  ;;  %v6965_v1 = vpack.c.bf16 %v6958_v61, %v6958_v61 }
0x1805   : > { %v6966_v63 = vpack.c.bf16 %v6960_v62, %v6960_v62  ;;  %v6962_v0 = vpop.f32.mrb[102].mxu0  ;;  %7646 = vmatpush1.bf16.msra.mxu0 %v10137_v58 }
0x1806   : > { %v6963_v2 = vpop.f32.mrb[103].mxu0  ;;  %7647 = vmatprep.subr.bf16.mxu0 %v10142_v60 }
0x1807   : > { %7192 = vmatprep.mubr.bf16.mxu1 %v6966_v63 }
0x1808   : > { %7193 = vmatmul.mubr.bf16.vlgmr.msra.gmra.mrb[108].mxu1 %v6965_v1 }
0x1809   : > { %7408 = vmatpush1.bf16.msra.mxu1 %v11554_v15  ;;  %7439 = vmatprep.mubr.bf16.mxu1 %v10452_v8  ;;  %v10149_v15 = vld [vmem:[%s10632_s17 + $0x250] ss:$8 sps:$4 sm:$0xff]   ;;  %v10154_v8 = vld [vmem:[%s10632_s17 + $0x264] ss:$8 sps:$4 sm:$0xff]  }
0x180a   : > { %7648 = vmatpush1.bf16.msra.mxu0 %v10140_v4 }
0x180b   : > { %7649 = vmatprep.subr.bf16.mxu0 %v10145_v7 }
0x180e   : > { %7650 = vmatpush1.bf16.msra.mxu0 %v10143_v57  ;;  %v10453_v57 = vmov 1966171168  }
0x180f   : > { %7651 = vmatprep.subr.bf16.mxu0 %v10148_v9  ;;  %v7724_v9 = vunpack.c.l.s4 %v10453_v57 }
0x1810   : > { %8528 = vmatmul.mubr.msk.bf16.vlgmr.msra.gmra.mrb[120].mxu1 %vm6833_vm12, %v8526_v11 }
0x1812   : > { %7652 = vmatpush1.bf16.msra.mxu0 %v10146_v12 }
0x1813   : > { %7653 = vmatprep.subr.bf16.mxu0 %v10151_v14 }
0x1816   : > { %7654 = vmatpush1.bf16.msra.mxu0 %v10149_v15 }
0x1817   : > { %7655 = vmatprep.subr.bf16.mxu0 %v10154_v8  ;;  %v7725_v8 = vunpack.c.0.s8 %v7724_v9 }
0x181a   : > { %7656 = vmatpush1.bf16.msra.mxu0 %v10152_v16 }
0x181b   : > { %7657 = vmatprep.subr.bf16.mxu0 %v10157_v17 }
0x181e   : > { %7658 = vmatpush1.bf16.msra.mxu0 %v10155_v18 }
0x181f   : > { %7659 = vmatprep.subr.bf16.mxu0 %v10160_v3 }
0x1822   : > { %7660 = vmatpush1.bf16.msra.mxu0 %v10158_v19  ;;  %v7728_v19 = vsub.s32 %v7725_v8, %v11543_v55 }
0x1823   : > { %7661 = vmatprep.subr.bf16.mxu0 %v10163_v20 }
0x1826   : > { %7662 = vmatpush1.bf16.msra.mxu0 %v10161_v5 }
0x1827   : > { %7663 = vmatprep.subr.bf16.mxu0 %v10166_v21 }
0x182a   : > { %7664 = vmatpush1.bf16.msra.mxu0 %v10164_v22 }
0x182b   : > { %7665 = vmatprep.subr.bf16.mxu0 %v10169_v23 }
0x182e   : > { %7666 = vmatpush1.bf16.msra.mxu0 %v10167_v10 }
0x182f   : > { %7667 = vmatprep.subr.bf16.mxu0 %v10172_v47 }
0x1832   : > { %7668 = vmatpush1.bf16.msra.mxu0 %v10170_v43 }
0x1833   : > { %7669 = vmatprep.subr.bf16.mxu0 %v10175_v45 }
0x1836   : > { %7670 = vmatpush1.bf16.msra.mxu0 %v10173_v48 }
0x1837   : > { %7671 = vmatprep.subr.bf16.mxu0 %v10178_v50 }
0x183a   : > { %7672 = vmatpush1.bf16.msra.mxu0 %v10176_v49 }
0x183b   : > { %7673 = vmatprep.subr.bf16.mxu0 %v10181_v51 }
0x183e   : > { %7674 = vmatpush1.bf16.msra.mxu0 %v10179_v52 }
0x18db   : > { %v7194_v24 = vpop.f32.mrb[108].mxu1 }
0x18dc   : > { %v7196_v13 = vpop.f32.mrb[109].mxu1  ;;  %v9557_v36 = vadd.f32 %v7194_v24, %v6134_v33 }
0x18dd   : > { %v7198_v25 = vpop.f32.mrb[110].mxu1  ;;  %v9560_v38 = vadd.f32 %v7196_v13, %v6138_v34 }
0x18de   : > { %v7199_v26 = vpop.f32.mrb[111].mxu1 }
0x18e3   : > { %v7441_v27 = vpop.f32.mrb[120].mxu1 }
0x18e4   : > { %v7443_v28 = vpop.f32.mrb[121].mxu1  ;;  %v7448_v30 = vpack.c.bf16 %v7441_v27, %v7441_v27 }
0x18e5   : > { %v7449_v29 = vpack.c.bf16 %v7443_v28, %v7443_v28  ;;  %v7445_v6 = vpop.f32.mrb[122].mxu1 }
0x18e6   : > { %v7446_v31 = vpop.f32.mrb[123].mxu1 }
0x18e7   : > { %7675 = vmatprep.mubr.bf16.mxu0 %v7449_v29 }
0x18e8   : > { %7676 = vmatmul.mubr.bf16.vlgmr.msra.gmra.mrb[104].mxu0 %v7448_v30 }
0x19bb   : > { %v7677_v39 = vpop.f32.mrb[104].mxu0 }
0x19bc   : > { %v9558_v41 = vadd.f32 %v9557_v36, %v7677_v39  ;;  %v7679_v42 = vpop.f32.mrb[105].mxu0 }
0x19bd   : > { %v9561_v44 = vadd.f32 %v9560_v38, %v7679_v42  ;;  %v7681_v46 = vpop.f32.mrb[106].mxu0 }
0x19be   : > { %v9559_v53 = vadd.f32 %v9558_v41, %v7691_v37  ;;  %v7682_v58 = vpop.f32.mrb[107].mxu0 }
0x19bf   : > { %v9562_v60 = vadd.f32 %v9561_v44, %v7695_v40 }
0x19c0   : > { %v7702_v61 = vmax.f32 %v9559_v53, 0.0 }
0x19c1   : > { %v7703_v62 = vmax.f32 %v9562_v60, 0.0 }
0x19c2   : > { %v7704_v63 = vsel %vm5600_vm9, %v7702_v61, 0.0 }
0x19c3   : > { %v7705_v0 = vrot.slane %v7704_v63, 4  ;;  %v7711_v1 = vsel %vm5600_vm9, %v7703_v62, 0.0 }
0x19c4   : > { %v7712_v2 = vrot.slane %v7711_v1, 4 }
0x19c5   : > { %v7706_v56 = vadd.f32 %v7705_v0, %v7704_v63 }
0x19c6   : > { %v7713_v4 = vadd.f32 %v7712_v2, %v7711_v1 }
0x19c7   : > { %v7707_v7 = vrot.slane %v7706_v56, 2 }
0x19c8   : > { %v7714_v59 = vrot.slane %v7713_v4, 2 }
0x19c9   : > { %v7708_v11 = vadd.f32 %v7707_v7, %v7706_v56 }
0x19ca   : > { %v7715_v12 = vadd.f32 %v7714_v59, %v7713_v4 }
0x19cb   : > { %v7709_v14 = vrot.slane %v7708_v11, 1 }
0x19cc   : > { %v7716_v15 = vrot.slane %v7715_v12, 1 }
0x19cd   : > { %v7710_v16 = vadd.f32 %v7709_v14, %v7708_v11 }
0x19ce   : > { %v7717_v17 = vadd.f32 %v7716_v15, %v7715_v12 }
0x19cf   : > { %v7718_v18 = vmul.f32 0.25, %v7710_v16 }
0x19d0   : > { %v7719_v3 = vmul.f32 0.25, %v7717_v17 }
0x19d2   : > { %v7722_v20 = vcombine.low %v7718_v18, %v7719_v3 }
0x19d4   : > { %v7729_v5 = vrot.slane %v7722_v20, %v7728_v19 }
0x19d6   : > { %v7736_v21 = vrot.slane %v7729_v5, %v7728_v19 }
0x19d8   : > { %7742 = vst.msk [vmem:[%s1198_s7] sm:$0x3] %vm7740_vm13, %v7736_v21 }
0x19d9 PF: > { %s87_s28 = sadd.s32 1, %s10400_s28  }
0x19da   : > { %p84_p13 = scmp.ge.s32.totalorder %s87_s28, 4  }
0x19dc   :  { %86 = sbr.rel (!%p84_p13) target bundleno = 65 (0x41), region = 317 }
0x19e3   :  { %7762 = vsyncpa [#allocation3], 1 }
0x19e4   :  { %7764 = vsyncpa [#allocation3 + $0x1], 1 }
0x19e5   :  { %7765 = vsyncpa [#allocation5], 1 }
0x19e6   :  { %7766 = vsyncpa [#allocation8], 1 }
0x19e7   :  { %7767 = vsyncpa [#allocation11], 1 }

</bundles_post_ra>
